<compile_context>
chip_gen: v5e
topology: v5e:2x2
jax: 0.10.0
libtpu: 0.0.40
codegen_flags: <defaults>
</compile_context>

<pallas_src>
import math
import functools

import jax
import jax.numpy as jnp
from jax.experimental import pallas as pl
from jax.experimental.pallas import tpu as pltpu


# ----------------------------------------------------------------------------
# Shared math helpers (used both inside the Pallas kernel and in the reference)
# ----------------------------------------------------------------------------
def _dot(a, b):
    """bf16-in / f32-accumulate matmul (native MXU rate)."""
    return jnp.dot(a.astype(jnp.bfloat16), b.astype(jnp.bfloat16),
                   preferred_element_type=jnp.float32)


def _dot_nt(a, b):
    """a @ b.T with bf16 inputs / f32 accumulation, without materializing b.T."""
    return jax.lax.dot_general(a.astype(jnp.bfloat16), b.astype(jnp.bfloat16),
                               (((1,), (1,)), ((), ())),
                               preferred_element_type=jnp.float32)


def _layer_norm(x, gamma, beta, eps=1e-5):
    mean = jnp.mean(x, axis=-1, keepdims=True)
    var = jnp.mean(jnp.square(x - mean), axis=-1, keepdims=True)
    return (x - mean) * jax.lax.rsqrt(var + eps) * gamma + beta


def _masked_softmax(x, m, approx_recip=False):
    # matches masked_softmax(x, m, axis=2) of the PyTorch code (axis is last here)
    x = jnp.clip(x, -15.0, 15.0)
    x = x * m
    e_x = jnp.exp(x - jnp.max(x, axis=-1, keepdims=True))
    e_x = e_x * m
    denom = jnp.sum(e_x, axis=-1, keepdims=True) + 1e-6
    if approx_recip:
        # EUP reciprocal: moves the divide off the VALU; only used inside the kernel.
        return e_x * pl.reciprocal(denom, approx=True)
    return e_x / denom


def _mha_core(q_all, k_all, v_all, residual, masks, fcw, fcb, ln_g, ln_b,
              n_head, d, inv_temp, n_b, lq, lk, attn_ref=None):
    """Multi-head attention on already-projected (fused, bf16) q/k/v.

    q_all: (n_b*lq, H*d), k_all/v_all: (n_b*lk, H*d), masks: (n_b, lq, lk) or a shared
    (lq, lk) mask, residual: (n_b*lq, d) f32.  The fc projection is accumulated per head
    as sum_h head_h @ fcw[h*d:(h+1)*d, :]  (== concat(heads) @ fcw) so no lane concats
    are needed and per-(b, h) temporaries die immediately.  If attn_ref is given, the
    softmax probabilities are written directly into attn_ref[b, :, h*lk:(h+1)*lk].
    """
    shared_mask = masks.ndim == 2
    per_b = []
    # NOTE: n_b (= bt) is capped by _pick_block_b; with much larger bt convert this
    # static loop to lax.fori_loop to bound live ranges explicitly.
    for b in range(n_b):
        q_b = q_all[b * lq:(b + 1) * lq]
        k_b = k_all[b * lk:(b + 1) * lk]
        v_b = v_all[b * lk:(b + 1) * lk]
        m_b = masks if shared_mask else masks[b]
        acc = None
        for h in range(n_head):
            sl = slice(h * d, (h + 1) * d)
            scores = _dot_nt(q_b[:, sl], k_b[:, sl]) * inv_temp
            a = _masked_softmax(scores, m_b, approx_recip=True)
            if attn_ref is not None:
                attn_ref[b, :, h * lk:(h + 1) * lk] = a      # direct per-head write
            head = _dot(a, v_b[:, sl])                       # (lq, d)
            contrib = _dot(head, fcw[sl, :])                 # head @ fc-slice
            acc = contrib if acc is None else acc + contrib
        per_b.append(acc)
    fc_out = per_b[0] if n_b == 1 else jnp.concatenate(per_b, axis=0)
    return _layer_norm(fc_out + fcb + residual, ln_g, ln_b)


def get_timing_signal(length, channels, min_timescale=1.0, max_timescale=10000.0):
    position = jnp.arange(length, dtype=jnp.float32)
    num_timescales = channels // 2
    log_timescale_increment = math.log(float(max_timescale) / float(min_timescale)) / (
        float(num_timescales) - 1)
    inv_timescales = min_timescale * jnp.exp(
        jnp.arange(num_timescales, dtype=jnp.float32) * -log_timescale_increment)
    scaled_time = position[:, None] * inv_timescales[None, :]
    signal = jnp.concatenate([jnp.sin(scaled_time), jnp.cos(scaled_time)], axis=1)
    if channels % 2:
        signal = jnp.pad(signal, ((0, 0), (0, channels % 2)))
    return signal.astype(jnp.float32)                             # (L, C)


# ----------------------------------------------------------------------------
# The Pallas kernel: one grid step = `bt` batch elements, everything fused.
# ----------------------------------------------------------------------------
def decoder_block_kernel(
    # data refs
    x_ref, sig_ref, mask_ref, samask_ref, obs_ref, omask_ref, node_ref, nmask_ref,
    # self_att (fused qkv) weights
    s_wqkv, s_fcw, s_fcb, s_lg, s_lb,
    # fused obs+node query projection, obs fused K+V, obs fc/ln
    on_wq, o_wkv, o_fcw, o_fcb, o_lg, o_lb,
    # node fused K+V, node fc/ln
    n_wkv, n_fcw, n_fcb, n_lg, n_lb,
    # FFN + norms
    f0w, f0b, f1w, f1b, f2w, f2b, n1g, n1b, n2g, n2b,
    # outputs
    outpk_ref, obsattn_ref,
    *, n_head, d, bt, L, Lo, Ln):
    inv_temp = 1.0 / (d ** 0.5)
    hd = n_head * d

    # ---- PosEncoder --------------------------------------------------------
    x = (x_ref[...] + sig_ref[...]).reshape(bt * L, d)        # (Bt*L, D)
    mask_col = mask_ref[...].reshape(bt * L, 1)               # (Bt*L, 1)

    # bf16 (0/1) masks -> f32 once per block
    samask = samask_ref[...].astype(jnp.float32)              # (L, L) shared or (bt, L, L)
    omask = omask_ref[...].astype(jnp.float32)
    nmask = nmask_ref[...].astype(jnp.float32)

    # ---- self attention ----------------------------------------------------
    res = x
    qkv = _dot(x, s_wqkv[...]).astype(jnp.bfloat16)           # one wide (D -> 3*H*D) matmul
    out = _mha_core(qkv[:, :hd], qkv[:, hd:2 * hd], qkv[:, 2 * hd:], x,
                    samask, s_fcw[...], s_fcb[...], s_lg[...], s_lb[...],
                    n_head, d, inv_temp, bt, L, L)
    out_self = out * mask_col
    out = out_self + res                                      # layer_dropout (eval)

    # ---- norm_1 + obs / node cross attention + FFN_0 ------------------------
    res = out
    out_n = _layer_norm(out, n1g[...], n1b[...])

    q_on = _dot(out_n, on_wq[...]).astype(jnp.bfloat16)                       # fused obs+node queries
    kv_o = _dot(obs_ref[...].reshape(bt * Lo, d), o_wkv[...]).astype(jnp.bfloat16)
    kv_n = _dot(node_ref[...].reshape(bt * Ln, d), n_wkv[...]).astype(jnp.bfloat16)

    out_obs = _mha_core(q_on[:, :hd], kv_o[:, :hd], kv_o[:, hd:], out_n,
                        omask, o_fcw[...], o_fcb[...], o_lg[...], o_lb[...],
                        n_head, d, inv_temp, bt, L, Lo, attn_ref=obsattn_ref)
    out_node = _mha_core(q_on[:, hd:], kv_n[:, :hd], kv_n[:, hd:], out_n,
                         nmask, n_fcw[...], n_fcb[...], n_lg[...], n_lb[...],
                         n_head, d, inv_temp, bt, L, Ln)

    cat = jnp.concatenate([out_obs, out_node], axis=-1)       # (Bt*L, 2D)
    ff = _dot(cat, f0w[...]) + f0b[...]
    ff = jnp.maximum(ff, 0.0) * mask_col
    out = ff + res                                            # layer_dropout (eval)

    # ---- norm_2 + FFN_1 / FFN_2 --------------------------------------------
    res = out
    o2 = _layer_norm(out, n2g[...], n2b[...])
    o2 = jnp.maximum(_dot(o2, f1w[...]) + f1b[...], 0.0)
    o2 = _dot(o2, f2w[...]) + f2b[...]
    out_final = o2 * mask_col + res                           # layer_dropout (eval)

    # Single packed store [out | out_self | out_obs] -> one (bt, L, 3D) output block /
    # DMA per step instead of three D-wide (heavily masked) stores.
    packed = jnp.concatenate([out_final, out_self, out_obs], axis=-1)
    outpk_ref[...] = packed.reshape(bt, L, 3 * d)


# ----------------------------------------------------------------------------
# Wrapper helpers
# ----------------------------------------------------------------------------
_WEIGHTS_SINGLE_BUFFER_OK = [None]   # probed once: does this JAX accept pl.Buffered(1)?


def prepare_weights(weights):
    """Pre-transpose to (in, out), fuse Q/K/V (and obs+node query) projections, and
    pre-cast matmul weights to bf16.  Biases / LayerNorm params stay f32."""
    (s_wq, s_wk, s_wv, s_fcw, s_fcb, s_lg, s_lb,
     o_wq, o_wk, o_wv, o_fcw, o_fcb, o_lg, o_lb,
     n_wq, n_wk, n_wv, n_fcw, n_fcb, n_lg, n_lb,
     f0w, f0b, f1w, f1b, f2w, f2b, n1g, n1b, n2g, n2b) = weights
    bf = lambda w: w.astype(jnp.bfloat16)
    t = lambda w: bf(w.T)
    s_wqkv = bf(jnp.concatenate([s_wq.T, s_wk.T, s_wv.T], axis=1))   # (D, 3*H*D)
    on_wq = bf(jnp.concatenate([o_wq.T, n_wq.T], axis=1))            # (D, 2*H*D)
    o_wkv = bf(jnp.concatenate([o_wk.T, o_wv.T], axis=1))            # (D, 2*H*D)
    n_wkv = bf(jnp.concatenate([n_wk.T, n_wv.T], axis=1))            # (D, 2*H*D)
    return (s_wqkv, t(s_fcw), s_fcb, s_lg, s_lb,
            on_wq, o_wkv, t(o_fcw), o_fcb, o_lg, o_lb,
            n_wkv, t(n_fcw), n_fcb, n_lg, n_lb,
            t(f0w), f0b, t(f1w), f1b, t(f2w), f2b, n1g, n1b, n2g, n2b)


def _vmem_capacity_bytes():
    try:
        return int(pltpu.get_tpu_info().vmem_capacity_bytes)
    except Exception:
        return 64 << 20          # conservative (v7x-sized) fallback


def _per_step_vmem_bytes(bt, L, Lo, Ln, D, n_head, prepped, shared_samask,
                         single_buffer_weights):
    """Rough per-grid-step VMEM footprint used for bt selection and vmem_limit_bytes."""
    f32, bf16 = 4, 2
    blk_in = bt * L * D * f32 + L * D * f32 + bt * L * f32
    blk_in += (L * L if shared_samask else bt * L * L) * bf16
    blk_in += bt * Lo * D * f32 + bt * L * Lo * bf16
    blk_in += bt * Ln * D * f32 + bt * L * Ln * bf16
    blk_out = bt * L * 3 * D * f32 + bt * L * n_head * Lo * f32
    w_bytes = sum(int(w.size) * w.dtype.itemsize for w in prepped)
    w_mult = 1 if single_buffer_weights else 2
    # rough bound on live intermediates (fused projections, scores, activations)
    inter = bt * L * 5 * n_head * D * bf16
    inter += bt * (Lo + Ln) * 2 * n_head * D * bf16
    inter += bt * L * D * f32 * 10
    inter += bt * L * max(L, Lo, Ln) * f32 * 2
    return 2 * (blk_in + blk_out) + w_mult * w_bytes + inter


def _pick_block_b(B, L, Lo, Ln, D, n_head, prepped, shared_samask,
                  single_buffer_weights, target_rows, vmem_budget_bytes):
    """Largest divisor bt of B such that:
      * the grid keeps >= 2 steps (DMA pipelining; v7x megacore sharding of the
        "parallel" batch axis),
      * the flattened matmul M-dim bt*L stays <= target_rows (512-1024 amortizes the
        ~0.35us per-step overhead; prefer a multiple of 256 on v6e/v7x, 128 on v5e),
      * the per-step footprint fits the VMEM budget (critical on v7x's 64 MiB)."""
    best = 1
    for cand in range(1, B + 1):
        if B % cand:
            continue
        if B >= 2 and B // cand < 2:
            continue
        if cand * L > max(target_rows, L):
            continue
        if _per_step_vmem_bytes(cand, L, Lo, Ln, D, n_head, prepped, shared_samask,
                                single_buffer_weights) > vmem_budget_bytes:
            continue
        best = cand
    return best


# ----------------------------------------------------------------------------
# Wrapper
# ----------------------------------------------------------------------------
def decoder_block_pallas(x, mask, self_att_mask, obs_enc, obs_mask,
                         node_enc, node_mask, weights, n_head,
                         block_b=None, target_rows=512, vmem_budget_bytes=None):
    """self_att_mask may be (B, L, L) or, if identical across the batch (e.g. causal),
    a single shared (L, L) array, which removes its per-batch DMA traffic."""
    B, L, D = x.shape
    Lo = obs_enc.shape[1]
    Ln = node_enc.shape[1]

    prepped = prepare_weights(weights)
    shared_samask = self_att_mask.ndim == 2

    vmem_cap = _vmem_capacity_bytes()
    budget = vmem_budget_bytes if vmem_budget_bytes is not None else int(vmem_cap * 0.55)

    bt = block_b if block_b is not None else _pick_block_b(
        B, L, Lo, Ln, D, n_head, prepped, shared_samask, True, target_rows, budget)
    assert B % bt == 0

    sig = get_timing_signal(L, D)                 # (L, D), shared across the grid
    mask3 = mask[..., None]                       # (B, L, 1)
    # 0/1 masks are exact in bf16 -> halves the dominant per-step mask DMA bytes.
    samask_bf = self_att_mask.astype(jnp.bfloat16)
    omask_bf = obs_mask.astype(jnp.bfloat16)
    nmask_bf = node_mask.astype(jnp.bfloat16)

    if shared_samask:
        samask_spec = pl.BlockSpec((L, L), lambda i: (0, 0))
    else:
        samask_spec = pl.BlockSpec((bt, L, L), lambda i: (i, 0, 0))

    data_specs = [
        pl.BlockSpec((bt, L, D), lambda i: (i, 0, 0)),     # x
        pl.BlockSpec((L, D), lambda i: (0, 0)),            # positional signal (shared)
        pl.BlockSpec((bt, L, 1), lambda i: (i, 0, 0)),     # mask
        samask_spec,                                       # self_att_mask (bf16)
        pl.BlockSpec((bt, Lo, D), lambda i: (i, 0, 0)),    # obs_enc
        pl.BlockSpec((bt, L, Lo), lambda i: (i, 0, 0)),    # obs_mask (bf16)
        pl.BlockSpec((bt, Ln, D), lambda i: (i, 0, 0)),    # node_enc
        pl.BlockSpec((bt, L, Ln), lambda i: (i, 0, 0)),    # node_mask (bf16)
    ]

    out_shape = (
        jax.ShapeDtypeStruct((B, L, 3 * D), jnp.float32),        # [out | out_self | out_obs]
        jax.ShapeDtypeStruct((B, L, n_head * Lo), jnp.float32),  # obs_attention (lane-packed)
    )
    out_specs = (
        pl.BlockSpec((bt, L, 3 * D), lambda i: (i, 0, 0)),
        pl.BlockSpec((bt, L, n_head * Lo), lambda i: (i, 0, 0)),
    )

    kernel = functools.partial(decoder_block_kernel, n_head=n_head, d=D,
                               bt=bt, L=L, Lo=Lo, Ln=Ln)
    args = (x, sig, mask3, samask_bf, obs_enc, omask_bf, node_enc, nmask_bf) + prepped

    def _call(single_buffer_weights):
        weight_specs = []
        for w in prepped:
            idx = (lambda i, nd=w.ndim: (0,) * nd)
            if single_buffer_weights:
                # Constant index_map -> never re-fetched; the 2nd buffer is pure waste.
                weight_specs.append(
                    pl.BlockSpec(w.shape, idx, pipeline_mode=pl.Buffered(1)))
            else:
                weight_specs.append(pl.BlockSpec(w.shape, idx))
        est = _per_step_vmem_bytes(bt, L, Lo, Ln, D, n_head, prepped, shared_samask,
                                   single_buffer_weights)
        vmem_limit = int(min(max(2 * est, 16 << 20), int(vmem_cap * 0.75)))
        return pl.pallas_call(
            kernel,
            out_shape=out_shape,
            grid_spec=pltpu.PrefetchScalarGridSpec(
                num_scalar_prefetch=0,
                grid=(B // bt,),
                in_specs=data_specs + weight_specs,
                out_specs=out_specs,
            ),
            # Independent batch steps: "parallel" lets v7x shard the grid over its two
            # TensorCores (no-op on single-core v5e/v6e).  vmem_limit_bytes is derived
            # from the per-step footprint and clamped below physical VMEM.
            compiler_params=pltpu.CompilerParams(
                dimension_semantics=("parallel",),
                vmem_limit_bytes=vmem_limit),
        )(*args)

    if _WEIGHTS_SINGLE_BUFFER_OK[0] is None:
        try:
            result = _call(True)
            jax.block_until_ready(result)
            _WEIGHTS_SINGLE_BUFFER_OK[0] = True
        except Exception:
            _WEIGHTS_SINGLE_BUFFER_OK[0] = False
            result = _call(False)
    else:
        result = _call(_WEIGHTS_SINGLE_BUFFER_OK[0])

    packed, obs_attn_packed = result
    out = packed[..., :D]
    out_self = packed[..., D:2 * D]
    out_obs = packed[..., 2 * D:]
    # (B, L, H*Lo) -> (H*B, L, Lo), same ordering as PyTorch's mask.repeat(n_head, 1, 1)
    obs_attn = obs_attn_packed.reshape(B, L, n_head, Lo).transpose(2, 0, 1, 3)
    obs_attn = obs_attn.reshape(n_head * B, L, Lo)
    return out, out_self, out_obs, obs_attn


# ----------------------------------------------------------------------------
# Pure-JAX reference (original per-head, per-module weight layout) for validation
# ----------------------------------------------------------------------------
def _ref_mha(q_in, k_in, v_in, mask2d, wq, wk, wv, fcw, fcb, ln_g, ln_b,
             n_head, d, inv_temp):
    residual = q_in
    heads, attns = [], []
    for h in range(n_head):
        q_h = _dot(q_in, wq[h * d:(h + 1) * d, :].T)
        k_h = _dot(k_in, wk[h * d:(h + 1) * d, :].T)
        v_h = _dot(v_in, wv[h * d:(h + 1) * d, :].T)
        scores = _dot_nt(q_h, k_h) * inv_temp
        a = _masked_softmax(scores, mask2d)
        heads.append(_dot(a, v_h))
        attns.append(a)
    out = _dot(jnp.concatenate(heads, axis=-1), fcw.T) + fcb
    out = _layer_norm(out + residual, ln_g, ln_b)
    return out, attns


def decoder_block_reference(x, mask, self_att_mask, obs_enc, obs_mask,
                            node_enc, node_mask, weights, n_head):
    (s_wq, s_wk, s_wv, s_fcw, s_fcb, s_lg, s_lb,
     o_wq, o_wk, o_wv, o_fcw, o_fcb, o_lg, o_lb,
     n_wq, n_wk, n_wv, n_fcw, n_fcb, n_lg, n_lb,
     f0w, f0b, f1w, f1b, f2w, f2b, n1g, n1b, n2g, n2b) = weights
    B, L, D = x.shape
    Lo = obs_enc.shape[1]
    sig = get_timing_signal(L, D)
    inv_temp = 1.0 / (D ** 0.5)
    outs, outselfs, outobss, attns_all = [], [], [], []
    for b in range(B):
        mb = mask[b][:, None]
        out = x[b] + sig
        res = out
        out, _ = _ref_mha(out, out, out, self_att_mask[b],
                          s_wq, s_wk, s_wv, s_fcw, s_fcb, s_lg, s_lb, n_head, D, inv_temp)
        out_self = out * mb
        out = out_self + res
        res = out
        out = _layer_norm(out, n1g, n1b)
        out_obs, attns = _ref_mha(out, obs_enc[b], obs_enc[b], obs_mask[b],
                                  o_wq, o_wk, o_wv, o_fcw, o_fcb, o_lg, o_lb,
                                  n_head, D, inv_temp)
        out_node, _ = _ref_mha(out, node_enc[b], node_enc[b], node_mask[b],
                               n_wq, n_wk, n_wv, n_fcw, n_fcb, n_lg, n_lb,
                               n_head, D, inv_temp)
        cat = jnp.concatenate([out_obs, out_node], axis=-1)
        o2 = jnp.maximum(_dot(cat, f0w.T) + f0b, 0.0) * mb + res
        res = o2
        o3 = _layer_norm(o2, n2g, n2b)
        o3 = jnp.maximum(_dot(o3, f1w.T) + f1b, 0.0)
        o3 = _dot(o3, f2w.T) + f2b
        o3 = o3 * mb + res
        outs.append(o3); outselfs.append(out_self); outobss.append(out_obs)
        attns_all.append(jnp.stack(attns, 0))               # (H, L, Lo)
    obs_attn = jnp.stack(attns_all, 1).reshape(n_head * B, L, Lo)
    return jnp.stack(outs), jnp.stack(outselfs), jnp.stack(outobss), obs_attn


# ----------------------------------------------------------------------------
# Deterministic parameter init (PyTorch conventions)
# ----------------------------------------------------------------------------
def init_attention_params(key, d, n_head):
    k1, k2, k3, k4 = jax.random.split(key, 4)
    std = math.sqrt(2.0 / (d * 2))
    wq = jax.random.normal(k1, (n_head * d, d), jnp.float32) * std
    wk = jax.random.normal(k2, (n_head * d, d), jnp.float32) * std
    wv = jax.random.normal(k3, (n_head * d, d), jnp.float32) * std
    fc_std = math.sqrt(2.0 / (n_head * d + d))              # xavier normal
    fcw = jax.random.normal(k4, (d, n_head * d), jnp.float32) * fc_std
    fcb = jnp.zeros((1, d), jnp.float32)
    ln_g = jnp.ones((1, d), jnp.float32)
    ln_b = jnp.zeros((1, d), jnp.float32)
    return [wq, wk, wv, fcw, fcb, ln_g, ln_b]


def init_linear(key, out_dim, in_dim):
    k1, k2 = jax.random.split(key)
    bound = 1.0 / math.sqrt(in_dim)
    w = jax.random.uniform(k1, (out_dim, in_dim), jnp.float32, -bound, bound)
    b = jax.random.uniform(k2, (1, out_dim), jnp.float32, -bound, bound)
    return w, b


if __name__ == "__main__":
    # Small shapes consistent with the module: ch_num == block_hidden_dim, n_head = 2.
    B, L, Lo, Ln, D, H = 2, 8, 16, 8, 32, 2

    root = jax.random.PRNGKey(0)
    keys = jax.random.split(root, 12)

    x = jax.random.normal(keys[0], (B, L, D), jnp.float32)
    obs_enc = jax.random.normal(keys[1], (B, Lo, D), jnp.float32)
    node_enc = jax.random.normal(keys[2], (B, Ln, D), jnp.float32)

    mask = (jax.random.uniform(keys[3], (B, L)) > 0.2).astype(jnp.float32)
    causal = jnp.tril(jnp.ones((L, L), jnp.float32))           # shared self-attn mask
    self_att_mask_b = jnp.broadcast_to(causal, (B, L, L))      # per-batch copy for reference
    obs_mask = (jax.random.uniform(keys[4], (B, L, Lo)) > 0.2).astype(jnp.float32)
    node_mask = (jax.random.uniform(keys[5], (B, L, Ln)) > 0.2).astype(jnp.float32)

    weights = tuple(
        init_attention_params(keys[6], D, H)      # self_att
        + init_attention_params(keys[7], D, H)    # obs_att
        + init_attention_params(keys[8], D, H)    # node_att
        + list(init_linear(keys[9], D, 2 * D))    # FFN_0
        + list(init_linear(keys[10], D, D))       # FFN_1
        + list(init_linear(keys[11], D, D))       # FFN_2
        + [jnp.ones((1, D), jnp.float32), jnp.zeros((1, D), jnp.float32),   # norm_1
           jnp.ones((1, D), jnp.float32), jnp.zeros((1, D), jnp.float32)]   # norm_2
    )

    out, out_self, out_obs, obs_attn = decoder_block_pallas(
        x, mask, causal, obs_enc, obs_mask, node_enc, node_mask, weights, H)
    jax.block_until_ready((out, out_self, out_obs, obs_attn))

    r_out, r_out_self, r_out_obs, r_obs_attn = decoder_block_reference(
        x, mask, self_att_mask_b, obs_enc, obs_mask, node_enc, node_mask, weights, H)

    # Tolerance budget: bf16-in / f32-accumulate matmuls (vs the module's fp32) plus the
    # EUP approximate reciprocal in the kernel softmax (the reference uses exact divide).
    for a, b in [(out, r_out), (out_self, r_out_self),
                 (out_obs, r_out_obs), (obs_attn, r_obs_attn)]:
        assert a.shape == b.shape, (a.shape, b.shape)
        err = float(jnp.max(jnp.abs(a - b)))
        assert err < 2e-2, err

    print("KERNEL_OK")
</pallas_src>

<mosaic_0001>
module attributes {stable_mosaic.version = 11 : i64} {
  func.func @decoder_block_kernel(%arg0: i32, %arg1: memref<1x8x32xf32, #tpu.memory_space<vmem>>, %arg2: memref<8x32xf32, #tpu.memory_space<vmem>>, %arg3: memref<1x8x1xf32, #tpu.memory_space<vmem>>, %arg4: memref<8x8xbf16, #tpu.memory_space<vmem>>, %arg5: memref<1x16x32xf32, #tpu.memory_space<vmem>>, %arg6: memref<1x8x16xbf16, #tpu.memory_space<vmem>>, %arg7: memref<1x8x32xf32, #tpu.memory_space<vmem>>, %arg8: memref<1x8x8xbf16, #tpu.memory_space<vmem>>, %arg9: memref<32x192xbf16, #tpu.memory_space<vmem>>, %arg10: memref<64x32xbf16, #tpu.memory_space<vmem>>, %arg11: memref<1x32xf32, #tpu.memory_space<vmem>>, %arg12: memref<1x32xf32, #tpu.memory_space<vmem>>, %arg13: memref<1x32xf32, #tpu.memory_space<vmem>>, %arg14: memref<32x128xbf16, #tpu.memory_space<vmem>>, %arg15: memref<32x128xbf16, #tpu.memory_space<vmem>>, %arg16: memref<64x32xbf16, #tpu.memory_space<vmem>>, %arg17: memref<1x32xf32, #tpu.memory_space<vmem>>, %arg18: memref<1x32xf32, #tpu.memory_space<vmem>>, %arg19: memref<1x32xf32, #tpu.memory_space<vmem>>, %arg20: memref<32x128xbf16, #tpu.memory_space<vmem>>, %arg21: memref<64x32xbf16, #tpu.memory_space<vmem>>, %arg22: memref<1x32xf32, #tpu.memory_space<vmem>>, %arg23: memref<1x32xf32, #tpu.memory_space<vmem>>, %arg24: memref<1x32xf32, #tpu.memory_space<vmem>>, %arg25: memref<64x32xbf16, #tpu.memory_space<vmem>>, %arg26: memref<1x32xf32, #tpu.memory_space<vmem>>, %arg27: memref<32x32xbf16, #tpu.memory_space<vmem>>, %arg28: memref<1x32xf32, #tpu.memory_space<vmem>>, %arg29: memref<32x32xbf16, #tpu.memory_space<vmem>>, %arg30: memref<1x32xf32, #tpu.memory_space<vmem>>, %arg31: memref<1x32xf32, #tpu.memory_space<vmem>>, %arg32: memref<1x32xf32, #tpu.memory_space<vmem>>, %arg33: memref<1x32xf32, #tpu.memory_space<vmem>>, %arg34: memref<1x32xf32, #tpu.memory_space<vmem>>, %arg35: memref<1x8x96xf32, #tpu.memory_space<vmem>>, %arg36: memref<1x8x32xf32, #tpu.memory_space<vmem>>) attributes {dimension_semantics = [#tpu.dimension_semantics<parallel>], iteration_bounds = array<i64: 2>, scalar_prefetch = 0 : i64, scratch_operands = 0 : i64, tpu.core_type = #tpu.core_type<tc>, window_params = [{transform_indices = @transform_0, window_bounds = array<i64: 1, 8, 32>}, {pipeline_mode = #tpu.pipeline_mode<synchronous>, transform_indices = @transform_1, window_bounds = array<i64: 8, 32>}, {transform_indices = @transform_2, window_bounds = array<i64: 1, 8, 1>}, {pipeline_mode = #tpu.pipeline_mode<synchronous>, transform_indices = @transform_3, window_bounds = array<i64: 8, 8>}, {transform_indices = @transform_4, window_bounds = array<i64: 1, 16, 32>}, {transform_indices = @transform_5, window_bounds = array<i64: 1, 8, 16>}, {transform_indices = @transform_6, window_bounds = array<i64: 1, 8, 32>}, {transform_indices = @transform_7, window_bounds = array<i64: 1, 8, 8>}, {pipeline_mode = #tpu.pipeline_mode<synchronous>, transform_indices = @transform_8, window_bounds = array<i64: 32, 192>}, {pipeline_mode = #tpu.pipeline_mode<synchronous>, transform_indices = @transform_9, window_bounds = array<i64: 64, 32>}, {pipeline_mode = #tpu.pipeline_mode<synchronous>, transform_indices = @transform_10, window_bounds = array<i64: 1, 32>}, {pipeline_mode = #tpu.pipeline_mode<synchronous>, transform_indices = @transform_11, window_bounds = array<i64: 1, 32>}, {pipeline_mode = #tpu.pipeline_mode<synchronous>, transform_indices = @transform_12, window_bounds = array<i64: 1, 32>}, {pipeline_mode = #tpu.pipeline_mode<synchronous>, transform_indices = @transform_13, window_bounds = array<i64: 32, 128>}, {pipeline_mode = #tpu.pipeline_mode<synchronous>, transform_indices = @transform_14, window_bounds = array<i64: 32, 128>}, {pipeline_mode = #tpu.pipeline_mode<synchronous>, transform_indices = @transform_15, window_bounds = array<i64: 64, 32>}, {pipeline_mode = #tpu.pipeline_mode<synchronous>, transform_indices = @transform_16, window_bounds = array<i64: 1, 32>}, {pipeline_mode = #tpu.pipeline_mode<synchronous>, transform_indices = @transform_17, window_bounds = array<i64: 1, 32>}, {pipeline_mode = #tpu.pipeline_mode<synchronous>, transform_indices = @transform_18, window_bounds = array<i64: 1, 32>}, {pipeline_mode = #tpu.pipeline_mode<synchronous>, transform_indices = @transform_19, window_bounds = array<i64: 32, 128>}, {pipeline_mode = #tpu.pipeline_mode<synchronous>, transform_indices = @transform_20, window_bounds = array<i64: 64, 32>}, {pipeline_mode = #tpu.pipeline_mode<synchronous>, transform_indices = @transform_21, window_bounds = array<i64: 1, 32>}, {pipeline_mode = #tpu.pipeline_mode<synchronous>, transform_indices = @transform_22, window_bounds = array<i64: 1, 32>}, {pipeline_mode = #tpu.pipeline_mode<synchronous>, transform_indices = @transform_23, window_bounds = array<i64: 1, 32>}, {pipeline_mode = #tpu.pipeline_mode<synchronous>, transform_indices = @transform_24, window_bounds = array<i64: 64, 32>}, {pipeline_mode = #tpu.pipeline_mode<synchronous>, transform_indices = @transform_25, window_bounds = array<i64: 1, 32>}, {pipeline_mode = #tpu.pipeline_mode<synchronous>, transform_indices = @transform_26, window_bounds = array<i64: 32, 32>}, {pipeline_mode = #tpu.pipeline_mode<synchronous>, transform_indices = @transform_27, window_bounds = array<i64: 1, 32>}, {pipeline_mode = #tpu.pipeline_mode<synchronous>, transform_indices = @transform_28, window_bounds = array<i64: 32, 32>}, {pipeline_mode = #tpu.pipeline_mode<synchronous>, transform_indices = @transform_29, window_bounds = array<i64: 1, 32>}, {pipeline_mode = #tpu.pipeline_mode<synchronous>, transform_indices = @transform_30, window_bounds = array<i64: 1, 32>}, {pipeline_mode = #tpu.pipeline_mode<synchronous>, transform_indices = @transform_31, window_bounds = array<i64: 1, 32>}, {pipeline_mode = #tpu.pipeline_mode<synchronous>, transform_indices = @transform_32, window_bounds = array<i64: 1, 32>}, {pipeline_mode = #tpu.pipeline_mode<synchronous>, transform_indices = @transform_33, window_bounds = array<i64: 1, 32>}, {transform_indices = @transform_34, window_bounds = array<i64: 1, 8, 96>}, {transform_indices = @transform_35, window_bounds = array<i64: 1, 8, 32>}]} {
    %c0 = arith.constant 0 : index
    %c0_0 = arith.constant 0 : index
    %c0_1 = arith.constant 0 : index
    %0 = vector.load %arg1[%c0, %c0_0, %c0_1] : memref<1x8x32xf32, #tpu.memory_space<vmem>>, vector<1x8x32xf32>
    %c0_2 = arith.constant 0 : index
    %c0_3 = arith.constant 0 : index
    %1 = vector.load %arg2[%c0_2, %c0_3] : memref<8x32xf32, #tpu.memory_space<vmem>>, vector<8x32xf32>
    %2 = vector.shape_cast %1 : vector<8x32xf32> to vector<1x8x32xf32>
    %3 = arith.addf %0, %2 : vector<1x8x32xf32>
    %4 = vector.shape_cast %3 : vector<1x8x32xf32> to vector<8x32xf32>
    %c0_4 = arith.constant 0 : index
    %c0_5 = arith.constant 0 : index
    %c0_6 = arith.constant 0 : index
    %5 = vector.load %arg3[%c0_4, %c0_5, %c0_6] : memref<1x8x1xf32, #tpu.memory_space<vmem>>, vector<1x8x1xf32>
    %6 = vector.shape_cast %5 : vector<1x8x1xf32> to vector<8x1xf32>
    %c0_7 = arith.constant 0 : index
    %c0_8 = arith.constant 0 : index
    %7 = vector.load %arg4[%c0_7, %c0_8] : memref<8x8xbf16, #tpu.memory_space<vmem>>, vector<8x8xbf16>
    %8 = arith.extf %7 : vector<8x8xbf16> to vector<8x8xf32>
    %c0_9 = arith.constant 0 : index
    %c0_10 = arith.constant 0 : index
    %c0_11 = arith.constant 0 : index
    %9 = vector.load %arg6[%c0_9, %c0_10, %c0_11] : memref<1x8x16xbf16, #tpu.memory_space<vmem>>, vector<1x8x16xbf16>
    %10 = arith.extf %9 : vector<1x8x16xbf16> to vector<1x8x16xf32>
    %c0_12 = arith.constant 0 : index
    %c0_13 = arith.constant 0 : index
    %c0_14 = arith.constant 0 : index
    %11 = vector.load %arg8[%c0_12, %c0_13, %c0_14] : memref<1x8x8xbf16, #tpu.memory_space<vmem>>, vector<1x8x8xbf16>
    %12 = arith.extf %11 : vector<1x8x8xbf16> to vector<1x8x8xf32>
    %c0_15 = arith.constant 0 : index
    %c0_16 = arith.constant 0 : index
    %13 = vector.load %arg9[%c0_15, %c0_16] : memref<32x192xbf16, #tpu.memory_space<vmem>>, vector<32x192xbf16>
    %14 = arith.truncf %4 : vector<8x32xf32> to vector<8x32xbf16>
    %cst = arith.constant dense<0.000000e+00> : vector<8x192xf32>
    %15 = tpu.matmul %14, %13, %cst {dimension_numbers = #tpu.dot_dimension_numbers<[1], [0], [0], [1], [0, 0, 1, 1], [], []>} : vector<8x32xbf16>, vector<32x192xbf16>, vector<8x192xf32> -> vector<8x192xf32>
    %16 = arith.truncf %15 : vector<8x192xf32> to vector<8x192xbf16>
    %17 = vector.extract_strided_slice %16 {offsets = [0, 0], sizes = [8, 64], strides = [1, 1]} : vector<8x192xbf16> to vector<8x64xbf16>
    %18 = vector.extract_strided_slice %16 {offsets = [0, 64], sizes = [8, 64], strides = [1, 1]} : vector<8x192xbf16> to vector<8x64xbf16>
    %19 = vector.extract_strided_slice %16 {offsets = [0, 128], sizes = [8, 64], strides = [1, 1]} : vector<8x192xbf16> to vector<8x64xbf16>
    %c0_17 = arith.constant 0 : index
    %c0_18 = arith.constant 0 : index
    %20 = vector.load %arg10[%c0_17, %c0_18] : memref<64x32xbf16, #tpu.memory_space<vmem>>, vector<64x32xbf16>
    %c0_19 = arith.constant 0 : index
    %c0_20 = arith.constant 0 : index
    %21 = vector.load %arg11[%c0_19, %c0_20] : memref<1x32xf32, #tpu.memory_space<vmem>>, vector<1x32xf32>
    %c0_21 = arith.constant 0 : index
    %c0_22 = arith.constant 0 : index
    %22 = vector.load %arg12[%c0_21, %c0_22] : memref<1x32xf32, #tpu.memory_space<vmem>>, vector<1x32xf32>
    %c0_23 = arith.constant 0 : index
    %c0_24 = arith.constant 0 : index
    %23 = vector.load %arg13[%c0_23, %c0_24] : memref<1x32xf32, #tpu.memory_space<vmem>>, vector<1x32xf32>
    %24 = vector.extract_strided_slice %17 {offsets = [0, 0], sizes = [8, 32], strides = [1, 1]} : vector<8x64xbf16> to vector<8x32xbf16>
    %25 = vector.extract_strided_slice %18 {offsets = [0, 0], sizes = [8, 32], strides = [1, 1]} : vector<8x64xbf16> to vector<8x32xbf16>
    %cst_25 = arith.constant dense<0.000000e+00> : vector<8x8xf32>
    %26 = tpu.matmul %24, %25, %cst_25 {dimension_numbers = #tpu.dot_dimension_numbers<[1], [1], [0], [0], [0, 0, 1, 0], [], []>} : vector<8x32xbf16>, vector<8x32xbf16>, vector<8x8xf32> -> vector<8x8xf32>
    %cst_26 = arith.constant 0.176776692 : f32
    %27 = vector.broadcast %cst_26 : f32 to vector<8x8xf32>
    %28 = arith.mulf %26, %27 : vector<8x8xf32>
    %cst_27 = arith.constant -1.500000e+01 : f32
    %cst_28 = arith.constant 1.500000e+01 : f32
    %29 = vector.broadcast %cst_27 : f32 to vector<8x8xf32>
    %30 = arith.maximumf %29, %28 : vector<8x8xf32>
    %31 = vector.broadcast %cst_28 : f32 to vector<8x8xf32>
    %32 = arith.minimumf %31, %30 : vector<8x8xf32>
    %33 = arith.mulf %32, %8 : vector<8x8xf32>
    %cst_29 = arith.constant dense<0xFF800000> : vector<8xf32>
    %34 = vector.multi_reduction <maximumf>, %33, %cst_29 [1] : vector<8x8xf32> to vector<8xf32>
    %35 = vector.shape_cast %34 : vector<8xf32> to vector<8x1xf32>
    %36 = vector.broadcast %35 : vector<8x1xf32> to vector<8x8xf32>
    %37 = arith.subf %33, %36 : vector<8x8xf32>
    %38 = math.exp %37 : vector<8x8xf32>
    %39 = arith.mulf %38, %8 : vector<8x8xf32>
    %cst_30 = arith.constant dense<0.000000e+00> : vector<8xf32>
    %40 = vector.multi_reduction <add>, %39, %cst_30 [1] : vector<8x8xf32> to vector<8xf32>
    %41 = vector.shape_cast %40 : vector<8xf32> to vector<8x1xf32>
    %cst_31 = arith.constant 9.99999997E-7 : f32
    %42 = vector.broadcast %cst_31 : f32 to vector<8x1xf32>
    %43 = arith.addf %41, %42 : vector<8x1xf32>
    %44 = tpu.reciprocal %43 {approx = true} : vector<8x1xf32> -> vector<8x1xf32>
    %45 = vector.broadcast %44 : vector<8x1xf32> to vector<8x8xf32>
    %46 = arith.mulf %39, %45 : vector<8x8xf32>
    %47 = vector.extract_strided_slice %19 {offsets = [0, 0], sizes = [8, 32], strides = [1, 1]} : vector<8x64xbf16> to vector<8x32xbf16>
    %48 = arith.truncf %46 : vector<8x8xf32> to vector<8x8xbf16>
    %cst_32 = arith.constant dense<0.000000e+00> : vector<8x32xf32>
    %49 = tpu.matmul %48, %47, %cst_32 {dimension_numbers = #tpu.dot_dimension_numbers<[1], [0], [0], [1], [0, 0, 1, 1], [], []>} : vector<8x8xbf16>, vector<8x32xbf16>, vector<8x32xf32> -> vector<8x32xf32>
    %50 = vector.extract_strided_slice %20 {offsets = [0, 0], sizes = [32, 32], strides = [1, 1]} : vector<64x32xbf16> to vector<32x32xbf16>
    %51 = arith.truncf %49 : vector<8x32xf32> to vector<8x32xbf16>
    %cst_33 = arith.constant dense<0.000000e+00> : vector<8x32xf32>
    %52 = tpu.matmul %51, %50, %cst_33 {dimension_numbers = #tpu.dot_dimension_numbers<[1], [0], [0], [1], [0, 0, 1, 1], [], []>} : vector<8x32xbf16>, vector<32x32xbf16>, vector<8x32xf32> -> vector<8x32xf32>
    %53 = vector.extract_strided_slice %17 {offsets = [0, 32], sizes = [8, 32], strides = [1, 1]} : vector<8x64xbf16> to vector<8x32xbf16>
    %54 = vector.extract_strided_slice %18 {offsets = [0, 32], sizes = [8, 32], strides = [1, 1]} : vector<8x64xbf16> to vector<8x32xbf16>
    %cst_34 = arith.constant dense<0.000000e+00> : vector<8x8xf32>
    %55 = tpu.matmul %53, %54, %cst_34 {dimension_numbers = #tpu.dot_dimension_numbers<[1], [1], [0], [0], [0, 0, 1, 0], [], []>} : vector<8x32xbf16>, vector<8x32xbf16>, vector<8x8xf32> -> vector<8x8xf32>
    %cst_35 = arith.constant 0.176776692 : f32
    %56 = vector.broadcast %cst_35 : f32 to vector<8x8xf32>
    %57 = arith.mulf %55, %56 : vector<8x8xf32>
    %cst_36 = arith.constant -1.500000e+01 : f32
    %cst_37 = arith.constant 1.500000e+01 : f32
    %58 = vector.broadcast %cst_36 : f32 to vector<8x8xf32>
    %59 = arith.maximumf %58, %57 : vector<8x8xf32>
    %60 = vector.broadcast %cst_37 : f32 to vector<8x8xf32>
    %61 = arith.minimumf %60, %59 : vector<8x8xf32>
    %62 = arith.mulf %61, %8 : vector<8x8xf32>
    %cst_38 = arith.constant dense<0xFF800000> : vector<8xf32>
    %63 = vector.multi_reduction <maximumf>, %62, %cst_38 [1] : vector<8x8xf32> to vector<8xf32>
    %64 = vector.shape_cast %63 : vector<8xf32> to vector<8x1xf32>
    %65 = vector.broadcast %64 : vector<8x1xf32> to vector<8x8xf32>
    %66 = arith.subf %62, %65 : vector<8x8xf32>
    %67 = math.exp %66 : vector<8x8xf32>
    %68 = arith.mulf %67, %8 : vector<8x8xf32>
    %cst_39 = arith.constant dense<0.000000e+00> : vector<8xf32>
    %69 = vector.multi_reduction <add>, %68, %cst_39 [1] : vector<8x8xf32> to vector<8xf32>
    %70 = vector.shape_cast %69 : vector<8xf32> to vector<8x1xf32>
    %cst_40 = arith.constant 9.99999997E-7 : f32
    %71 = vector.broadcast %cst_40 : f32 to vector<8x1xf32>
    %72 = arith.addf %70, %71 : vector<8x1xf32>
    %73 = tpu.reciprocal %72 {approx = true} : vector<8x1xf32> -> vector<8x1xf32>
    %74 = vector.broadcast %73 : vector<8x1xf32> to vector<8x8xf32>
    %75 = arith.mulf %68, %74 : vector<8x8xf32>
    %76 = vector.extract_strided_slice %19 {offsets = [0, 32], sizes = [8, 32], strides = [1, 1]} : vector<8x64xbf16> to vector<8x32xbf16>
    %77 = arith.truncf %75 : vector<8x8xf32> to vector<8x8xbf16>
    %cst_41 = arith.constant dense<0.000000e+00> : vector<8x32xf32>
    %78 = tpu.matmul %77, %76, %cst_41 {dimension_numbers = #tpu.dot_dimension_numbers<[1], [0], [0], [1], [0, 0, 1, 1], [], []>} : vector<8x8xbf16>, vector<8x32xbf16>, vector<8x32xf32> -> vector<8x32xf32>
    %79 = vector.extract_strided_slice %20 {offsets = [32, 0], sizes = [32, 32], strides = [1, 1]} : vector<64x32xbf16> to vector<32x32xbf16>
    %80 = arith.truncf %78 : vector<8x32xf32> to vector<8x32xbf16>
    %cst_42 = arith.constant dense<0.000000e+00> : vector<8x32xf32>
    %81 = tpu.matmul %80, %79, %cst_42 {dimension_numbers = #tpu.dot_dimension_numbers<[1], [0], [0], [1], [0, 0, 1, 1], [], []>} : vector<8x32xbf16>, vector<32x32xbf16>, vector<8x32xf32> -> vector<8x32xf32>
    %82 = arith.addf %52, %81 : vector<8x32xf32>
    %83 = vector.broadcast %21 : vector<1x32xf32> to vector<8x32xf32>
    %84 = arith.addf %82, %83 : vector<8x32xf32>
    %85 = arith.addf %84, %4 : vector<8x32xf32>
    %cst_43 = arith.constant dense<0.000000e+00> : vector<8xf32>
    %86 = vector.multi_reduction <add>, %85, %cst_43 [1] : vector<8x32xf32> to vector<8xf32>
    %87 = vector.shape_cast %86 : vector<8xf32> to vector<8x1xf32>
    %cst_44 = arith.constant 3.200000e+01 : f32
    %88 = vector.broadcast %cst_44 : f32 to vector<8x1xf32>
    %89 = arith.divf %87, %88 : vector<8x1xf32>
    %90 = vector.broadcast %89 : vector<8x1xf32> to vector<8x32xf32>
    %91 = arith.subf %85, %90 : vector<8x32xf32>
    %92 = arith.mulf %91, %91 : vector<8x32xf32>
    %cst_45 = arith.constant dense<0.000000e+00> : vector<8xf32>
    %93 = vector.multi_reduction <add>, %92, %cst_45 [1] : vector<8x32xf32> to vector<8xf32>
    %94 = vector.shape_cast %93 : vector<8xf32> to vector<8x1xf32>
    %cst_46 = arith.constant 3.200000e+01 : f32
    %95 = vector.broadcast %cst_46 : f32 to vector<8x1xf32>
    %96 = arith.divf %94, %95 : vector<8x1xf32>
    %97 = vector.broadcast %89 : vector<8x1xf32> to vector<8x32xf32>
    %98 = arith.subf %85, %97 : vector<8x32xf32>
    %cst_47 = arith.constant 9.99999974E-6 : f32
    %99 = vector.broadcast %cst_47 : f32 to vector<8x1xf32>
    %100 = arith.addf %96, %99 : vector<8x1xf32>
    %101 = math.rsqrt %100 : vector<8x1xf32>
    %102 = vector.broadcast %101 : vector<8x1xf32> to vector<8x32xf32>
    %103 = arith.mulf %98, %102 : vector<8x32xf32>
    %104 = vector.broadcast %22 : vector<1x32xf32> to vector<8x32xf32>
    %105 = arith.mulf %103, %104 : vector<8x32xf32>
    %106 = vector.broadcast %23 : vector<1x32xf32> to vector<8x32xf32>
    %107 = arith.addf %105, %106 : vector<8x32xf32>
    %108 = vector.broadcast %6 : vector<8x1xf32> to vector<8x32xf32>
    %109 = arith.mulf %107, %108 : vector<8x32xf32>
    %110 = arith.addf %109, %4 : vector<8x32xf32>
    %c0_48 = arith.constant 0 : index
    %c0_49 = arith.constant 0 : index
    %111 = vector.load %arg31[%c0_48, %c0_49] : memref<1x32xf32, #tpu.memory_space<vmem>>, vector<1x32xf32>
    %c0_50 = arith.constant 0 : index
    %c0_51 = arith.constant 0 : index
    %112 = vector.load %arg32[%c0_50, %c0_51] : memref<1x32xf32, #tpu.memory_space<vmem>>, vector<1x32xf32>
    %cst_52 = arith.constant dense<0.000000e+00> : vector<8xf32>
    %113 = vector.multi_reduction <add>, %110, %cst_52 [1] : vector<8x32xf32> to vector<8xf32>
    %114 = vector.shape_cast %113 : vector<8xf32> to vector<8x1xf32>
    %cst_53 = arith.constant 3.200000e+01 : f32
    %115 = vector.broadcast %cst_53 : f32 to vector<8x1xf32>
    %116 = arith.divf %114, %115 : vector<8x1xf32>
    %117 = vector.broadcast %116 : vector<8x1xf32> to vector<8x32xf32>
    %118 = arith.subf %110, %117 : vector<8x32xf32>
    %119 = arith.mulf %118, %118 : vector<8x32xf32>
    %cst_54 = arith.constant dense<0.000000e+00> : vector<8xf32>
    %120 = vector.multi_reduction <add>, %119, %cst_54 [1] : vector<8x32xf32> to vector<8xf32>
    %121 = vector.shape_cast %120 : vector<8xf32> to vector<8x1xf32>
    %cst_55 = arith.constant 3.200000e+01 : f32
    %122 = vector.broadcast %cst_55 : f32 to vector<8x1xf32>
    %123 = arith.divf %121, %122 : vector<8x1xf32>
    %124 = vector.broadcast %116 : vector<8x1xf32> to vector<8x32xf32>
    %125 = arith.subf %110, %124 : vector<8x32xf32>
    %cst_56 = arith.constant 9.99999974E-6 : f32
    %126 = vector.broadcast %cst_56 : f32 to vector<8x1xf32>
    %127 = arith.addf %123, %126 : vector<8x1xf32>
    %128 = math.rsqrt %127 : vector<8x1xf32>
    %129 = vector.broadcast %128 : vector<8x1xf32> to vector<8x32xf32>
    %130 = arith.mulf %125, %129 : vector<8x32xf32>
    %131 = vector.broadcast %111 : vector<1x32xf32> to vector<8x32xf32>
    %132 = arith.mulf %130, %131 : vector<8x32xf32>
    %133 = vector.broadcast %112 : vector<1x32xf32> to vector<8x32xf32>
    %134 = arith.addf %132, %133 : vector<8x32xf32>
    %c0_57 = arith.constant 0 : index
    %c0_58 = arith.constant 0 : index
    %135 = vector.load %arg14[%c0_57, %c0_58] : memref<32x128xbf16, #tpu.memory_space<vmem>>, vector<32x128xbf16>
    %136 = arith.truncf %134 : vector<8x32xf32> to vector<8x32xbf16>
    %cst_59 = arith.constant dense<0.000000e+00> : vector<8x128xf32>
    %137 = tpu.matmul %136, %135, %cst_59 {dimension_numbers = #tpu.dot_dimension_numbers<[1], [0], [0], [1], [0, 0, 1, 1], [], []>} : vector<8x32xbf16>, vector<32x128xbf16>, vector<8x128xf32> -> vector<8x128xf32>
    %138 = arith.truncf %137 : vector<8x128xf32> to vector<8x128xbf16>
    %c0_60 = arith.constant 0 : index
    %c0_61 = arith.constant 0 : index
    %c0_62 = arith.constant 0 : index
    %139 = vector.load %arg5[%c0_60, %c0_61, %c0_62] : memref<1x16x32xf32, #tpu.memory_space<vmem>>, vector<1x16x32xf32>
    %140 = vector.shape_cast %139 : vector<1x16x32xf32> to vector<16x32xf32>
    %c0_63 = arith.constant 0 : index
    %c0_64 = arith.constant 0 : index
    %141 = vector.load %arg15[%c0_63, %c0_64] : memref<32x128xbf16, #tpu.memory_space<vmem>>, vector<32x128xbf16>
    %142 = arith.truncf %140 : vector<16x32xf32> to vector<16x32xbf16>
    %cst_65 = arith.constant dense<0.000000e+00> : vector<16x128xf32>
    %143 = tpu.matmul %142, %141, %cst_65 {dimension_numbers = #tpu.dot_dimension_numbers<[1], [0], [0], [1], [0, 0, 1, 1], [], []>} : vector<16x32xbf16>, vector<32x128xbf16>, vector<16x128xf32> -> vector<16x128xf32>
    %144 = arith.truncf %143 : vector<16x128xf32> to vector<16x128xbf16>
    %c0_66 = arith.constant 0 : index
    %c0_67 = arith.constant 0 : index
    %c0_68 = arith.constant 0 : index
    %145 = vector.load %arg7[%c0_66, %c0_67, %c0_68] : memref<1x8x32xf32, #tpu.memory_space<vmem>>, vector<1x8x32xf32>
    %146 = vector.shape_cast %145 : vector<1x8x32xf32> to vector<8x32xf32>
    %c0_69 = arith.constant 0 : index
    %c0_70 = arith.constant 0 : index
    %147 = vector.load %arg20[%c0_69, %c0_70] : memref<32x128xbf16, #tpu.memory_space<vmem>>, vector<32x128xbf16>
    %148 = arith.truncf %146 : vector<8x32xf32> to vector<8x32xbf16>
    %cst_71 = arith.constant dense<0.000000e+00> : vector<8x128xf32>
    %149 = tpu.matmul %148, %147, %cst_71 {dimension_numbers = #tpu.dot_dimension_numbers<[1], [0], [0], [1], [0, 0, 1, 1], [], []>} : vector<8x32xbf16>, vector<32x128xbf16>, vector<8x128xf32> -> vector<8x128xf32>
    %150 = arith.truncf %149 : vector<8x128xf32> to vector<8x128xbf16>
    %151 = vector.extract_strided_slice %138 {offsets = [0, 0], sizes = [8, 64], strides = [1, 1]} : vector<8x128xbf16> to vector<8x64xbf16>
    %152 = vector.extract_strided_slice %144 {offsets = [0, 0], sizes = [16, 64], strides = [1, 1]} : vector<16x128xbf16> to vector<16x64xbf16>
    %153 = vector.extract_strided_slice %144 {offsets = [0, 64], sizes = [16, 64], strides = [1, 1]} : vector<16x128xbf16> to vector<16x64xbf16>
    %c0_72 = arith.constant 0 : index
    %c0_73 = arith.constant 0 : index
    %154 = vector.load %arg16[%c0_72, %c0_73] : memref<64x32xbf16, #tpu.memory_space<vmem>>, vector<64x32xbf16>
    %c0_74 = arith.constant 0 : index
    %c0_75 = arith.constant 0 : index
    %155 = vector.load %arg17[%c0_74, %c0_75] : memref<1x32xf32, #tpu.memory_space<vmem>>, vector<1x32xf32>
    %c0_76 = arith.constant 0 : index
    %c0_77 = arith.constant 0 : index
    %156 = vector.load %arg18[%c0_76, %c0_77] : memref<1x32xf32, #tpu.memory_space<vmem>>, vector<1x32xf32>
    %c0_78 = arith.constant 0 : index
    %c0_79 = arith.constant 0 : index
    %157 = vector.load %arg19[%c0_78, %c0_79] : memref<1x32xf32, #tpu.memory_space<vmem>>, vector<1x32xf32>
    %158 = vector.shape_cast %10 : vector<1x8x16xf32> to vector<8x16xf32>
    %159 = vector.extract_strided_slice %151 {offsets = [0, 0], sizes = [8, 32], strides = [1, 1]} : vector<8x64xbf16> to vector<8x32xbf16>
    %160 = vector.extract_strided_slice %152 {offsets = [0, 0], sizes = [16, 32], strides = [1, 1]} : vector<16x64xbf16> to vector<16x32xbf16>
    %cst_80 = arith.constant dense<0.000000e+00> : vector<8x16xf32>
    %161 = tpu.matmul %159, %160, %cst_80 {dimension_numbers = #tpu.dot_dimension_numbers<[1], [1], [0], [0], [0, 0, 1, 0], [], []>} : vector<8x32xbf16>, vector<16x32xbf16>, vector<8x16xf32> -> vector<8x16xf32>
    %cst_81 = arith.constant 0.176776692 : f32
    %162 = vector.broadcast %cst_81 : f32 to vector<8x16xf32>
    %163 = arith.mulf %161, %162 : vector<8x16xf32>
    %cst_82 = arith.constant -1.500000e+01 : f32
    %cst_83 = arith.constant 1.500000e+01 : f32
    %164 = vector.broadcast %cst_82 : f32 to vector<8x16xf32>
    %165 = arith.maximumf %164, %163 : vector<8x16xf32>
    %166 = vector.broadcast %cst_83 : f32 to vector<8x16xf32>
    %167 = arith.minimumf %166, %165 : vector<8x16xf32>
    %168 = arith.mulf %167, %158 : vector<8x16xf32>
    %cst_84 = arith.constant dense<0xFF800000> : vector<8xf32>
    %169 = vector.multi_reduction <maximumf>, %168, %cst_84 [1] : vector<8x16xf32> to vector<8xf32>
    %170 = vector.shape_cast %169 : vector<8xf32> to vector<8x1xf32>
    %171 = vector.broadcast %170 : vector<8x1xf32> to vector<8x16xf32>
    %172 = arith.subf %168, %171 : vector<8x16xf32>
    %173 = math.exp %172 : vector<8x16xf32>
    %174 = arith.mulf %173, %158 : vector<8x16xf32>
    %cst_85 = arith.constant dense<0.000000e+00> : vector<8xf32>
    %175 = vector.multi_reduction <add>, %174, %cst_85 [1] : vector<8x16xf32> to vector<8xf32>
    %176 = vector.shape_cast %175 : vector<8xf32> to vector<8x1xf32>
    %cst_86 = arith.constant 9.99999997E-7 : f32
    %177 = vector.broadcast %cst_86 : f32 to vector<8x1xf32>
    %178 = arith.addf %176, %177 : vector<8x1xf32>
    %179 = tpu.reciprocal %178 {approx = true} : vector<8x1xf32> -> vector<8x1xf32>
    %180 = vector.broadcast %179 : vector<8x1xf32> to vector<8x16xf32>
    %181 = arith.mulf %174, %180 : vector<8x16xf32>
    %c0_87 = arith.constant 0 : index
    %c0_88 = arith.constant 0 : index
    %c0_89 = arith.constant 0 : index
    %182 = vector.load %arg36[%c0_87, %c0_88, %c0_89] : memref<1x8x32xf32, #tpu.memory_space<vmem>>, vector<1x8x16xf32>
    %183 = vector.shape_cast %182 : vector<1x8x16xf32> to vector<8x16xf32>
    %184 = vector.shape_cast %181 : vector<8x16xf32> to vector<1x8x16xf32>
    tpu.vector_store %arg36[%c0_87, %c0_88, %c0_89], %184 {strides = array<i32>} : memref<1x8x32xf32, #tpu.memory_space<vmem>>, vector<1x8x16xf32>,
    %185 = vector.extract_strided_slice %153 {offsets = [0, 0], sizes = [16, 32], strides = [1, 1]} : vector<16x64xbf16> to vector<16x32xbf16>
    %186 = arith.truncf %181 : vector<8x16xf32> to vector<8x16xbf16>
    %cst_90 = arith.constant dense<0.000000e+00> : vector<8x32xf32>
    %187 = tpu.matmul %186, %185, %cst_90 {dimension_numbers = #tpu.dot_dimension_numbers<[1], [0], [0], [1], [0, 0, 1, 1], [], []>} : vector<8x16xbf16>, vector<16x32xbf16>, vector<8x32xf32> -> vector<8x32xf32>
    %188 = vector.extract_strided_slice %154 {offsets = [0, 0], sizes = [32, 32], strides = [1, 1]} : vector<64x32xbf16> to vector<32x32xbf16>
    %189 = arith.truncf %187 : vector<8x32xf32> to vector<8x32xbf16>
    %cst_91 = arith.constant dense<0.000000e+00> : vector<8x32xf32>
    %190 = tpu.matmul %189, %188, %cst_91 {dimension_numbers = #tpu.dot_dimension_numbers<[1], [0], [0], [1], [0, 0, 1, 1], [], []>} : vector<8x32xbf16>, vector<32x32xbf16>, vector<8x32xf32> -> vector<8x32xf32>
    %191 = vector.extract_strided_slice %151 {offsets = [0, 32], sizes = [8, 32], strides = [1, 1]} : vector<8x64xbf16> to vector<8x32xbf16>
    %192 = vector.extract_strided_slice %152 {offsets = [0, 32], sizes = [16, 32], strides = [1, 1]} : vector<16x64xbf16> to vector<16x32xbf16>
    %cst_92 = arith.constant dense<0.000000e+00> : vector<8x16xf32>
    %193 = tpu.matmul %191, %192, %cst_92 {dimension_numbers = #tpu.dot_dimension_numbers<[1], [1], [0], [0], [0, 0, 1, 0], [], []>} : vector<8x32xbf16>, vector<16x32xbf16>, vector<8x16xf32> -> vector<8x16xf32>
    %cst_93 = arith.constant 0.176776692 : f32
    %194 = vector.broadcast %cst_93 : f32 to vector<8x16xf32>
    %195 = arith.mulf %193, %194 : vector<8x16xf32>
    %cst_94 = arith.constant -1.500000e+01 : f32
    %cst_95 = arith.constant 1.500000e+01 : f32
    %196 = vector.broadcast %cst_94 : f32 to vector<8x16xf32>
    %197 = arith.maximumf %196, %195 : vector<8x16xf32>
    %198 = vector.broadcast %cst_95 : f32 to vector<8x16xf32>
    %199 = arith.minimumf %198, %197 : vector<8x16xf32>
    %200 = arith.mulf %199, %158 : vector<8x16xf32>
    %cst_96 = arith.constant dense<0xFF800000> : vector<8xf32>
    %201 = vector.multi_reduction <maximumf>, %200, %cst_96 [1] : vector<8x16xf32> to vector<8xf32>
    %202 = vector.shape_cast %201 : vector<8xf32> to vector<8x1xf32>
    %203 = vector.broadcast %202 : vector<8x1xf32> to vector<8x16xf32>
    %204 = arith.subf %200, %203 : vector<8x16xf32>
    %205 = math.exp %204 : vector<8x16xf32>
    %206 = arith.mulf %205, %158 : vector<8x16xf32>
    %cst_97 = arith.constant dense<0.000000e+00> : vector<8xf32>
    %207 = vector.multi_reduction <add>, %206, %cst_97 [1] : vector<8x16xf32> to vector<8xf32>
    %208 = vector.shape_cast %207 : vector<8xf32> to vector<8x1xf32>
    %cst_98 = arith.constant 9.99999997E-7 : f32
    %209 = vector.broadcast %cst_98 : f32 to vector<8x1xf32>
    %210 = arith.addf %208, %209 : vector<8x1xf32>
    %211 = tpu.reciprocal %210 {approx = true} : vector<8x1xf32> -> vector<8x1xf32>
    %212 = vector.broadcast %211 : vector<8x1xf32> to vector<8x16xf32>
    %213 = arith.mulf %206, %212 : vector<8x16xf32>
    %c0_99 = arith.constant 0 : index
    %c0_100 = arith.constant 0 : index
    %c16 = arith.constant 16 : index
    %214 = vector.load %arg36[%c0_99, %c0_100, %c16] : memref<1x8x32xf32, #tpu.memory_space<vmem>>, vector<1x8x16xf32>
    %215 = vector.shape_cast %214 : vector<1x8x16xf32> to vector<8x16xf32>
    %216 = vector.shape_cast %213 : vector<8x16xf32> to vector<1x8x16xf32>
    tpu.vector_store %arg36[%c0_99, %c0_100, %c16], %216 {strides = array<i32>} : memref<1x8x32xf32, #tpu.memory_space<vmem>>, vector<1x8x16xf32>,
    %217 = vector.extract_strided_slice %153 {offsets = [0, 32], sizes = [16, 32], strides = [1, 1]} : vector<16x64xbf16> to vector<16x32xbf16>
    %218 = arith.truncf %213 : vector<8x16xf32> to vector<8x16xbf16>
    %cst_101 = arith.constant dense<0.000000e+00> : vector<8x32xf32>
    %219 = tpu.matmul %218, %217, %cst_101 {dimension_numbers = #tpu.dot_dimension_numbers<[1], [0], [0], [1], [0, 0, 1, 1], [], []>} : vector<8x16xbf16>, vector<16x32xbf16>, vector<8x32xf32> -> vector<8x32xf32>
    %220 = vector.extract_strided_slice %154 {offsets = [32, 0], sizes = [32, 32], strides = [1, 1]} : vector<64x32xbf16> to vector<32x32xbf16>
    %221 = arith.truncf %219 : vector<8x32xf32> to vector<8x32xbf16>
    %cst_102 = arith.constant dense<0.000000e+00> : vector<8x32xf32>
    %222 = tpu.matmul %221, %220, %cst_102 {dimension_numbers = #tpu.dot_dimension_numbers<[1], [0], [0], [1], [0, 0, 1, 1], [], []>} : vector<8x32xbf16>, vector<32x32xbf16>, vector<8x32xf32> -> vector<8x32xf32>
    %223 = arith.addf %190, %222 : vector<8x32xf32>
    %224 = vector.broadcast %155 : vector<1x32xf32> to vector<8x32xf32>
    %225 = arith.addf %223, %224 : vector<8x32xf32>
    %226 = arith.addf %225, %134 : vector<8x32xf32>
    %cst_103 = arith.constant dense<0.000000e+00> : vector<8xf32>
    %227 = vector.multi_reduction <add>, %226, %cst_103 [1] : vector<8x32xf32> to vector<8xf32>
    %228 = vector.shape_cast %227 : vector<8xf32> to vector<8x1xf32>
    %cst_104 = arith.constant 3.200000e+01 : f32
    %229 = vector.broadcast %cst_104 : f32 to vector<8x1xf32>
    %230 = arith.divf %228, %229 : vector<8x1xf32>
    %231 = vector.broadcast %230 : vector<8x1xf32> to vector<8x32xf32>
    %232 = arith.subf %226, %231 : vector<8x32xf32>
    %233 = arith.mulf %232, %232 : vector<8x32xf32>
    %cst_105 = arith.constant dense<0.000000e+00> : vector<8xf32>
    %234 = vector.multi_reduction <add>, %233, %cst_105 [1] : vector<8x32xf32> to vector<8xf32>
    %235 = vector.shape_cast %234 : vector<8xf32> to vector<8x1xf32>
    %cst_106 = arith.constant 3.200000e+01 : f32
    %236 = vector.broadcast %cst_106 : f32 to vector<8x1xf32>
    %237 = arith.divf %235, %236 : vector<8x1xf32>
    %238 = vector.broadcast %230 : vector<8x1xf32> to vector<8x32xf32>
    %239 = arith.subf %226, %238 : vector<8x32xf32>
    %cst_107 = arith.constant 9.99999974E-6 : f32
    %240 = vector.broadcast %cst_107 : f32 to vector<8x1xf32>
    %241 = arith.addf %237, %240 : vector<8x1xf32>
    %242 = math.rsqrt %241 : vector<8x1xf32>
    %243 = vector.broadcast %242 : vector<8x1xf32> to vector<8x32xf32>
    %244 = arith.mulf %239, %243 : vector<8x32xf32>
    %245 = vector.broadcast %156 : vector<1x32xf32> to vector<8x32xf32>
    %246 = arith.mulf %244, %245 : vector<8x32xf32>
    %247 = vector.broadcast %157 : vector<1x32xf32> to vector<8x32xf32>
    %248 = arith.addf %246, %247 : vector<8x32xf32>
    %249 = vector.extract_strided_slice %138 {offsets = [0, 64], sizes = [8, 64], strides = [1, 1]} : vector<8x128xbf16> to vector<8x64xbf16>
    %250 = vector.extract_strided_slice %150 {offsets = [0, 0], sizes = [8, 64], strides = [1, 1]} : vector<8x128xbf16> to vector<8x64xbf16>
    %251 = vector.extract_strided_slice %150 {offsets = [0, 64], sizes = [8, 64], strides = [1, 1]} : vector<8x128xbf16> to vector<8x64xbf16>
    %c0_108 = arith.constant 0 : index
    %c0_109 = arith.constant 0 : index
    %252 = vector.load %arg21[%c0_108, %c0_109] : memref<64x32xbf16, #tpu.memory_space<vmem>>, vector<64x32xbf16>
    %c0_110 = arith.constant 0 : index
    %c0_111 = arith.constant 0 : index
    %253 = vector.load %arg22[%c0_110, %c0_111] : memref<1x32xf32, #tpu.memory_space<vmem>>, vector<1x32xf32>
    %c0_112 = arith.constant 0 : index
    %c0_113 = arith.constant 0 : index
    %254 = vector.load %arg23[%c0_112, %c0_113] : memref<1x32xf32, #tpu.memory_space<vmem>>, vector<1x32xf32>
    %c0_114 = arith.constant 0 : index
    %c0_115 = arith.constant 0 : index
    %255 = vector.load %arg24[%c0_114, %c0_115] : memref<1x32xf32, #tpu.memory_space<vmem>>, vector<1x32xf32>
    %256 = vector.shape_cast %12 : vector<1x8x8xf32> to vector<8x8xf32>
    %257 = vector.extract_strided_slice %249 {offsets = [0, 0], sizes = [8, 32], strides = [1, 1]} : vector<8x64xbf16> to vector<8x32xbf16>
    %258 = vector.extract_strided_slice %250 {offsets = [0, 0], sizes = [8, 32], strides = [1, 1]} : vector<8x64xbf16> to vector<8x32xbf16>
    %cst_116 = arith.constant dense<0.000000e+00> : vector<8x8xf32>
    %259 = tpu.matmul %257, %258, %cst_116 {dimension_numbers = #tpu.dot_dimension_numbers<[1], [1], [0], [0], [0, 0, 1, 0], [], []>} : vector<8x32xbf16>, vector<8x32xbf16>, vector<8x8xf32> -> vector<8x8xf32>
    %cst_117 = arith.constant 0.176776692 : f32
    %260 = vector.broadcast %cst_117 : f32 to vector<8x8xf32>
    %261 = arith.mulf %259, %260 : vector<8x8xf32>
    %cst_118 = arith.constant -1.500000e+01 : f32
    %cst_119 = arith.constant 1.500000e+01 : f32
    %262 = vector.broadcast %cst_118 : f32 to vector<8x8xf32>
    %263 = arith.maximumf %262, %261 : vector<8x8xf32>
    %264 = vector.broadcast %cst_119 : f32 to vector<8x8xf32>
    %265 = arith.minimumf %264, %263 : vector<8x8xf32>
    %266 = arith.mulf %265, %256 : vector<8x8xf32>
    %cst_120 = arith.constant dense<0xFF800000> : vector<8xf32>
    %267 = vector.multi_reduction <maximumf>, %266, %cst_120 [1] : vector<8x8xf32> to vector<8xf32>
    %268 = vector.shape_cast %267 : vector<8xf32> to vector<8x1xf32>
    %269 = vector.broadcast %268 : vector<8x1xf32> to vector<8x8xf32>
    %270 = arith.subf %266, %269 : vector<8x8xf32>
    %271 = math.exp %270 : vector<8x8xf32>
    %272 = arith.mulf %271, %256 : vector<8x8xf32>
    %cst_121 = arith.constant dense<0.000000e+00> : vector<8xf32>
    %273 = vector.multi_reduction <add>, %272, %cst_121 [1] : vector<8x8xf32> to vector<8xf32>
    %274 = vector.shape_cast %273 : vector<8xf32> to vector<8x1xf32>
    %cst_122 = arith.constant 9.99999997E-7 : f32
    %275 = vector.broadcast %cst_122 : f32 to vector<8x1xf32>
    %276 = arith.addf %274, %275 : vector<8x1xf32>
    %277 = tpu.reciprocal %276 {approx = true} : vector<8x1xf32> -> vector<8x1xf32>
    %278 = vector.broadcast %277 : vector<8x1xf32> to vector<8x8xf32>
    %279 = arith.mulf %272, %278 : vector<8x8xf32>
    %280 = vector.extract_strided_slice %251 {offsets = [0, 0], sizes = [8, 32], strides = [1, 1]} : vector<8x64xbf16> to vector<8x32xbf16>
    %281 = arith.truncf %279 : vector<8x8xf32> to vector<8x8xbf16>
    %cst_123 = arith.constant dense<0.000000e+00> : vector<8x32xf32>
    %282 = tpu.matmul %281, %280, %cst_123 {dimension_numbers = #tpu.dot_dimension_numbers<[1], [0], [0], [1], [0, 0, 1, 1], [], []>} : vector<8x8xbf16>, vector<8x32xbf16>, vector<8x32xf32> -> vector<8x32xf32>
    %283 = vector.extract_strided_slice %252 {offsets = [0, 0], sizes = [32, 32], strides = [1, 1]} : vector<64x32xbf16> to vector<32x32xbf16>
    %284 = arith.truncf %282 : vector<8x32xf32> to vector<8x32xbf16>
    %cst_124 = arith.constant dense<0.000000e+00> : vector<8x32xf32>
    %285 = tpu.matmul %284, %283, %cst_124 {dimension_numbers = #tpu.dot_dimension_numbers<[1], [0], [0], [1], [0, 0, 1, 1], [], []>} : vector<8x32xbf16>, vector<32x32xbf16>, vector<8x32xf32> -> vector<8x32xf32>
    %286 = vector.extract_strided_slice %249 {offsets = [0, 32], sizes = [8, 32], strides = [1, 1]} : vector<8x64xbf16> to vector<8x32xbf16>
    %287 = vector.extract_strided_slice %250 {offsets = [0, 32], sizes = [8, 32], strides = [1, 1]} : vector<8x64xbf16> to vector<8x32xbf16>
    %cst_125 = arith.constant dense<0.000000e+00> : vector<8x8xf32>
    %288 = tpu.matmul %286, %287, %cst_125 {dimension_numbers = #tpu.dot_dimension_numbers<[1], [1], [0], [0], [0, 0, 1, 0], [], []>} : vector<8x32xbf16>, vector<8x32xbf16>, vector<8x8xf32> -> vector<8x8xf32>
    %cst_126 = arith.constant 0.176776692 : f32
    %289 = vector.broadcast %cst_126 : f32 to vector<8x8xf32>
    %290 = arith.mulf %288, %289 : vector<8x8xf32>
    %cst_127 = arith.constant -1.500000e+01 : f32
    %cst_128 = arith.constant 1.500000e+01 : f32
    %291 = vector.broadcast %cst_127 : f32 to vector<8x8xf32>
    %292 = arith.maximumf %291, %290 : vector<8x8xf32>
    %293 = vector.broadcast %cst_128 : f32 to vector<8x8xf32>
    %294 = arith.minimumf %293, %292 : vector<8x8xf32>
    %295 = arith.mulf %294, %256 : vector<8x8xf32>
    %cst_129 = arith.constant dense<0xFF800000> : vector<8xf32>
    %296 = vector.multi_reduction <maximumf>, %295, %cst_129 [1] : vector<8x8xf32> to vector<8xf32>
    %297 = vector.shape_cast %296 : vector<8xf32> to vector<8x1xf32>
    %298 = vector.broadcast %297 : vector<8x1xf32> to vector<8x8xf32>
    %299 = arith.subf %295, %298 : vector<8x8xf32>
    %300 = math.exp %299 : vector<8x8xf32>
    %301 = arith.mulf %300, %256 : vector<8x8xf32>
    %cst_130 = arith.constant dense<0.000000e+00> : vector<8xf32>
    %302 = vector.multi_reduction <add>, %301, %cst_130 [1] : vector<8x8xf32> to vector<8xf32>
    %303 = vector.shape_cast %302 : vector<8xf32> to vector<8x1xf32>
    %cst_131 = arith.constant 9.99999997E-7 : f32
    %304 = vector.broadcast %cst_131 : f32 to vector<8x1xf32>
    %305 = arith.addf %303, %304 : vector<8x1xf32>
    %306 = tpu.reciprocal %305 {approx = true} : vector<8x1xf32> -> vector<8x1xf32>
    %307 = vector.broadcast %306 : vector<8x1xf32> to vector<8x8xf32>
    %308 = arith.mulf %301, %307 : vector<8x8xf32>
    %309 = vector.extract_strided_slice %251 {offsets = [0, 32], sizes = [8, 32], strides = [1, 1]} : vector<8x64xbf16> to vector<8x32xbf16>
    %310 = arith.truncf %308 : vector<8x8xf32> to vector<8x8xbf16>
    %cst_132 = arith.constant dense<0.000000e+00> : vector<8x32xf32>
    %311 = tpu.matmul %310, %309, %cst_132 {dimension_numbers = #tpu.dot_dimension_numbers<[1], [0], [0], [1], [0, 0, 1, 1], [], []>} : vector<8x8xbf16>, vector<8x32xbf16>, vector<8x32xf32> -> vector<8x32xf32>
    %312 = vector.extract_strided_slice %252 {offsets = [32, 0], sizes = [32, 32], strides = [1, 1]} : vector<64x32xbf16> to vector<32x32xbf16>
    %313 = arith.truncf %311 : vector<8x32xf32> to vector<8x32xbf16>
    %cst_133 = arith.constant dense<0.000000e+00> : vector<8x32xf32>
    %314 = tpu.matmul %313, %312, %cst_133 {dimension_numbers = #tpu.dot_dimension_numbers<[1], [0], [0], [1], [0, 0, 1, 1], [], []>} : vector<8x32xbf16>, vector<32x32xbf16>, vector<8x32xf32> -> vector<8x32xf32>
    %315 = arith.addf %285, %314 : vector<8x32xf32>
    %316 = vector.broadcast %253 : vector<1x32xf32> to vector<8x32xf32>
    %317 = arith.addf %315, %316 : vector<8x32xf32>
    %318 = arith.addf %317, %134 : vector<8x32xf32>
    %cst_134 = arith.constant dense<0.000000e+00> : vector<8xf32>
    %319 = vector.multi_reduction <add>, %318, %cst_134 [1] : vector<8x32xf32> to vector<8xf32>
    %320 = vector.shape_cast %319 : vector<8xf32> to vector<8x1xf32>
    %cst_135 = arith.constant 3.200000e+01 : f32
    %321 = vector.broadcast %cst_135 : f32 to vector<8x1xf32>
    %322 = arith.divf %320, %321 : vector<8x1xf32>
    %323 = vector.broadcast %322 : vector<8x1xf32> to vector<8x32xf32>
    %324 = arith.subf %318, %323 : vector<8x32xf32>
    %325 = arith.mulf %324, %324 : vector<8x32xf32>
    %cst_136 = arith.constant dense<0.000000e+00> : vector<8xf32>
    %326 = vector.multi_reduction <add>, %325, %cst_136 [1] : vector<8x32xf32> to vector<8xf32>
    %327 = vector.shape_cast %326 : vector<8xf32> to vector<8x1xf32>
    %cst_137 = arith.constant 3.200000e+01 : f32
    %328 = vector.broadcast %cst_137 : f32 to vector<8x1xf32>
    %329 = arith.divf %327, %328 : vector<8x1xf32>
    %330 = vector.broadcast %322 : vector<8x1xf32> to vector<8x32xf32>
    %331 = arith.subf %318, %330 : vector<8x32xf32>
    %cst_138 = arith.constant 9.99999974E-6 : f32
    %332 = vector.broadcast %cst_138 : f32 to vector<8x1xf32>
    %333 = arith.addf %329, %332 : vector<8x1xf32>
    %334 = math.rsqrt %333 : vector<8x1xf32>
    %335 = vector.broadcast %334 : vector<8x1xf32> to vector<8x32xf32>
    %336 = arith.mulf %331, %335 : vector<8x32xf32>
    %337 = vector.broadcast %254 : vector<1x32xf32> to vector<8x32xf32>
    %338 = arith.mulf %336, %337 : vector<8x32xf32>
    %339 = vector.broadcast %255 : vector<1x32xf32> to vector<8x32xf32>
    %340 = arith.addf %338, %339 : vector<8x32xf32>
    %341 = tpu.concatenate %248, %340 in 1 : vector<8x32xf32>, vector<8x32xf32> -> vector<8x64xf32>
    %c0_139 = arith.constant 0 : index
    %c0_140 = arith.constant 0 : index
    %342 = vector.load %arg25[%c0_139, %c0_140] : memref<64x32xbf16, #tpu.memory_space<vmem>>, vector<64x32xbf16>
    %343 = arith.truncf %341 : vector<8x64xf32> to vector<8x64xbf16>
    %cst_141 = arith.constant dense<0.000000e+00> : vector<8x32xf32>
    %344 = tpu.matmul %343, %342, %cst_141 {dimension_numbers = #tpu.dot_dimension_numbers<[1], [0], [0], [1], [0, 0, 1, 1], [], []>} : vector<8x64xbf16>, vector<64x32xbf16>, vector<8x32xf32> -> vector<8x32xf32>
    %c0_142 = arith.constant 0 : index
    %c0_143 = arith.constant 0 : index
    %345 = vector.load %arg26[%c0_142, %c0_143] : memref<1x32xf32, #tpu.memory_space<vmem>>, vector<1x32xf32>
    %346 = vector.broadcast %345 : vector<1x32xf32> to vector<8x32xf32>
    %347 = arith.addf %344, %346 : vector<8x32xf32>
    %cst_144 = arith.constant 0.000000e+00 : f32
    %348 = vector.broadcast %cst_144 : f32 to vector<8x32xf32>
    %349 = arith.maximumf %347, %348 : vector<8x32xf32>
    %350 = vector.broadcast %6 : vector<8x1xf32> to vector<8x32xf32>
    %351 = arith.mulf %349, %350 : vector<8x32xf32>
    %352 = arith.addf %351, %110 : vector<8x32xf32>
    %c0_145 = arith.constant 0 : index
    %c0_146 = arith.constant 0 : index
    %353 = vector.load %arg33[%c0_145, %c0_146] : memref<1x32xf32, #tpu.memory_space<vmem>>, vector<1x32xf32>
    %c0_147 = arith.constant 0 : index
    %c0_148 = arith.constant 0 : index
    %354 = vector.load %arg34[%c0_147, %c0_148] : memref<1x32xf32, #tpu.memory_space<vmem>>, vector<1x32xf32>
    %cst_149 = arith.constant dense<0.000000e+00> : vector<8xf32>
    %355 = vector.multi_reduction <add>, %352, %cst_149 [1] : vector<8x32xf32> to vector<8xf32>
    %356 = vector.shape_cast %355 : vector<8xf32> to vector<8x1xf32>
    %cst_150 = arith.constant 3.200000e+01 : f32
    %357 = vector.broadcast %cst_150 : f32 to vector<8x1xf32>
    %358 = arith.divf %356, %357 : vector<8x1xf32>
    %359 = vector.broadcast %358 : vector<8x1xf32> to vector<8x32xf32>
    %360 = arith.subf %352, %359 : vector<8x32xf32>
    %361 = arith.mulf %360, %360 : vector<8x32xf32>
    %cst_151 = arith.constant dense<0.000000e+00> : vector<8xf32>
    %362 = vector.multi_reduction <add>, %361, %cst_151 [1] : vector<8x32xf32> to vector<8xf32>
    %363 = vector.shape_cast %362 : vector<8xf32> to vector<8x1xf32>
    %cst_152 = arith.constant 3.200000e+01 : f32
    %364 = vector.broadcast %cst_152 : f32 to vector<8x1xf32>
    %365 = arith.divf %363, %364 : vector<8x1xf32>
    %366 = vector.broadcast %358 : vector<8x1xf32> to vector<8x32xf32>
    %367 = arith.subf %352, %366 : vector<8x32xf32>
    %cst_153 = arith.constant 9.99999974E-6 : f32
    %368 = vector.broadcast %cst_153 : f32 to vector<8x1xf32>
    %369 = arith.addf %365, %368 : vector<8x1xf32>
    %370 = math.rsqrt %369 : vector<8x1xf32>
    %371 = vector.broadcast %370 : vector<8x1xf32> to vector<8x32xf32>
    %372 = arith.mulf %367, %371 : vector<8x32xf32>
    %373 = vector.broadcast %353 : vector<1x32xf32> to vector<8x32xf32>
    %374 = arith.mulf %372, %373 : vector<8x32xf32>
    %375 = vector.broadcast %354 : vector<1x32xf32> to vector<8x32xf32>
    %376 = arith.addf %374, %375 : vector<8x32xf32>
    %c0_154 = arith.constant 0 : index
    %c0_155 = arith.constant 0 : index
    %377 = vector.load %arg27[%c0_154, %c0_155] : memref<32x32xbf16, #tpu.memory_space<vmem>>, vector<32x32xbf16>
    %378 = arith.truncf %376 : vector<8x32xf32> to vector<8x32xbf16>
    %cst_156 = arith.constant dense<0.000000e+00> : vector<8x32xf32>
    %379 = tpu.matmul %378, %377, %cst_156 {dimension_numbers = #tpu.dot_dimension_numbers<[1], [0], [0], [1], [0, 0, 1, 1], [], []>} : vector<8x32xbf16>, vector<32x32xbf16>, vector<8x32xf32> -> vector<8x32xf32>
    %c0_157 = arith.constant 0 : index
    %c0_158 = arith.constant 0 : index
    %380 = vector.load %arg28[%c0_157, %c0_158] : memref<1x32xf32, #tpu.memory_space<vmem>>, vector<1x32xf32>
    %381 = vector.broadcast %380 : vector<1x32xf32> to vector<8x32xf32>
    %382 = arith.addf %379, %381 : vector<8x32xf32>
    %cst_159 = arith.constant 0.000000e+00 : f32
    %383 = vector.broadcast %cst_159 : f32 to vector<8x32xf32>
    %384 = arith.maximumf %382, %383 : vector<8x32xf32>
    %c0_160 = arith.constant 0 : index
    %c0_161 = arith.constant 0 : index
    %385 = vector.load %arg29[%c0_160, %c0_161] : memref<32x32xbf16, #tpu.memory_space<vmem>>, vector<32x32xbf16>
    %386 = arith.truncf %384 : vector<8x32xf32> to vector<8x32xbf16>
    %cst_162 = arith.constant dense<0.000000e+00> : vector<8x32xf32>
    %387 = tpu.matmul %386, %385, %cst_162 {dimension_numbers = #tpu.dot_dimension_numbers<[1], [0], [0], [1], [0, 0, 1, 1], [], []>} : vector<8x32xbf16>, vector<32x32xbf16>, vector<8x32xf32> -> vector<8x32xf32>
    %c0_163 = arith.constant 0 : index
    %c0_164 = arith.constant 0 : index
    %388 = vector.load %arg30[%c0_163, %c0_164] : memref<1x32xf32, #tpu.memory_space<vmem>>, vector<1x32xf32>
    %389 = vector.broadcast %388 : vector<1x32xf32> to vector<8x32xf32>
    %390 = arith.addf %387, %389 : vector<8x32xf32>
    %391 = vector.broadcast %6 : vector<8x1xf32> to vector<8x32xf32>
    %392 = arith.mulf %390, %391 : vector<8x32xf32>
    %393 = arith.addf %392, %352 : vector<8x32xf32>
    %394 = tpu.concatenate %393, %109, %248 in 1 : vector<8x32xf32>, vector<8x32xf32>, vector<8x32xf32> -> vector<8x96xf32>
    %395 = vector.shape_cast %394 : vector<8x96xf32> to vector<1x8x96xf32>
    %c0_165 = arith.constant 0 : index
    %c0_166 = arith.constant 0 : index
    %c0_167 = arith.constant 0 : index
    %396 = vector.load %arg35[%c0_165, %c0_166, %c0_167] : memref<1x8x96xf32, #tpu.memory_space<vmem>>, vector<1x8x96xf32>
    tpu.vector_store %arg35[%c0_165, %c0_166, %c0_167], %395 {strides = array<i32>} : memref<1x8x96xf32, #tpu.memory_space<vmem>>, vector<1x8x96xf32>,
    return
  }
  func.func @transform_0(%arg0: i32) -> (i32, i32, i32) {
    %c0_i32 = arith.constant 0 : i32
    %c0_i32_0 = arith.constant 0 : i32
    %c0_i32_1 = arith.constant 0 : i32
    return %arg0, %c0_i32, %c0_i32_0 : i32, i32, i32
  }
  func.func @transform_1(%arg0: i32) -> (i32, i32) {
    %c0_i32 = arith.constant 0 : i32
    %c0_i32_0 = arith.constant 0 : i32
    %c0_i32_1 = arith.constant 0 : i32
    return %c0_i32, %c0_i32_0 : i32, i32
  }
  func.func @transform_2(%arg0: i32) -> (i32, i32, i32) {
    %c0_i32 = arith.constant 0 : i32
    %c0_i32_0 = arith.constant 0 : i32
    %c0_i32_1 = arith.constant 0 : i32
    return %arg0, %c0_i32, %c0_i32_0 : i32, i32, i32
  }
  func.func @transform_3(%arg0: i32) -> (i32, i32) {
    %c0_i32 = arith.constant 0 : i32
    %c0_i32_0 = arith.constant 0 : i32
    %c0_i32_1 = arith.constant 0 : i32
    return %c0_i32, %c0_i32_0 : i32, i32
  }
  func.func @transform_4(%arg0: i32) -> (i32, i32, i32) {
    %c0_i32 = arith.constant 0 : i32
    %c0_i32_0 = arith.constant 0 : i32
    %c0_i32_1 = arith.constant 0 : i32
    return %arg0, %c0_i32, %c0_i32_0 : i32, i32, i32
  }
  func.func @transform_5(%arg0: i32) -> (i32, i32, i32) {
    %c0_i32 = arith.constant 0 : i32
    %c0_i32_0 = arith.constant 0 : i32
    %c0_i32_1 = arith.constant 0 : i32
    return %arg0, %c0_i32, %c0_i32_0 : i32, i32, i32
  }
  func.func @transform_6(%arg0: i32) -> (i32, i32, i32) {
    %c0_i32 = arith.constant 0 : i32
    %c0_i32_0 = arith.constant 0 : i32
    %c0_i32_1 = arith.constant 0 : i32
    return %arg0, %c0_i32, %c0_i32_0 : i32, i32, i32
  }
  func.func @transform_7(%arg0: i32) -> (i32, i32, i32) {
    %c0_i32 = arith.constant 0 : i32
    %c0_i32_0 = arith.constant 0 : i32
    %c0_i32_1 = arith.constant 0 : i32
    return %arg0, %c0_i32, %c0_i32_0 : i32, i32, i32
  }
  func.func @transform_8(%arg0: i32) -> (i32, i32) {
    %c0_i32 = arith.constant 0 : i32
    %c0_i32_0 = arith.constant 0 : i32
    %c0_i32_1 = arith.constant 0 : i32
    return %c0_i32, %c0_i32_0 : i32, i32
  }
  func.func @transform_9(%arg0: i32) -> (i32, i32) {
    %c0_i32 = arith.constant 0 : i32
    %c0_i32_0 = arith.constant 0 : i32
    %c0_i32_1 = arith.constant 0 : i32
    return %c0_i32, %c0_i32_0 : i32, i32
  }
  func.func @transform_10(%arg0: i32) -> (i32, i32) {
    %c0_i32 = arith.constant 0 : i32
    %c0_i32_0 = arith.constant 0 : i32
    %c0_i32_1 = arith.constant 0 : i32
    return %c0_i32, %c0_i32_0 : i32, i32
  }
  func.func @transform_11(%arg0: i32) -> (i32, i32) {
    %c0_i32 = arith.constant 0 : i32
    %c0_i32_0 = arith.constant 0 : i32
    %c0_i32_1 = arith.constant 0 : i32
    return %c0_i32, %c0_i32_0 : i32, i32
  }
  func.func @transform_12(%arg0: i32) -> (i32, i32) {
    %c0_i32 = arith.constant 0 : i32
    %c0_i32_0 = arith.constant 0 : i32
    %c0_i32_1 = arith.constant 0 : i32
    return %c0_i32, %c0_i32_0 : i32, i32
  }
  func.func @transform_13(%arg0: i32) -> (i32, i32) {
    %c0_i32 = arith.constant 0 : i32
    %c0_i32_0 = arith.constant 0 : i32
    %c0_i32_1 = arith.constant 0 : i32
    return %c0_i32, %c0_i32_0 : i32, i32
  }
  func.func @transform_14(%arg0: i32) -> (i32, i32) {
    %c0_i32 = arith.constant 0 : i32
    %c0_i32_0 = arith.constant 0 : i32
    %c0_i32_1 = arith.constant 0 : i32
    return %c0_i32, %c0_i32_0 : i32, i32
  }
  func.func @transform_15(%arg0: i32) -> (i32, i32) {
    %c0_i32 = arith.constant 0 : i32
    %c0_i32_0 = arith.constant 0 : i32
    %c0_i32_1 = arith.constant 0 : i32
    return %c0_i32, %c0_i32_0 : i32, i32
  }
  func.func @transform_16(%arg0: i32) -> (i32, i32) {
    %c0_i32 = arith.constant 0 : i32
    %c0_i32_0 = arith.constant 0 : i32
    %c0_i32_1 = arith.constant 0 : i32
    return %c0_i32, %c0_i32_0 : i32, i32
  }
  func.func @transform_17(%arg0: i32) -> (i32, i32) {
    %c0_i32 = arith.constant 0 : i32
    %c0_i32_0 = arith.constant 0 : i32
    %c0_i32_1 = arith.constant 0 : i32
    return %c0_i32, %c0_i32_0 : i32, i32
  }
  func.func @transform_18(%arg0: i32) -> (i32, i32) {
    %c0_i32 = arith.constant 0 : i32
    %c0_i32_0 = arith.constant 0 : i32
    %c0_i32_1 = arith.constant 0 : i32
    return %c0_i32, %c0_i32_0 : i32, i32
  }
  func.func @transform_19(%arg0: i32) -> (i32, i32) {
    %c0_i32 = arith.constant 0 : i32
    %c0_i32_0 = arith.constant 0 : i32
    %c0_i32_1 = arith.constant 0 : i32
    return %c0_i32, %c0_i32_0 : i32, i32
  }
  func.func @transform_20(%arg0: i32) -> (i32, i32) {
    %c0_i32 = arith.constant 0 : i32
    %c0_i32_0 = arith.constant 0 : i32
    %c0_i32_1 = arith.constant 0 : i32
    return %c0_i32, %c0_i32_0 : i32, i32
  }
  func.func @transform_21(%arg0: i32) -> (i32, i32) {
    %c0_i32 = arith.constant 0 : i32
    %c0_i32_0 = arith.constant 0 : i32
    %c0_i32_1 = arith.constant 0 : i32
    return %c0_i32, %c0_i32_0 : i32, i32
  }
  func.func @transform_22(%arg0: i32) -> (i32, i32) {
    %c0_i32 = arith.constant 0 : i32
    %c0_i32_0 = arith.constant 0 : i32
    %c0_i32_1 = arith.constant 0 : i32
    return %c0_i32, %c0_i32_0 : i32, i32
  }
  func.func @transform_23(%arg0: i32) -> (i32, i32) {
    %c0_i32 = arith.constant 0 : i32
    %c0_i32_0 = arith.constant 0 : i32
    %c0_i32_1 = arith.constant 0 : i32
    return %c0_i32, %c0_i32_0 : i32, i32
  }
  func.func @transform_24(%arg0: i32) -> (i32, i32) {
    %c0_i32 = arith.constant 0 : i32
    %c0_i32_0 = arith.constant 0 : i32
    %c0_i32_1 = arith.constant 0 : i32
    return %c0_i32, %c0_i32_0 : i32, i32
  }
  func.func @transform_25(%arg0: i32) -> (i32, i32) {
    %c0_i32 = arith.constant 0 : i32
    %c0_i32_0 = arith.constant 0 : i32
    %c0_i32_1 = arith.constant 0 : i32
    return %c0_i32, %c0_i32_0 : i32, i32
  }
  func.func @transform_26(%arg0: i32) -> (i32, i32) {
    %c0_i32 = arith.constant 0 : i32
    %c0_i32_0 = arith.constant 0 : i32
    %c0_i32_1 = arith.constant 0 : i32
    return %c0_i32, %c0_i32_0 : i32, i32
  }
  func.func @transform_27(%arg0: i32) -> (i32, i32) {
    %c0_i32 = arith.constant 0 : i32
    %c0_i32_0 = arith.constant 0 : i32
    %c0_i32_1 = arith.constant 0 : i32
    return %c0_i32, %c0_i32_0 : i32, i32
  }
  func.func @transform_28(%arg0: i32) -> (i32, i32) {
    %c0_i32 = arith.constant 0 : i32
    %c0_i32_0 = arith.constant 0 : i32
    %c0_i32_1 = arith.constant 0 : i32
    return %c0_i32, %c0_i32_0 : i32, i32
  }
  func.func @transform_29(%arg0: i32) -> (i32, i32) {
    %c0_i32 = arith.constant 0 : i32
    %c0_i32_0 = arith.constant 0 : i32
    %c0_i32_1 = arith.constant 0 : i32
    return %c0_i32, %c0_i32_0 : i32, i32
  }
  func.func @transform_30(%arg0: i32) -> (i32, i32) {
    %c0_i32 = arith.constant 0 : i32
    %c0_i32_0 = arith.constant 0 : i32
    %c0_i32_1 = arith.constant 0 : i32
    return %c0_i32, %c0_i32_0 : i32, i32
  }
  func.func @transform_31(%arg0: i32) -> (i32, i32) {
    %c0_i32 = arith.constant 0 : i32
    %c0_i32_0 = arith.constant 0 : i32
    %c0_i32_1 = arith.constant 0 : i32
    return %c0_i32, %c0_i32_0 : i32, i32
  }
  func.func @transform_32(%arg0: i32) -> (i32, i32) {
    %c0_i32 = arith.constant 0 : i32
    %c0_i32_0 = arith.constant 0 : i32
    %c0_i32_1 = arith.constant 0 : i32
    return %c0_i32, %c0_i32_0 : i32, i32
  }
  func.func @transform_33(%arg0: i32) -> (i32, i32) {
    %c0_i32 = arith.constant 0 : i32
    %c0_i32_0 = arith.constant 0 : i32
    %c0_i32_1 = arith.constant 0 : i32
    return %c0_i32, %c0_i32_0 : i32, i32
  }
  func.func @transform_34(%arg0: i32) -> (i32, i32, i32) {
    %c0_i32 = arith.constant 0 : i32
    %c0_i32_0 = arith.constant 0 : i32
    %c0_i32_1 = arith.constant 0 : i32
    return %arg0, %c0_i32, %c0_i32_0 : i32, i32, i32
  }
  func.func @transform_35(%arg0: i32) -> (i32, i32, i32) {
    %c0_i32 = arith.constant 0 : i32
    %c0_i32_0 = arith.constant 0 : i32
    %c0_i32_1 = arith.constant 0 : i32
    return %arg0, %c0_i32, %c0_i32_0 : i32, i32, i32
  }
}

module attributes {stable_mosaic.version = 11 : i64} {
  func.func @decoder_block_kernel(%arg0: i32, %arg1: memref<1x8x32xf32, #tpu.memory_space<vmem>>, %arg2: memref<8x32xf32, #tpu.memory_space<vmem>>, %arg3: memref<1x8x1xf32, #tpu.memory_space<vmem>>, %arg4: memref<8x8xbf16, #tpu.memory_space<vmem>>, %arg5: memref<1x16x32xf32, #tpu.memory_space<vmem>>, %arg6: memref<1x8x16xbf16, #tpu.memory_space<vmem>>, %arg7: memref<1x8x32xf32, #tpu.memory_space<vmem>>, %arg8: memref<1x8x8xbf16, #tpu.memory_space<vmem>>, %arg9: memref<32x192xbf16, #tpu.memory_space<vmem>>, %arg10: memref<64x32xbf16, #tpu.memory_space<vmem>>, %arg11: memref<1x32xf32, #tpu.memory_space<vmem>>, %arg12: memref<1x32xf32, #tpu.memory_space<vmem>>, %arg13: memref<1x32xf32, #tpu.memory_space<vmem>>, %arg14: memref<32x128xbf16, #tpu.memory_space<vmem>>, %arg15: memref<32x128xbf16, #tpu.memory_space<vmem>>, %arg16: memref<64x32xbf16, #tpu.memory_space<vmem>>, %arg17: memref<1x32xf32, #tpu.memory_space<vmem>>, %arg18: memref<1x32xf32, #tpu.memory_space<vmem>>, %arg19: memref<1x32xf32, #tpu.memory_space<vmem>>, %arg20: memref<32x128xbf16, #tpu.memory_space<vmem>>, %arg21: memref<64x32xbf16, #tpu.memory_space<vmem>>, %arg22: memref<1x32xf32, #tpu.memory_space<vmem>>, %arg23: memref<1x32xf32, #tpu.memory_space<vmem>>, %arg24: memref<1x32xf32, #tpu.memory_space<vmem>>, %arg25: memref<64x32xbf16, #tpu.memory_space<vmem>>, %arg26: memref<1x32xf32, #tpu.memory_space<vmem>>, %arg27: memref<32x32xbf16, #tpu.memory_space<vmem>>, %arg28: memref<1x32xf32, #tpu.memory_space<vmem>>, %arg29: memref<32x32xbf16, #tpu.memory_space<vmem>>, %arg30: memref<1x32xf32, #tpu.memory_space<vmem>>, %arg31: memref<1x32xf32, #tpu.memory_space<vmem>>, %arg32: memref<1x32xf32, #tpu.memory_space<vmem>>, %arg33: memref<1x32xf32, #tpu.memory_space<vmem>>, %arg34: memref<1x32xf32, #tpu.memory_space<vmem>>, %arg35: memref<1x8x96xf32, #tpu.memory_space<vmem>>, %arg36: memref<1x8x32xf32, #tpu.memory_space<vmem>>) attributes {dimension_semantics = [#tpu.dimension_semantics<parallel>], iteration_bounds = array<i64: 2>, scalar_prefetch = 0 : i64, scratch_operands = 0 : i64, tpu.core_type = #tpu.core_type<tc>, window_params = [{transform_indices = @transform_0, window_bounds = array<i64: 1, 8, 32>}, {pipeline_mode = #tpu.pipeline_mode<synchronous>, transform_indices = @transform_1, window_bounds = array<i64: 8, 32>}, {transform_indices = @transform_2, window_bounds = array<i64: 1, 8, 1>}, {pipeline_mode = #tpu.pipeline_mode<synchronous>, transform_indices = @transform_3, window_bounds = array<i64: 8, 8>}, {transform_indices = @transform_4, window_bounds = array<i64: 1, 16, 32>}, {transform_indices = @transform_5, window_bounds = array<i64: 1, 8, 16>}, {transform_indices = @transform_6, window_bounds = array<i64: 1, 8, 32>}, {transform_indices = @transform_7, window_bounds = array<i64: 1, 8, 8>}, {pipeline_mode = #tpu.pipeline_mode<synchronous>, transform_indices = @transform_8, window_bounds = array<i64: 32, 192>}, {pipeline_mode = #tpu.pipeline_mode<synchronous>, transform_indices = @transform_9, window_bounds = array<i64: 64, 32>}, {pipeline_mode = #tpu.pipeline_mode<synchronous>, transform_indices = @transform_10, window_bounds = array<i64: 1, 32>}, {pipeline_mode = #tpu.pipeline_mode<synchronous>, transform_indices = @transform_11, window_bounds = array<i64: 1, 32>}, {pipeline_mode = #tpu.pipeline_mode<synchronous>, transform_indices = @transform_12, window_bounds = array<i64: 1, 32>}, {pipeline_mode = #tpu.pipeline_mode<synchronous>, transform_indices = @transform_13, window_bounds = array<i64: 32, 128>}, {pipeline_mode = #tpu.pipeline_mode<synchronous>, transform_indices = @transform_14, window_bounds = array<i64: 32, 128>}, {pipeline_mode = #tpu.pipeline_mode<synchronous>, transform_indices = @transform_15, window_bounds = array<i64: 64, 32>}, {pipeline_mode = #tpu.pipeline_mode<synchronous>, transform_indices = @transform_16, window_bounds = array<i64: 1, 32>}, {pipeline_mode = #tpu.pipeline_mode<synchronous>, transform_indices = @transform_17, window_bounds = array<i64: 1, 32>}, {pipeline_mode = #tpu.pipeline_mode<synchronous>, transform_indices = @transform_18, window_bounds = array<i64: 1, 32>}, {pipeline_mode = #tpu.pipeline_mode<synchronous>, transform_indices = @transform_19, window_bounds = array<i64: 32, 128>}, {pipeline_mode = #tpu.pipeline_mode<synchronous>, transform_indices = @transform_20, window_bounds = array<i64: 64, 32>}, {pipeline_mode = #tpu.pipeline_mode<synchronous>, transform_indices = @transform_21, window_bounds = array<i64: 1, 32>}, {pipeline_mode = #tpu.pipeline_mode<synchronous>, transform_indices = @transform_22, window_bounds = array<i64: 1, 32>}, {pipeline_mode = #tpu.pipeline_mode<synchronous>, transform_indices = @transform_23, window_bounds = array<i64: 1, 32>}, {pipeline_mode = #tpu.pipeline_mode<synchronous>, transform_indices = @transform_24, window_bounds = array<i64: 64, 32>}, {pipeline_mode = #tpu.pipeline_mode<synchronous>, transform_indices = @transform_25, window_bounds = array<i64: 1, 32>}, {pipeline_mode = #tpu.pipeline_mode<synchronous>, transform_indices = @transform_26, window_bounds = array<i64: 32, 32>}, {pipeline_mode = #tpu.pipeline_mode<synchronous>, transform_indices = @transform_27, window_bounds = array<i64: 1, 32>}, {pipeline_mode = #tpu.pipeline_mode<synchronous>, transform_indices = @transform_28, window_bounds = array<i64: 32, 32>}, {pipeline_mode = #tpu.pipeline_mode<synchronous>, transform_indices = @transform_29, window_bounds = array<i64: 1, 32>}, {pipeline_mode = #tpu.pipeline_mode<synchronous>, transform_indices = @transform_30, window_bounds = array<i64: 1, 32>}, {pipeline_mode = #tpu.pipeline_mode<synchronous>, transform_indices = @transform_31, window_bounds = array<i64: 1, 32>}, {pipeline_mode = #tpu.pipeline_mode<synchronous>, transform_indices = @transform_32, window_bounds = array<i64: 1, 32>}, {pipeline_mode = #tpu.pipeline_mode<synchronous>, transform_indices = @transform_33, window_bounds = array<i64: 1, 32>}, {transform_indices = @transform_34, window_bounds = array<i64: 1, 8, 96>}, {transform_indices = @transform_35, window_bounds = array<i64: 1, 8, 32>}]} {
    %c0 = arith.constant 0 : index
    %c0_0 = arith.constant 0 : index
    %c0_1 = arith.constant 0 : index
    %0 = vector.load %arg1[%c0, %c0_0, %c0_1] : memref<1x8x32xf32, #tpu.memory_space<vmem>>, vector<1x8x32xf32>
    %c0_2 = arith.constant 0 : index
    %c0_3 = arith.constant 0 : index
    %1 = vector.load %arg2[%c0_2, %c0_3] : memref<8x32xf32, #tpu.memory_space<vmem>>, vector<8x32xf32>
    %2 = vector.shape_cast %1 : vector<8x32xf32> to vector<1x8x32xf32>
    %3 = arith.addf %0, %2 : vector<1x8x32xf32>
    %4 = vector.shape_cast %3 : vector<1x8x32xf32> to vector<8x32xf32>
    %c0_4 = arith.constant 0 : index
    %c0_5 = arith.constant 0 : index
    %c0_6 = arith.constant 0 : index
    %5 = vector.load %arg3[%c0_4, %c0_5, %c0_6] : memref<1x8x1xf32, #tpu.memory_space<vmem>>, vector<1x8x1xf32>
    %6 = vector.shape_cast %5 : vector<1x8x1xf32> to vector<8x1xf32>
    %c0_7 = arith.constant 0 : index
    %c0_8 = arith.constant 0 : index
    %7 = vector.load %arg4[%c0_7, %c0_8] : memref<8x8xbf16, #tpu.memory_space<vmem>>, vector<8x8xbf16>
    %8 = arith.extf %7 : vector<8x8xbf16> to vector<8x8xf32>
    %c0_9 = arith.constant 0 : index
    %c0_10 = arith.constant 0 : index
    %c0_11 = arith.constant 0 : index
    %9 = vector.load %arg6[%c0_9, %c0_10, %c0_11] : memref<1x8x16xbf16, #tpu.memory_space<vmem>>, vector<1x8x16xbf16>
    %10 = arith.extf %9 : vector<1x8x16xbf16> to vector<1x8x16xf32>
    %c0_12 = arith.constant 0 : index
    %c0_13 = arith.constant 0 : index
    %c0_14 = arith.constant 0 : index
    %11 = vector.load %arg8[%c0_12, %c0_13, %c0_14] : memref<1x8x8xbf16, #tpu.memory_space<vmem>>, vector<1x8x8xbf16>
    %12 = arith.extf %11 : vector<1x8x8xbf16> to vector<1x8x8xf32>
    %c0_15 = arith.constant 0 : index
    %c0_16 = arith.constant 0 : index
    %13 = vector.load %arg9[%c0_15, %c0_16] : memref<32x192xbf16, #tpu.memory_space<vmem>>, vector<32x192xbf16>
    %14 = arith.truncf %4 : vector<8x32xf32> to vector<8x32xbf16>
    %cst = arith.constant dense<0.000000e+00> : vector<8x192xf32>
    %15 = tpu.matmul %14, %13, %cst {dimension_numbers = #tpu.dot_dimension_numbers<[1], [0], [0], [1], [0, 0, 1, 1], [], []>} : vector<8x32xbf16>, vector<32x192xbf16>, vector<8x192xf32> -> vector<8x192xf32>
    %16 = arith.truncf %15 : vector<8x192xf32> to vector<8x192xbf16>
    %17 = vector.extract_strided_slice %16 {offsets = [0, 0], sizes = [8, 64], strides = [1, 1]} : vector<8x192xbf16> to vector<8x64xbf16>
    %18 = vector.extract_strided_slice %16 {offsets = [0, 64], sizes = [8, 64], strides = [1, 1]} : vector<8x192xbf16> to vector<8x64xbf16>
    %19 = vector.extract_strided_slice %16 {offsets = [0, 128], sizes = [8, 64], strides = [1, 1]} : vector<8x192xbf16> to vector<8x64xbf16>
    %c0_17 = arith.constant 0 : index
    %c0_18 = arith.constant 0 : index
    %20 = vector.load %arg10[%c0_17, %c0_18] : memref<64x32xbf16, #tpu.memory_space<vmem>>, vector<64x32xbf16>
    %c0_19 = arith.constant 0 : index
    %c0_20 = arith.constant 0 : index
    %21 = vector.load %arg11[%c0_19, %c0_20] : memref<1x32xf32, #tpu.memory_space<vmem>>, vector<1x32xf32>
    %c0_21 = arith.constant 0 : index
    %c0_22 = arith.constant 0 : index
    %22 = vector.load %arg12[%c0_21, %c0_22] : memref<1x32xf32, #tpu.memory_space<vmem>>, vector<1x32xf32>
    %c0_23 = arith.constant 0 : index
    %c0_24 = arith.constant 0 : index
    %23 = vector.load %arg13[%c0_23, %c0_24] : memref<1x32xf32, #tpu.memory_space<vmem>>, vector<1x32xf32>
    %24 = vector.extract_strided_slice %17 {offsets = [0, 0], sizes = [8, 32], strides = [1, 1]} : vector<8x64xbf16> to vector<8x32xbf16>
    %25 = vector.extract_strided_slice %18 {offsets = [0, 0], sizes = [8, 32], strides = [1, 1]} : vector<8x64xbf16> to vector<8x32xbf16>
    %cst_25 = arith.constant dense<0.000000e+00> : vector<8x8xf32>
    %26 = tpu.matmul %24, %25, %cst_25 {dimension_numbers = #tpu.dot_dimension_numbers<[1], [1], [0], [0], [0, 0, 1, 0], [], []>} : vector<8x32xbf16>, vector<8x32xbf16>, vector<8x8xf32> -> vector<8x8xf32>
    %cst_26 = arith.constant 0.176776692 : f32
    %27 = vector.broadcast %cst_26 : f32 to vector<8x8xf32>
    %28 = arith.mulf %26, %27 : vector<8x8xf32>
    %cst_27 = arith.constant -1.500000e+01 : f32
    %cst_28 = arith.constant 1.500000e+01 : f32
    %29 = vector.broadcast %cst_27 : f32 to vector<8x8xf32>
    %30 = arith.maximumf %29, %28 : vector<8x8xf32>
    %31 = vector.broadcast %cst_28 : f32 to vector<8x8xf32>
    %32 = arith.minimumf %31, %30 : vector<8x8xf32>
    %33 = arith.mulf %32, %8 : vector<8x8xf32>
    %cst_29 = arith.constant dense<0xFF800000> : vector<8xf32>
    %34 = vector.multi_reduction <maximumf>, %33, %cst_29 [1] : vector<8x8xf32> to vector<8xf32>
    %35 = vector.shape_cast %34 : vector<8xf32> to vector<8x1xf32>
    %36 = vector.broadcast %35 : vector<8x1xf32> to vector<8x8xf32>
    %37 = arith.subf %33, %36 : vector<8x8xf32>
    %38 = math.exp %37 : vector<8x8xf32>
    %39 = arith.mulf %38, %8 : vector<8x8xf32>
    %cst_30 = arith.constant dense<0.000000e+00> : vector<8xf32>
    %40 = vector.multi_reduction <add>, %39, %cst_30 [1] : vector<8x8xf32> to vector<8xf32>
    %41 = vector.shape_cast %40 : vector<8xf32> to vector<8x1xf32>
    %cst_31 = arith.constant 9.99999997E-7 : f32
    %42 = vector.broadcast %cst_31 : f32 to vector<8x1xf32>
    %43 = arith.addf %41, %42 : vector<8x1xf32>
    %44 = tpu.reciprocal %43 {approx = true} : vector<8x1xf32> -> vector<8x1xf32>
    %45 = vector.broadcast %44 : vector<8x1xf32> to vector<8x8xf32>
    %46 = arith.mulf %39, %45 : vector<8x8xf32>
    %47 = vector.extract_strided_slice %19 {offsets = [0, 0], sizes = [8, 32], strides = [1, 1]} : vector<8x64xbf16> to vector<8x32xbf16>
    %48 = arith.truncf %46 : vector<8x8xf32> to vector<8x8xbf16>
    %cst_32 = arith.constant dense<0.000000e+00> : vector<8x32xf32>
    %49 = tpu.matmul %48, %47, %cst_32 {dimension_numbers = #tpu.dot_dimension_numbers<[1], [0], [0], [1], [0, 0, 1, 1], [], []>} : vector<8x8xbf16>, vector<8x32xbf16>, vector<8x32xf32> -> vector<8x32xf32>
    %50 = vector.extract_strided_slice %20 {offsets = [0, 0], sizes = [32, 32], strides = [1, 1]} : vector<64x32xbf16> to vector<32x32xbf16>
    %51 = arith.truncf %49 : vector<8x32xf32> to vector<8x32xbf16>
    %cst_33 = arith.constant dense<0.000000e+00> : vector<8x32xf32>
    %52 = tpu.matmul %51, %50, %cst_33 {dimension_numbers = #tpu.dot_dimension_numbers<[1], [0], [0], [1], [0, 0, 1, 1], [], []>} : vector<8x32xbf16>, vector<32x32xbf16>, vector<8x32xf32> -> vector<8x32xf32>
    %53 = vector.extract_strided_slice %17 {offsets = [0, 32], sizes = [8, 32], strides = [1, 1]} : vector<8x64xbf16> to vector<8x32xbf16>
    %54 = vector.extract_strided_slice %18 {offsets = [0, 32], sizes = [8, 32], strides = [1, 1]} : vector<8x64xbf16> to vector<8x32xbf16>
    %cst_34 = arith.constant dense<0.000000e+00> : vector<8x8xf32>
    %55 = tpu.matmul %53, %54, %cst_34 {dimension_numbers = #tpu.dot_dimension_numbers<[1], [1], [0], [0], [0, 0, 1, 0], [], []>} : vector<8x32xbf16>, vector<8x32xbf16>, vector<8x8xf32> -> vector<8x8xf32>
    %cst_35 = arith.constant 0.176776692 : f32
    %56 = vector.broadcast %cst_35 : f32 to vector<8x8xf32>
    %57 = arith.mulf %55, %56 : vector<8x8xf32>
    %cst_36 = arith.constant -1.500000e+01 : f32
    %cst_37 = arith.constant 1.500000e+01 : f32
    %58 = vector.broadcast %cst_36 : f32 to vector<8x8xf32>
    %59 = arith.maximumf %58, %57 : vector<8x8xf32>
    %60 = vector.broadcast %cst_37 : f32 to vector<8x8xf32>
    %61 = arith.minimumf %60, %59 : vector<8x8xf32>
    %62 = arith.mulf %61, %8 : vector<8x8xf32>
    %cst_38 = arith.constant dense<0xFF800000> : vector<8xf32>
    %63 = vector.multi_reduction <maximumf>, %62, %cst_38 [1] : vector<8x8xf32> to vector<8xf32>
    %64 = vector.shape_cast %63 : vector<8xf32> to vector<8x1xf32>
    %65 = vector.broadcast %64 : vector<8x1xf32> to vector<8x8xf32>
    %66 = arith.subf %62, %65 : vector<8x8xf32>
    %67 = math.exp %66 : vector<8x8xf32>
    %68 = arith.mulf %67, %8 : vector<8x8xf32>
    %cst_39 = arith.constant dense<0.000000e+00> : vector<8xf32>
    %69 = vector.multi_reduction <add>, %68, %cst_39 [1] : vector<8x8xf32> to vector<8xf32>
    %70 = vector.shape_cast %69 : vector<8xf32> to vector<8x1xf32>
    %cst_40 = arith.constant 9.99999997E-7 : f32
    %71 = vector.broadcast %cst_40 : f32 to vector<8x1xf32>
    %72 = arith.addf %70, %71 : vector<8x1xf32>
    %73 = tpu.reciprocal %72 {approx = true} : vector<8x1xf32> -> vector<8x1xf32>
    %74 = vector.broadcast %73 : vector<8x1xf32> to vector<8x8xf32>
    %75 = arith.mulf %68, %74 : vector<8x8xf32>
    %76 = vector.extract_strided_slice %19 {offsets = [0, 32], sizes = [8, 32], strides = [1, 1]} : vector<8x64xbf16> to vector<8x32xbf16>
    %77 = arith.truncf %75 : vector<8x8xf32> to vector<8x8xbf16>
    %cst_41 = arith.constant dense<0.000000e+00> : vector<8x32xf32>
    %78 = tpu.matmul %77, %76, %cst_41 {dimension_numbers = #tpu.dot_dimension_numbers<[1], [0], [0], [1], [0, 0, 1, 1], [], []>} : vector<8x8xbf16>, vector<8x32xbf16>, vector<8x32xf32> -> vector<8x32xf32>
    %79 = vector.extract_strided_slice %20 {offsets = [32, 0], sizes = [32, 32], strides = [1, 1]} : vector<64x32xbf16> to vector<32x32xbf16>
    %80 = arith.truncf %78 : vector<8x32xf32> to vector<8x32xbf16>
    %cst_42 = arith.constant dense<0.000000e+00> : vector<8x32xf32>
    %81 = tpu.matmul %80, %79, %cst_42 {dimension_numbers = #tpu.dot_dimension_numbers<[1], [0], [0], [1], [0, 0, 1, 1], [], []>} : vector<8x32xbf16>, vector<32x32xbf16>, vector<8x32xf32> -> vector<8x32xf32>
    %82 = arith.addf %52, %81 : vector<8x32xf32>
    %83 = vector.broadcast %21 : vector<1x32xf32> to vector<8x32xf32>
    %84 = arith.addf %82, %83 : vector<8x32xf32>
    %85 = arith.addf %84, %4 : vector<8x32xf32>
    %cst_43 = arith.constant dense<0.000000e+00> : vector<8xf32>
    %86 = vector.multi_reduction <add>, %85, %cst_43 [1] : vector<8x32xf32> to vector<8xf32>
    %87 = vector.shape_cast %86 : vector<8xf32> to vector<8x1xf32>
    %cst_44 = arith.constant 3.200000e+01 : f32
    %88 = vector.broadcast %cst_44 : f32 to vector<8x1xf32>
    %89 = arith.divf %87, %88 : vector<8x1xf32>
    %90 = vector.broadcast %89 : vector<8x1xf32> to vector<8x32xf32>
    %91 = arith.subf %85, %90 : vector<8x32xf32>
    %92 = arith.mulf %91, %91 : vector<8x32xf32>
    %cst_45 = arith.constant dense<0.000000e+00> : vector<8xf32>
    %93 = vector.multi_reduction <add>, %92, %cst_45 [1] : vector<8x32xf32> to vector<8xf32>
    %94 = vector.shape_cast %93 : vector<8xf32> to vector<8x1xf32>
    %cst_46 = arith.constant 3.200000e+01 : f32
    %95 = vector.broadcast %cst_46 : f32 to vector<8x1xf32>
    %96 = arith.divf %94, %95 : vector<8x1xf32>
    %97 = vector.broadcast %89 : vector<8x1xf32> to vector<8x32xf32>
    %98 = arith.subf %85, %97 : vector<8x32xf32>
    %cst_47 = arith.constant 9.99999974E-6 : f32
    %99 = vector.broadcast %cst_47 : f32 to vector<8x1xf32>
    %100 = arith.addf %96, %99 : vector<8x1xf32>
    %101 = math.rsqrt %100 : vector<8x1xf32>
    %102 = vector.broadcast %101 : vector<8x1xf32> to vector<8x32xf32>
    %103 = arith.mulf %98, %102 : vector<8x32xf32>
    %104 = vector.broadcast %22 : vector<1x32xf32> to vector<8x32xf32>
    %105 = arith.mulf %103, %104 : vector<8x32xf32>
    %106 = vector.broadcast %23 : vector<1x32xf32> to vector<8x32xf32>
    %107 = arith.addf %105, %106 : vector<8x32xf32>
    %108 = vector.broadcast %6 : vector<8x1xf32> to vector<8x32xf32>
    %109 = arith.mulf %107, %108 : vector<8x32xf32>
    %110 = arith.addf %109, %4 : vector<8x32xf32>
    %c0_48 = arith.constant 0 : index
    %c0_49 = arith.constant 0 : index
    %111 = vector.load %arg31[%c0_48, %c0_49] : memref<1x32xf32, #tpu.memory_space<vmem>>, vector<1x32xf32>
    %c0_50 = arith.constant 0 : index
    %c0_51 = arith.constant 0 : index
    %112 = vector.load %arg32[%c0_50, %c0_51] : memref<1x32xf32, #tpu.memory_space<vmem>>, vector<1x32xf32>
    %cst_52 = arith.constant dense<0.000000e+00> : vector<8xf32>
    %113 = vector.multi_reduction <add>, %110, %cst_52 [1] : vector<8x32xf32> to vector<8xf32>
    %114 = vector.shape_cast %113 : vector<8xf32> to vector<8x1xf32>
    %cst_53 = arith.constant 3.200000e+01 : f32
    %115 = vector.broadcast %cst_53 : f32 to vector<8x1xf32>
    %116 = arith.divf %114, %115 : vector<8x1xf32>
    %117 = vector.broadcast %116 : vector<8x1xf32> to vector<8x32xf32>
    %118 = arith.subf %110, %117 : vector<8x32xf32>
    %119 = arith.mulf %118, %118 : vector<8x32xf32>
    %cst_54 = arith.constant dense<0.000000e+00> : vector<8xf32>
    %120 = vector.multi_reduction <add>, %119, %cst_54 [1] : vector<8x32xf32> to vector<8xf32>
    %121 = vector.shape_cast %120 : vector<8xf32> to vector<8x1xf32>
    %cst_55 = arith.constant 3.200000e+01 : f32
    %122 = vector.broadcast %cst_55 : f32 to vector<8x1xf32>
    %123 = arith.divf %121, %122 : vector<8x1xf32>
    %124 = vector.broadcast %116 : vector<8x1xf32> to vector<8x32xf32>
    %125 = arith.subf %110, %124 : vector<8x32xf32>
    %cst_56 = arith.constant 9.99999974E-6 : f32
    %126 = vector.broadcast %cst_56 : f32 to vector<8x1xf32>
    %127 = arith.addf %123, %126 : vector<8x1xf32>
    %128 = math.rsqrt %127 : vector<8x1xf32>
    %129 = vector.broadcast %128 : vector<8x1xf32> to vector<8x32xf32>
    %130 = arith.mulf %125, %129 : vector<8x32xf32>
    %131 = vector.broadcast %111 : vector<1x32xf32> to vector<8x32xf32>
    %132 = arith.mulf %130, %131 : vector<8x32xf32>
    %133 = vector.broadcast %112 : vector<1x32xf32> to vector<8x32xf32>
    %134 = arith.addf %132, %133 : vector<8x32xf32>
    %c0_57 = arith.constant 0 : index
    %c0_58 = arith.constant 0 : index
    %135 = vector.load %arg14[%c0_57, %c0_58] : memref<32x128xbf16, #tpu.memory_space<vmem>>, vector<32x128xbf16>
    %136 = arith.truncf %134 : vector<8x32xf32> to vector<8x32xbf16>
    %cst_59 = arith.constant dense<0.000000e+00> : vector<8x128xf32>
    %137 = tpu.matmul %136, %135, %cst_59 {dimension_numbers = #tpu.dot_dimension_numbers<[1], [0], [0], [1], [0, 0, 1, 1], [], []>} : vector<8x32xbf16>, vector<32x128xbf16>, vector<8x128xf32> -> vector<8x128xf32>
    %138 = arith.truncf %137 : vector<8x128xf32> to vector<8x128xbf16>
    %c0_60 = arith.constant 0 : index
    %c0_61 = arith.constant 0 : index
    %c0_62 = arith.constant 0 : index
    %139 = vector.load %arg5[%c0_60, %c0_61, %c0_62] : memref<1x16x32xf32, #tpu.memory_space<vmem>>, vector<1x16x32xf32>
    %140 = vector.shape_cast %139 : vector<1x16x32xf32> to vector<16x32xf32>
    %c0_63 = arith.constant 0 : index
    %c0_64 = arith.constant 0 : index
    %141 = vector.load %arg15[%c0_63, %c0_64] : memref<32x128xbf16, #tpu.memory_space<vmem>>, vector<32x128xbf16>
    %142 = arith.truncf %140 : vector<16x32xf32> to vector<16x32xbf16>
    %cst_65 = arith.constant dense<0.000000e+00> : vector<16x128xf32>
    %143 = tpu.matmul %142, %141, %cst_65 {dimension_numbers = #tpu.dot_dimension_numbers<[1], [0], [0], [1], [0, 0, 1, 1], [], []>} : vector<16x32xbf16>, vector<32x128xbf16>, vector<16x128xf32> -> vector<16x128xf32>
    %144 = arith.truncf %143 : vector<16x128xf32> to vector<16x128xbf16>
    %c0_66 = arith.constant 0 : index
    %c0_67 = arith.constant 0 : index
    %c0_68 = arith.constant 0 : index
    %145 = vector.load %arg7[%c0_66, %c0_67, %c0_68] : memref<1x8x32xf32, #tpu.memory_space<vmem>>, vector<1x8x32xf32>
    %146 = vector.shape_cast %145 : vector<1x8x32xf32> to vector<8x32xf32>
    %c0_69 = arith.constant 0 : index
    %c0_70 = arith.constant 0 : index
    %147 = vector.load %arg20[%c0_69, %c0_70] : memref<32x128xbf16, #tpu.memory_space<vmem>>, vector<32x128xbf16>
    %148 = arith.truncf %146 : vector<8x32xf32> to vector<8x32xbf16>
    %cst_71 = arith.constant dense<0.000000e+00> : vector<8x128xf32>
    %149 = tpu.matmul %148, %147, %cst_71 {dimension_numbers = #tpu.dot_dimension_numbers<[1], [0], [0], [1], [0, 0, 1, 1], [], []>} : vector<8x32xbf16>, vector<32x128xbf16>, vector<8x128xf32> -> vector<8x128xf32>
    %150 = arith.truncf %149 : vector<8x128xf32> to vector<8x128xbf16>
    %151 = vector.extract_strided_slice %138 {offsets = [0, 0], sizes = [8, 64], strides = [1, 1]} : vector<8x128xbf16> to vector<8x64xbf16>
    %152 = vector.extract_strided_slice %144 {offsets = [0, 0], sizes = [16, 64], strides = [1, 1]} : vector<16x128xbf16> to vector<16x64xbf16>
    %153 = vector.extract_strided_slice %144 {offsets = [0, 64], sizes = [16, 64], strides = [1, 1]} : vector<16x128xbf16> to vector<16x64xbf16>
    %c0_72 = arith.constant 0 : index
    %c0_73 = arith.constant 0 : index
    %154 = vector.load %arg16[%c0_72, %c0_73] : memref<64x32xbf16, #tpu.memory_space<vmem>>, vector<64x32xbf16>
    %c0_74 = arith.constant 0 : index
    %c0_75 = arith.constant 0 : index
    %155 = vector.load %arg17[%c0_74, %c0_75] : memref<1x32xf32, #tpu.memory_space<vmem>>, vector<1x32xf32>
    %c0_76 = arith.constant 0 : index
    %c0_77 = arith.constant 0 : index
    %156 = vector.load %arg18[%c0_76, %c0_77] : memref<1x32xf32, #tpu.memory_space<vmem>>, vector<1x32xf32>
    %c0_78 = arith.constant 0 : index
    %c0_79 = arith.constant 0 : index
    %157 = vector.load %arg19[%c0_78, %c0_79] : memref<1x32xf32, #tpu.memory_space<vmem>>, vector<1x32xf32>
    %158 = vector.shape_cast %10 : vector<1x8x16xf32> to vector<8x16xf32>
    %159 = vector.extract_strided_slice %151 {offsets = [0, 0], sizes = [8, 32], strides = [1, 1]} : vector<8x64xbf16> to vector<8x32xbf16>
    %160 = vector.extract_strided_slice %152 {offsets = [0, 0], sizes = [16, 32], strides = [1, 1]} : vector<16x64xbf16> to vector<16x32xbf16>
    %cst_80 = arith.constant dense<0.000000e+00> : vector<8x16xf32>
    %161 = tpu.matmul %159, %160, %cst_80 {dimension_numbers = #tpu.dot_dimension_numbers<[1], [1], [0], [0], [0, 0, 1, 0], [], []>} : vector<8x32xbf16>, vector<16x32xbf16>, vector<8x16xf32> -> vector<8x16xf32>
    %cst_81 = arith.constant 0.176776692 : f32
    %162 = vector.broadcast %cst_81 : f32 to vector<8x16xf32>
    %163 = arith.mulf %161, %162 : vector<8x16xf32>
    %cst_82 = arith.constant -1.500000e+01 : f32
    %cst_83 = arith.constant 1.500000e+01 : f32
    %164 = vector.broadcast %cst_82 : f32 to vector<8x16xf32>
    %165 = arith.maximumf %164, %163 : vector<8x16xf32>
    %166 = vector.broadcast %cst_83 : f32 to vector<8x16xf32>
    %167 = arith.minimumf %166, %165 : vector<8x16xf32>
    %168 = arith.mulf %167, %158 : vector<8x16xf32>
    %cst_84 = arith.constant dense<0xFF800000> : vector<8xf32>
    %169 = vector.multi_reduction <maximumf>, %168, %cst_84 [1] : vector<8x16xf32> to vector<8xf32>
    %170 = vector.shape_cast %169 : vector<8xf32> to vector<8x1xf32>
    %171 = vector.broadcast %170 : vector<8x1xf32> to vector<8x16xf32>
    %172 = arith.subf %168, %171 : vector<8x16xf32>
    %173 = math.exp %172 : vector<8x16xf32>
    %174 = arith.mulf %173, %158 : vector<8x16xf32>
    %cst_85 = arith.constant dense<0.000000e+00> : vector<8xf32>
    %175 = vector.multi_reduction <add>, %174, %cst_85 [1] : vector<8x16xf32> to vector<8xf32>
    %176 = vector.shape_cast %175 : vector<8xf32> to vector<8x1xf32>
    %cst_86 = arith.constant 9.99999997E-7 : f32
    %177 = vector.broadcast %cst_86 : f32 to vector<8x1xf32>
    %178 = arith.addf %176, %177 : vector<8x1xf32>
    %179 = tpu.reciprocal %178 {approx = true} : vector<8x1xf32> -> vector<8x1xf32>
    %180 = vector.broadcast %179 : vector<8x1xf32> to vector<8x16xf32>
    %181 = arith.mulf %174, %180 : vector<8x16xf32>
    %c0_87 = arith.constant 0 : index
    %c0_88 = arith.constant 0 : index
    %c0_89 = arith.constant 0 : index
    %182 = vector.load %arg36[%c0_87, %c0_88, %c0_89] : memref<1x8x32xf32, #tpu.memory_space<vmem>>, vector<1x8x16xf32>
    %183 = vector.shape_cast %182 : vector<1x8x16xf32> to vector<8x16xf32>
    %184 = vector.shape_cast %181 : vector<8x16xf32> to vector<1x8x16xf32>
    tpu.vector_store %arg36[%c0_87, %c0_88, %c0_89], %184 {strides = array<i32>} : memref<1x8x32xf32, #tpu.memory_space<vmem>>, vector<1x8x16xf32>,
    %185 = vector.extract_strided_slice %153 {offsets = [0, 0], sizes = [16, 32], strides = [1, 1]} : vector<16x64xbf16> to vector<16x32xbf16>
    %186 = arith.truncf %181 : vector<8x16xf32> to vector<8x16xbf16>
    %cst_90 = arith.constant dense<0.000000e+00> : vector<8x32xf32>
    %187 = tpu.matmul %186, %185, %cst_90 {dimension_numbers = #tpu.dot_dimension_numbers<[1], [0], [0], [1], [0, 0, 1, 1], [], []>} : vector<8x16xbf16>, vector<16x32xbf16>, vector<8x32xf32> -> vector<8x32xf32>
    %188 = vector.extract_strided_slice %154 {offsets = [0, 0], sizes = [32, 32], strides = [1, 1]} : vector<64x32xbf16> to vector<32x32xbf16>
    %189 = arith.truncf %187 : vector<8x32xf32> to vector<8x32xbf16>
    %cst_91 = arith.constant dense<0.000000e+00> : vector<8x32xf32>
    %190 = tpu.matmul %189, %188, %cst_91 {dimension_numbers = #tpu.dot_dimension_numbers<[1], [0], [0], [1], [0, 0, 1, 1], [], []>} : vector<8x32xbf16>, vector<32x32xbf16>, vector<8x32xf32> -> vector<8x32xf32>
    %191 = vector.extract_strided_slice %151 {offsets = [0, 32], sizes = [8, 32], strides = [1, 1]} : vector<8x64xbf16> to vector<8x32xbf16>
    %192 = vector.extract_strided_slice %152 {offsets = [0, 32], sizes = [16, 32], strides = [1, 1]} : vector<16x64xbf16> to vector<16x32xbf16>
    %cst_92 = arith.constant dense<0.000000e+00> : vector<8x16xf32>
    %193 = tpu.matmul %191, %192, %cst_92 {dimension_numbers = #tpu.dot_dimension_numbers<[1], [1], [0], [0], [0, 0, 1, 0], [], []>} : vector<8x32xbf16>, vector<16x32xbf16>, vector<8x16xf32> -> vector<8x16xf32>
    %cst_93 = arith.constant 0.176776692 : f32
    %194 = vector.broadcast %cst_93 : f32 to vector<8x16xf32>
    %195 = arith.mulf %193, %194 : vector<8x16xf32>
    %cst_94 = arith.constant -1.500000e+01 : f32
    %cst_95 = arith.constant 1.500000e+01 : f32
    %196 = vector.broadcast %cst_94 : f32 to vector<8x16xf32>
    %197 = arith.maximumf %196, %195 : vector<8x16xf32>
    %198 = vector.broadcast %cst_95 : f32 to vector<8x16xf32>
    %199 = arith.minimumf %198, %197 : vector<8x16xf32>
    %200 = arith.mulf %199, %158 : vector<8x16xf32>
    %cst_96 = arith.constant dense<0xFF800000> : vector<8xf32>
    %201 = vector.multi_reduction <maximumf>, %200, %cst_96 [1] : vector<8x16xf32> to vector<8xf32>
    %202 = vector.shape_cast %201 : vector<8xf32> to vector<8x1xf32>
    %203 = vector.broadcast %202 : vector<8x1xf32> to vector<8x16xf32>
    %204 = arith.subf %200, %203 : vector<8x16xf32>
    %205 = math.exp %204 : vector<8x16xf32>
    %206 = arith.mulf %205, %158 : vector<8x16xf32>
    %cst_97 = arith.constant dense<0.000000e+00> : vector<8xf32>
    %207 = vector.multi_reduction <add>, %206, %cst_97 [1] : vector<8x16xf32> to vector<8xf32>
    %208 = vector.shape_cast %207 : vector<8xf32> to vector<8x1xf32>
    %cst_98 = arith.constant 9.99999997E-7 : f32
    %209 = vector.broadcast %cst_98 : f32 to vector<8x1xf32>
    %210 = arith.addf %208, %209 : vector<8x1xf32>
    %211 = tpu.reciprocal %210 {approx = true} : vector<8x1xf32> -> vector<8x1xf32>
    %212 = vector.broadcast %211 : vector<8x1xf32> to vector<8x16xf32>
    %213 = arith.mulf %206, %212 : vector<8x16xf32>
    %c0_99 = arith.constant 0 : index
    %c0_100 = arith.constant 0 : index
    %c16 = arith.constant 16 : index
    %214 = vector.load %arg36[%c0_99, %c0_100, %c16] : memref<1x8x32xf32, #tpu.memory_space<vmem>>, vector<1x8x16xf32>
    %215 = vector.shape_cast %214 : vector<1x8x16xf32> to vector<8x16xf32>
    %216 = vector.shape_cast %213 : vector<8x16xf32> to vector<1x8x16xf32>
    tpu.vector_store %arg36[%c0_99, %c0_100, %c16], %216 {strides = array<i32>} : memref<1x8x32xf32, #tpu.memory_space<vmem>>, vector<1x8x16xf32>,
    %217 = vector.extract_strided_slice %153 {offsets = [0, 32], sizes = [16, 32], strides = [1, 1]} : vector<16x64xbf16> to vector<16x32xbf16>
    %218 = arith.truncf %213 : vector<8x16xf32> to vector<8x16xbf16>
    %cst_101 = arith.constant dense<0.000000e+00> : vector<8x32xf32>
    %219 = tpu.matmul %218, %217, %cst_101 {dimension_numbers = #tpu.dot_dimension_numbers<[1], [0], [0], [1], [0, 0, 1, 1], [], []>} : vector<8x16xbf16>, vector<16x32xbf16>, vector<8x32xf32> -> vector<8x32xf32>
    %220 = vector.extract_strided_slice %154 {offsets = [32, 0], sizes = [32, 32], strides = [1, 1]} : vector<64x32xbf16> to vector<32x32xbf16>
    %221 = arith.truncf %219 : vector<8x32xf32> to vector<8x32xbf16>
    %cst_102 = arith.constant dense<0.000000e+00> : vector<8x32xf32>
    %222 = tpu.matmul %221, %220, %cst_102 {dimension_numbers = #tpu.dot_dimension_numbers<[1], [0], [0], [1], [0, 0, 1, 1], [], []>} : vector<8x32xbf16>, vector<32x32xbf16>, vector<8x32xf32> -> vector<8x32xf32>
    %223 = arith.addf %190, %222 : vector<8x32xf32>
    %224 = vector.broadcast %155 : vector<1x32xf32> to vector<8x32xf32>
    %225 = arith.addf %223, %224 : vector<8x32xf32>
    %226 = arith.addf %225, %134 : vector<8x32xf32>
    %cst_103 = arith.constant dense<0.000000e+00> : vector<8xf32>
    %227 = vector.multi_reduction <add>, %226, %cst_103 [1] : vector<8x32xf32> to vector<8xf32>
    %228 = vector.shape_cast %227 : vector<8xf32> to vector<8x1xf32>
    %cst_104 = arith.constant 3.200000e+01 : f32
    %229 = vector.broadcast %cst_104 : f32 to vector<8x1xf32>
    %230 = arith.divf %228, %229 : vector<8x1xf32>
    %231 = vector.broadcast %230 : vector<8x1xf32> to vector<8x32xf32>
    %232 = arith.subf %226, %231 : vector<8x32xf32>
    %233 = arith.mulf %232, %232 : vector<8x32xf32>
    %cst_105 = arith.constant dense<0.000000e+00> : vector<8xf32>
    %234 = vector.multi_reduction <add>, %233, %cst_105 [1] : vector<8x32xf32> to vector<8xf32>
    %235 = vector.shape_cast %234 : vector<8xf32> to vector<8x1xf32>
    %cst_106 = arith.constant 3.200000e+01 : f32
    %236 = vector.broadcast %cst_106 : f32 to vector<8x1xf32>
    %237 = arith.divf %235, %236 : vector<8x1xf32>
    %238 = vector.broadcast %230 : vector<8x1xf32> to vector<8x32xf32>
    %239 = arith.subf %226, %238 : vector<8x32xf32>
    %cst_107 = arith.constant 9.99999974E-6 : f32
    %240 = vector.broadcast %cst_107 : f32 to vector<8x1xf32>
    %241 = arith.addf %237, %240 : vector<8x1xf32>
    %242 = math.rsqrt %241 : vector<8x1xf32>
    %243 = vector.broadcast %242 : vector<8x1xf32> to vector<8x32xf32>
    %244 = arith.mulf %239, %243 : vector<8x32xf32>
    %245 = vector.broadcast %156 : vector<1x32xf32> to vector<8x32xf32>
    %246 = arith.mulf %244, %245 : vector<8x32xf32>
    %247 = vector.broadcast %157 : vector<1x32xf32> to vector<8x32xf32>
    %248 = arith.addf %246, %247 : vector<8x32xf32>
    %249 = vector.extract_strided_slice %138 {offsets = [0, 64], sizes = [8, 64], strides = [1, 1]} : vector<8x128xbf16> to vector<8x64xbf16>
    %250 = vector.extract_strided_slice %150 {offsets = [0, 0], sizes = [8, 64], strides = [1, 1]} : vector<8x128xbf16> to vector<8x64xbf16>
    %251 = vector.extract_strided_slice %150 {offsets = [0, 64], sizes = [8, 64], strides = [1, 1]} : vector<8x128xbf16> to vector<8x64xbf16>
    %c0_108 = arith.constant 0 : index
    %c0_109 = arith.constant 0 : index
    %252 = vector.load %arg21[%c0_108, %c0_109] : memref<64x32xbf16, #tpu.memory_space<vmem>>, vector<64x32xbf16>
    %c0_110 = arith.constant 0 : index
    %c0_111 = arith.constant 0 : index
    %253 = vector.load %arg22[%c0_110, %c0_111] : memref<1x32xf32, #tpu.memory_space<vmem>>, vector<1x32xf32>
    %c0_112 = arith.constant 0 : index
    %c0_113 = arith.constant 0 : index
    %254 = vector.load %arg23[%c0_112, %c0_113] : memref<1x32xf32, #tpu.memory_space<vmem>>, vector<1x32xf32>
    %c0_114 = arith.constant 0 : index
    %c0_115 = arith.constant 0 : index
    %255 = vector.load %arg24[%c0_114, %c0_115] : memref<1x32xf32, #tpu.memory_space<vmem>>, vector<1x32xf32>
    %256 = vector.shape_cast %12 : vector<1x8x8xf32> to vector<8x8xf32>
    %257 = vector.extract_strided_slice %249 {offsets = [0, 0], sizes = [8, 32], strides = [1, 1]} : vector<8x64xbf16> to vector<8x32xbf16>
    %258 = vector.extract_strided_slice %250 {offsets = [0, 0], sizes = [8, 32], strides = [1, 1]} : vector<8x64xbf16> to vector<8x32xbf16>
    %cst_116 = arith.constant dense<0.000000e+00> : vector<8x8xf32>
    %259 = tpu.matmul %257, %258, %cst_116 {dimension_numbers = #tpu.dot_dimension_numbers<[1], [1], [0], [0], [0, 0, 1, 0], [], []>} : vector<8x32xbf16>, vector<8x32xbf16>, vector<8x8xf32> -> vector<8x8xf32>
    %cst_117 = arith.constant 0.176776692 : f32
    %260 = vector.broadcast %cst_117 : f32 to vector<8x8xf32>
    %261 = arith.mulf %259, %260 : vector<8x8xf32>
    %cst_118 = arith.constant -1.500000e+01 : f32
    %cst_119 = arith.constant 1.500000e+01 : f32
    %262 = vector.broadcast %cst_118 : f32 to vector<8x8xf32>
    %263 = arith.maximumf %262, %261 : vector<8x8xf32>
    %264 = vector.broadcast %cst_119 : f32 to vector<8x8xf32>
    %265 = arith.minimumf %264, %263 : vector<8x8xf32>
    %266 = arith.mulf %265, %256 : vector<8x8xf32>
    %cst_120 = arith.constant dense<0xFF800000> : vector<8xf32>
    %267 = vector.multi_reduction <maximumf>, %266, %cst_120 [1] : vector<8x8xf32> to vector<8xf32>
    %268 = vector.shape_cast %267 : vector<8xf32> to vector<8x1xf32>
    %269 = vector.broadcast %268 : vector<8x1xf32> to vector<8x8xf32>
    %270 = arith.subf %266, %269 : vector<8x8xf32>
    %271 = math.exp %270 : vector<8x8xf32>
    %272 = arith.mulf %271, %256 : vector<8x8xf32>
    %cst_121 = arith.constant dense<0.000000e+00> : vector<8xf32>
    %273 = vector.multi_reduction <add>, %272, %cst_121 [1] : vector<8x8xf32> to vector<8xf32>
    %274 = vector.shape_cast %273 : vector<8xf32> to vector<8x1xf32>
    %cst_122 = arith.constant 9.99999997E-7 : f32
    %275 = vector.broadcast %cst_122 : f32 to vector<8x1xf32>
    %276 = arith.addf %274, %275 : vector<8x1xf32>
    %277 = tpu.reciprocal %276 {approx = true} : vector<8x1xf32> -> vector<8x1xf32>
    %278 = vector.broadcast %277 : vector<8x1xf32> to vector<8x8xf32>
    %279 = arith.mulf %272, %278 : vector<8x8xf32>
    %280 = vector.extract_strided_slice %251 {offsets = [0, 0], sizes = [8, 32], strides = [1, 1]} : vector<8x64xbf16> to vector<8x32xbf16>
    %281 = arith.truncf %279 : vector<8x8xf32> to vector<8x8xbf16>
    %cst_123 = arith.constant dense<0.000000e+00> : vector<8x32xf32>
    %282 = tpu.matmul %281, %280, %cst_123 {dimension_numbers = #tpu.dot_dimension_numbers<[1], [0], [0], [1], [0, 0, 1, 1], [], []>} : vector<8x8xbf16>, vector<8x32xbf16>, vector<8x32xf32> -> vector<8x32xf32>
    %283 = vector.extract_strided_slice %252 {offsets = [0, 0], sizes = [32, 32], strides = [1, 1]} : vector<64x32xbf16> to vector<32x32xbf16>
    %284 = arith.truncf %282 : vector<8x32xf32> to vector<8x32xbf16>
    %cst_124 = arith.constant dense<0.000000e+00> : vector<8x32xf32>
    %285 = tpu.matmul %284, %283, %cst_124 {dimension_numbers = #tpu.dot_dimension_numbers<[1], [0], [0], [1], [0, 0, 1, 1], [], []>} : vector<8x32xbf16>, vector<32x32xbf16>, vector<8x32xf32> -> vector<8x32xf32>
    %286 = vector.extract_strided_slice %249 {offsets = [0, 32], sizes = [8, 32], strides = [1, 1]} : vector<8x64xbf16> to vector<8x32xbf16>
    %287 = vector.extract_strided_slice %250 {offsets = [0, 32], sizes = [8, 32], strides = [1, 1]} : vector<8x64xbf16> to vector<8x32xbf16>
    %cst_125 = arith.constant dense<0.000000e+00> : vector<8x8xf32>
    %288 = tpu.matmul %286, %287, %cst_125 {dimension_numbers = #tpu.dot_dimension_numbers<[1], [1], [0], [0], [0, 0, 1, 0], [], []>} : vector<8x32xbf16>, vector<8x32xbf16>, vector<8x8xf32> -> vector<8x8xf32>
    %cst_126 = arith.constant 0.176776692 : f32
    %289 = vector.broadcast %cst_126 : f32 to vector<8x8xf32>
    %290 = arith.mulf %288, %289 : vector<8x8xf32>
    %cst_127 = arith.constant -1.500000e+01 : f32
    %cst_128 = arith.constant 1.500000e+01 : f32
    %291 = vector.broadcast %cst_127 : f32 to vector<8x8xf32>
    %292 = arith.maximumf %291, %290 : vector<8x8xf32>
    %293 = vector.broadcast %cst_128 : f32 to vector<8x8xf32>
    %294 = arith.minimumf %293, %292 : vector<8x8xf32>
    %295 = arith.mulf %294, %256 : vector<8x8xf32>
    %cst_129 = arith.constant dense<0xFF800000> : vector<8xf32>
    %296 = vector.multi_reduction <maximumf>, %295, %cst_129 [1] : vector<8x8xf32> to vector<8xf32>
    %297 = vector.shape_cast %296 : vector<8xf32> to vector<8x1xf32>
    %298 = vector.broadcast %297 : vector<8x1xf32> to vector<8x8xf32>
    %299 = arith.subf %295, %298 : vector<8x8xf32>
    %300 = math.exp %299 : vector<8x8xf32>
    %301 = arith.mulf %300, %256 : vector<8x8xf32>
    %cst_130 = arith.constant dense<0.000000e+00> : vector<8xf32>
    %302 = vector.multi_reduction <add>, %301, %cst_130 [1] : vector<8x8xf32> to vector<8xf32>
    %303 = vector.shape_cast %302 : vector<8xf32> to vector<8x1xf32>
    %cst_131 = arith.constant 9.99999997E-7 : f32
    %304 = vector.broadcast %cst_131 : f32 to vector<8x1xf32>
    %305 = arith.addf %303, %304 : vector<8x1xf32>
    %306 = tpu.reciprocal %305 {approx = true} : vector<8x1xf32> -> vector<8x1xf32>
    %307 = vector.broadcast %306 : vector<8x1xf32> to vector<8x8xf32>
    %308 = arith.mulf %301, %307 : vector<8x8xf32>
    %309 = vector.extract_strided_slice %251 {offsets = [0, 32], sizes = [8, 32], strides = [1, 1]} : vector<8x64xbf16> to vector<8x32xbf16>
    %310 = arith.truncf %308 : vector<8x8xf32> to vector<8x8xbf16>
    %cst_132 = arith.constant dense<0.000000e+00> : vector<8x32xf32>
    %311 = tpu.matmul %310, %309, %cst_132 {dimension_numbers = #tpu.dot_dimension_numbers<[1], [0], [0], [1], [0, 0, 1, 1], [], []>} : vector<8x8xbf16>, vector<8x32xbf16>, vector<8x32xf32> -> vector<8x32xf32>
    %312 = vector.extract_strided_slice %252 {offsets = [32, 0], sizes = [32, 32], strides = [1, 1]} : vector<64x32xbf16> to vector<32x32xbf16>
    %313 = arith.truncf %311 : vector<8x32xf32> to vector<8x32xbf16>
    %cst_133 = arith.constant dense<0.000000e+00> : vector<8x32xf32>
    %314 = tpu.matmul %313, %312, %cst_133 {dimension_numbers = #tpu.dot_dimension_numbers<[1], [0], [0], [1], [0, 0, 1, 1], [], []>} : vector<8x32xbf16>, vector<32x32xbf16>, vector<8x32xf32> -> vector<8x32xf32>
    %315 = arith.addf %285, %314 : vector<8x32xf32>
    %316 = vector.broadcast %253 : vector<1x32xf32> to vector<8x32xf32>
    %317 = arith.addf %315, %316 : vector<8x32xf32>
    %318 = arith.addf %317, %134 : vector<8x32xf32>
    %cst_134 = arith.constant dense<0.000000e+00> : vector<8xf32>
    %319 = vector.multi_reduction <add>, %318, %cst_134 [1] : vector<8x32xf32> to vector<8xf32>
    %320 = vector.shape_cast %319 : vector<8xf32> to vector<8x1xf32>
    %cst_135 = arith.constant 3.200000e+01 : f32
    %321 = vector.broadcast %cst_135 : f32 to vector<8x1xf32>
    %322 = arith.divf %320, %321 : vector<8x1xf32>
    %323 = vector.broadcast %322 : vector<8x1xf32> to vector<8x32xf32>
    %324 = arith.subf %318, %323 : vector<8x32xf32>
    %325 = arith.mulf %324, %324 : vector<8x32xf32>
    %cst_136 = arith.constant dense<0.000000e+00> : vector<8xf32>
    %326 = vector.multi_reduction <add>, %325, %cst_136 [1] : vector<8x32xf32> to vector<8xf32>
    %327 = vector.shape_cast %326 : vector<8xf32> to vector<8x1xf32>
    %cst_137 = arith.constant 3.200000e+01 : f32
    %328 = vector.broadcast %cst_137 : f32 to vector<8x1xf32>
    %329 = arith.divf %327, %328 : vector<8x1xf32>
    %330 = vector.broadcast %322 : vector<8x1xf32> to vector<8x32xf32>
    %331 = arith.subf %318, %330 : vector<8x32xf32>
    %cst_138 = arith.constant 9.99999974E-6 : f32
    %332 = vector.broadcast %cst_138 : f32 to vector<8x1xf32>
    %333 = arith.addf %329, %332 : vector<8x1xf32>
    %334 = math.rsqrt %333 : vector<8x1xf32>
    %335 = vector.broadcast %334 : vector<8x1xf32> to vector<8x32xf32>
    %336 = arith.mulf %331, %335 : vector<8x32xf32>
    %337 = vector.broadcast %254 : vector<1x32xf32> to vector<8x32xf32>
    %338 = arith.mulf %336, %337 : vector<8x32xf32>
    %339 = vector.broadcast %255 : vector<1x32xf32> to vector<8x32xf32>
    %340 = arith.addf %338, %339 : vector<8x32xf32>
    %341 = tpu.concatenate %248, %340 in 1 : vector<8x32xf32>, vector<8x32xf32> -> vector<8x64xf32>
    %c0_139 = arith.constant 0 : index
    %c0_140 = arith.constant 0 : index
    %342 = vector.load %arg25[%c0_139, %c0_140] : memref<64x32xbf16, #tpu.memory_space<vmem>>, vector<64x32xbf16>
    %343 = arith.truncf %341 : vector<8x64xf32> to vector<8x64xbf16>
    %cst_141 = arith.constant dense<0.000000e+00> : vector<8x32xf32>
    %344 = tpu.matmul %343, %342, %cst_141 {dimension_numbers = #tpu.dot_dimension_numbers<[1], [0], [0], [1], [0, 0, 1, 1], [], []>} : vector<8x64xbf16>, vector<64x32xbf16>, vector<8x32xf32> -> vector<8x32xf32>
    %c0_142 = arith.constant 0 : index
    %c0_143 = arith.constant 0 : index
    %345 = vector.load %arg26[%c0_142, %c0_143] : memref<1x32xf32, #tpu.memory_space<vmem>>, vector<1x32xf32>
    %346 = vector.broadcast %345 : vector<1x32xf32> to vector<8x32xf32>
    %347 = arith.addf %344, %346 : vector<8x32xf32>
    %cst_144 = arith.constant 0.000000e+00 : f32
    %348 = vector.broadcast %cst_144 : f32 to vector<8x32xf32>
    %349 = arith.maximumf %347, %348 : vector<8x32xf32>
    %350 = vector.broadcast %6 : vector<8x1xf32> to vector<8x32xf32>
    %351 = arith.mulf %349, %350 : vector<8x32xf32>
    %352 = arith.addf %351, %110 : vector<8x32xf32>
    %c0_145 = arith.constant 0 : index
    %c0_146 = arith.constant 0 : index
    %353 = vector.load %arg33[%c0_145, %c0_146] : memref<1x32xf32, #tpu.memory_space<vmem>>, vector<1x32xf32>
    %c0_147 = arith.constant 0 : index
    %c0_148 = arith.constant 0 : index
    %354 = vector.load %arg34[%c0_147, %c0_148] : memref<1x32xf32, #tpu.memory_space<vmem>>, vector<1x32xf32>
    %cst_149 = arith.constant dense<0.000000e+00> : vector<8xf32>
    %355 = vector.multi_reduction <add>, %352, %cst_149 [1] : vector<8x32xf32> to vector<8xf32>
    %356 = vector.shape_cast %355 : vector<8xf32> to vector<8x1xf32>
    %cst_150 = arith.constant 3.200000e+01 : f32
    %357 = vector.broadcast %cst_150 : f32 to vector<8x1xf32>
    %358 = arith.divf %356, %357 : vector<8x1xf32>
    %359 = vector.broadcast %358 : vector<8x1xf32> to vector<8x32xf32>
    %360 = arith.subf %352, %359 : vector<8x32xf32>
    %361 = arith.mulf %360, %360 : vector<8x32xf32>
    %cst_151 = arith.constant dense<0.000000e+00> : vector<8xf32>
    %362 = vector.multi_reduction <add>, %361, %cst_151 [1] : vector<8x32xf32> to vector<8xf32>
    %363 = vector.shape_cast %362 : vector<8xf32> to vector<8x1xf32>
    %cst_152 = arith.constant 3.200000e+01 : f32
    %364 = vector.broadcast %cst_152 : f32 to vector<8x1xf32>
    %365 = arith.divf %363, %364 : vector<8x1xf32>
    %366 = vector.broadcast %358 : vector<8x1xf32> to vector<8x32xf32>
    %367 = arith.subf %352, %366 : vector<8x32xf32>
    %cst_153 = arith.constant 9.99999974E-6 : f32
    %368 = vector.broadcast %cst_153 : f32 to vector<8x1xf32>
    %369 = arith.addf %365, %368 : vector<8x1xf32>
    %370 = math.rsqrt %369 : vector<8x1xf32>
    %371 = vector.broadcast %370 : vector<8x1xf32> to vector<8x32xf32>
    %372 = arith.mulf %367, %371 : vector<8x32xf32>
    %373 = vector.broadcast %353 : vector<1x32xf32> to vector<8x32xf32>
    %374 = arith.mulf %372, %373 : vector<8x32xf32>
    %375 = vector.broadcast %354 : vector<1x32xf32> to vector<8x32xf32>
    %376 = arith.addf %374, %375 : vector<8x32xf32>
    %c0_154 = arith.constant 0 : index
    %c0_155 = arith.constant 0 : index
    %377 = vector.load %arg27[%c0_154, %c0_155] : memref<32x32xbf16, #tpu.memory_space<vmem>>, vector<32x32xbf16>
    %378 = arith.truncf %376 : vector<8x32xf32> to vector<8x32xbf16>
    %cst_156 = arith.constant dense<0.000000e+00> : vector<8x32xf32>
    %379 = tpu.matmul %378, %377, %cst_156 {dimension_numbers = #tpu.dot_dimension_numbers<[1], [0], [0], [1], [0, 0, 1, 1], [], []>} : vector<8x32xbf16>, vector<32x32xbf16>, vector<8x32xf32> -> vector<8x32xf32>
    %c0_157 = arith.constant 0 : index
    %c0_158 = arith.constant 0 : index
    %380 = vector.load %arg28[%c0_157, %c0_158] : memref<1x32xf32, #tpu.memory_space<vmem>>, vector<1x32xf32>
    %381 = vector.broadcast %380 : vector<1x32xf32> to vector<8x32xf32>
    %382 = arith.addf %379, %381 : vector<8x32xf32>
    %cst_159 = arith.constant 0.000000e+00 : f32
    %383 = vector.broadcast %cst_159 : f32 to vector<8x32xf32>
    %384 = arith.maximumf %382, %383 : vector<8x32xf32>
    %c0_160 = arith.constant 0 : index
    %c0_161 = arith.constant 0 : index
    %385 = vector.load %arg29[%c0_160, %c0_161] : memref<32x32xbf16, #tpu.memory_space<vmem>>, vector<32x32xbf16>
    %386 = arith.truncf %384 : vector<8x32xf32> to vector<8x32xbf16>
    %cst_162 = arith.constant dense<0.000000e+00> : vector<8x32xf32>
    %387 = tpu.matmul %386, %385, %cst_162 {dimension_numbers = #tpu.dot_dimension_numbers<[1], [0], [0], [1], [0, 0, 1, 1], [], []>} : vector<8x32xbf16>, vector<32x32xbf16>, vector<8x32xf32> -> vector<8x32xf32>
    %c0_163 = arith.constant 0 : index
    %c0_164 = arith.constant 0 : index
    %388 = vector.load %arg30[%c0_163, %c0_164] : memref<1x32xf32, #tpu.memory_space<vmem>>, vector<1x32xf32>
    %389 = vector.broadcast %388 : vector<1x32xf32> to vector<8x32xf32>
    %390 = arith.addf %387, %389 : vector<8x32xf32>
    %391 = vector.broadcast %6 : vector<8x1xf32> to vector<8x32xf32>
    %392 = arith.mulf %390, %391 : vector<8x32xf32>
    %393 = arith.addf %392, %352 : vector<8x32xf32>
    %394 = tpu.concatenate %393, %109, %248 in 1 : vector<8x32xf32>, vector<8x32xf32>, vector<8x32xf32> -> vector<8x96xf32>
    %395 = vector.shape_cast %394 : vector<8x96xf32> to vector<1x8x96xf32>
    %c0_165 = arith.constant 0 : index
    %c0_166 = arith.constant 0 : index
    %c0_167 = arith.constant 0 : index
    %396 = vector.load %arg35[%c0_165, %c0_166, %c0_167] : memref<1x8x96xf32, #tpu.memory_space<vmem>>, vector<1x8x96xf32>
    tpu.vector_store %arg35[%c0_165, %c0_166, %c0_167], %395 {strides = array<i32>} : memref<1x8x96xf32, #tpu.memory_space<vmem>>, vector<1x8x96xf32>,
    return
  }
  func.func @transform_0(%arg0: i32) -> (i32, i32, i32) {
    %c0_i32 = arith.constant 0 : i32
    %c0_i32_0 = arith.constant 0 : i32
    %c0_i32_1 = arith.constant 0 : i32
    return %arg0, %c0_i32, %c0_i32_0 : i32, i32, i32
  }
  func.func @transform_1(%arg0: i32) -> (i32, i32) {
    %c0_i32 = arith.constant 0 : i32
    %c0_i32_0 = arith.constant 0 : i32
    %c0_i32_1 = arith.constant 0 : i32
    return %c0_i32, %c0_i32_0 : i32, i32
  }
  func.func @transform_2(%arg0: i32) -> (i32, i32, i32) {
    %c0_i32 = arith.constant 0 : i32
    %c0_i32_0 = arith.constant 0 : i32
    %c0_i32_1 = arith.constant 0 : i32
    return %arg0, %c0_i32, %c0_i32_0 : i32, i32, i32
  }
  func.func @transform_3(%arg0: i32) -> (i32, i32) {
    %c0_i32 = arith.constant 0 : i32
    %c0_i32_0 = arith.constant 0 : i32
    %c0_i32_1 = arith.constant 0 : i32
    return %c0_i32, %c0_i32_0 : i32, i32
  }
  func.func @transform_4(%arg0: i32) -> (i32, i32, i32) {
    %c0_i32 = arith.constant 0 : i32
    %c0_i32_0 = arith.constant 0 : i32
    %c0_i32_1 = arith.constant 0 : i32
    return %arg0, %c0_i32, %c0_i32_0 : i32, i32, i32
  }
  func.func @transform_5(%arg0: i32) -> (i32, i32, i32) {
    %c0_i32 = arith.constant 0 : i32
    %c0_i32_0 = arith.constant 0 : i32
    %c0_i32_1 = arith.constant 0 : i32
    return %arg0, %c0_i32, %c0_i32_0 : i32, i32, i32
  }
  func.func @transform_6(%arg0: i32) -> (i32, i32, i32) {
    %c0_i32 = arith.constant 0 : i32
    %c0_i32_0 = arith.constant 0 : i32
    %c0_i32_1 = arith.constant 0 : i32
    return %arg0, %c0_i32, %c0_i32_0 : i32, i32, i32
  }
  func.func @transform_7(%arg0: i32) -> (i32, i32, i32) {
    %c0_i32 = arith.constant 0 : i32
    %c0_i32_0 = arith.constant 0 : i32
    %c0_i32_1 = arith.constant 0 : i32
    return %arg0, %c0_i32, %c0_i32_0 : i32, i32, i32
  }
  func.func @transform_8(%arg0: i32) -> (i32, i32) {
    %c0_i32 = arith.constant 0 : i32
    %c0_i32_0 = arith.constant 0 : i32
    %c0_i32_1 = arith.constant 0 : i32
    return %c0_i32, %c0_i32_0 : i32, i32
  }
  func.func @transform_9(%arg0: i32) -> (i32, i32) {
    %c0_i32 = arith.constant 0 : i32
    %c0_i32_0 = arith.constant 0 : i32
    %c0_i32_1 = arith.constant 0 : i32
    return %c0_i32, %c0_i32_0 : i32, i32
  }
  func.func @transform_10(%arg0: i32) -> (i32, i32) {
    %c0_i32 = arith.constant 0 : i32
    %c0_i32_0 = arith.constant 0 : i32
    %c0_i32_1 = arith.constant 0 : i32
    return %c0_i32, %c0_i32_0 : i32, i32
  }
  func.func @transform_11(%arg0: i32) -> (i32, i32) {
    %c0_i32 = arith.constant 0 : i32
    %c0_i32_0 = arith.constant 0 : i32
    %c0_i32_1 = arith.constant 0 : i32
    return %c0_i32, %c0_i32_0 : i32, i32
  }
  func.func @transform_12(%arg0: i32) -> (i32, i32) {
    %c0_i32 = arith.constant 0 : i32
    %c0_i32_0 = arith.constant 0 : i32
    %c0_i32_1 = arith.constant 0 : i32
    return %c0_i32, %c0_i32_0 : i32, i32
  }
  func.func @transform_13(%arg0: i32) -> (i32, i32) {
    %c0_i32 = arith.constant 0 : i32
    %c0_i32_0 = arith.constant 0 : i32
    %c0_i32_1 = arith.constant 0 : i32
    return %c0_i32, %c0_i32_0 : i32, i32
  }
  func.func @transform_14(%arg0: i32) -> (i32, i32) {
    %c0_i32 = arith.constant 0 : i32
    %c0_i32_0 = arith.constant 0 : i32
    %c0_i32_1 = arith.constant 0 : i32
    return %c0_i32, %c0_i32_0 : i32, i32
  }
  func.func @transform_15(%arg0: i32) -> (i32, i32) {
    %c0_i32 = arith.constant 0 : i32
    %c0_i32_0 = arith.constant 0 : i32
    %c0_i32_1 = arith.constant 0 : i32
    return %c0_i32, %c0_i32_0 : i32, i32
  }
  func.func @transform_16(%arg0: i32) -> (i32, i32) {
    %c0_i32 = arith.constant 0 : i32
    %c0_i32_0 = arith.constant 0 : i32
    %c0_i32_1 = arith.constant 0 : i32
    return %c0_i32, %c0_i32_0 : i32, i32
  }
  func.func @transform_17(%arg0: i32) -> (i32, i32) {
    %c0_i32 = arith.constant 0 : i32
    %c0_i32_0 = arith.constant 0 : i32
    %c0_i32_1 = arith.constant 0 : i32
    return %c0_i32, %c0_i32_0 : i32, i32
  }
  func.func @transform_18(%arg0: i32) -> (i32, i32) {
    %c0_i32 = arith.constant 0 : i32
    %c0_i32_0 = arith.constant 0 : i32
    %c0_i32_1 = arith.constant 0 : i32
    return %c0_i32, %c0_i32_0 : i32, i32
  }
  func.func @transform_19(%arg0: i32) -> (i32, i32) {
    %c0_i32 = arith.constant 0 : i32
    %c0_i32_0 = arith.constant 0 : i32
    %c0_i32_1 = arith.constant 0 : i32
    return %c0_i32, %c0_i32_0 : i32, i32
  }
  func.func @transform_20(%arg0: i32) -> (i32, i32) {
    %c0_i32 = arith.constant 0 : i32
    %c0_i32_0 = arith.constant 0 : i32
    %c0_i32_1 = arith.constant 0 : i32
    return %c0_i32, %c0_i32_0 : i32, i32
  }
  func.func @transform_21(%arg0: i32) -> (i32, i32) {
    %c0_i32 = arith.constant 0 : i32
    %c0_i32_0 = arith.constant 0 : i32
    %c0_i32_1 = arith.constant 0 : i32
    return %c0_i32, %c0_i32_0 : i32, i32
  }
  func.func @transform_22(%arg0: i32) -> (i32, i32) {
    %c0_i32 = arith.constant 0 : i32
    %c0_i32_0 = arith.constant 0 : i32
    %c0_i32_1 = arith.constant 0 : i32
    return %c0_i32, %c0_i32_0 : i32, i32
  }
  func.func @transform_23(%arg0: i32) -> (i32, i32) {
    %c0_i32 = arith.constant 0 : i32
    %c0_i32_0 = arith.constant 0 : i32
    %c0_i32_1 = arith.constant 0 : i32
    return %c0_i32, %c0_i32_0 : i32, i32
  }
  func.func @transform_24(%arg0: i32) -> (i32, i32) {
    %c0_i32 = arith.constant 0 : i32
    %c0_i32_0 = arith.constant 0 : i32
    %c0_i32_1 = arith.constant 0 : i32
    return %c0_i32, %c0_i32_0 : i32, i32
  }
  func.func @transform_25(%arg0: i32) -> (i32, i32) {
    %c0_i32 = arith.constant 0 : i32
    %c0_i32_0 = arith.constant 0 : i32
    %c0_i32_1 = arith.constant 0 : i32
    return %c0_i32, %c0_i32_0 : i32, i32
  }
  func.func @transform_26(%arg0: i32) -> (i32, i32) {
    %c0_i32 = arith.constant 0 : i32
    %c0_i32_0 = arith.constant 0 : i32
    %c0_i32_1 = arith.constant 0 : i32
    return %c0_i32, %c0_i32_0 : i32, i32
  }
  func.func @transform_27(%arg0: i32) -> (i32, i32) {
    %c0_i32 = arith.constant 0 : i32
    %c0_i32_0 = arith.constant 0 : i32
    %c0_i32_1 = arith.constant 0 : i32
    return %c0_i32, %c0_i32_0 : i32, i32
  }
  func.func @transform_28(%arg0: i32) -> (i32, i32) {
    %c0_i32 = arith.constant 0 : i32
    %c0_i32_0 = arith.constant 0 : i32
    %c0_i32_1 = arith.constant 0 : i32
    return %c0_i32, %c0_i32_0 : i32, i32
  }
  func.func @transform_29(%arg0: i32) -> (i32, i32) {
    %c0_i32 = arith.constant 0 : i32
    %c0_i32_0 = arith.constant 0 : i32
    %c0_i32_1 = arith.constant 0 : i32
    return %c0_i32, %c0_i32_0 : i32, i32
  }
  func.func @transform_30(%arg0: i32) -> (i32, i32) {
    %c0_i32 = arith.constant 0 : i32
    %c0_i32_0 = arith.constant 0 : i32
    %c0_i32_1 = arith.constant 0 : i32
    return %c0_i32, %c0_i32_0 : i32, i32
  }
  func.func @transform_31(%arg0: i32) -> (i32, i32) {
    %c0_i32 = arith.constant 0 : i32
    %c0_i32_0 = arith.constant 0 : i32
    %c0_i32_1 = arith.constant 0 : i32
    return %c0_i32, %c0_i32_0 : i32, i32
  }
  func.func @transform_32(%arg0: i32) -> (i32, i32) {
    %c0_i32 = arith.constant 0 : i32
    %c0_i32_0 = arith.constant 0 : i32
    %c0_i32_1 = arith.constant 0 : i32
    return %c0_i32, %c0_i32_0 : i32, i32
  }
  func.func @transform_33(%arg0: i32) -> (i32, i32) {
    %c0_i32 = arith.constant 0 : i32
    %c0_i32_0 = arith.constant 0 : i32
    %c0_i32_1 = arith.constant 0 : i32
    return %c0_i32, %c0_i32_0 : i32, i32
  }
  func.func @transform_34(%arg0: i32) -> (i32, i32, i32) {
    %c0_i32 = arith.constant 0 : i32
    %c0_i32_0 = arith.constant 0 : i32
    %c0_i32_1 = arith.constant 0 : i32
    return %arg0, %c0_i32, %c0_i32_0 : i32, i32, i32
  }
  func.func @transform_35(%arg0: i32) -> (i32, i32, i32) {
    %c0_i32 = arith.constant 0 : i32
    %c0_i32_0 = arith.constant 0 : i32
    %c0_i32_1 = arith.constant 0 : i32
    return %arg0, %c0_i32, %c0_i32_0 : i32, i32, i32
  }
}

</mosaic_0001>

<bundles_post_ra>
// kernel: tpu_custom_call.1
= control target key start
LH: loop header
LB: loop body
LE: loop exit
PB: predicated region body
PF: predicated region fallthrough
CT: control target
= control target key end

     0   :  { %s3617_s6 = smov 1   ;;  %s3618_s10 = smov 2   ;;  %s4353_s0 = inlined_call_operand.smem [shape: u32[36], index: -1, kind: input, shape index: {}] }
   0x1   :  { %s3676_s5 = sld [smem:[%s4353_s0]]   ;;  %s3619_s14 = smov 3  }
   0x2   :  { %s3681_s9 = sld [smem:[%s4353_s0 + %s3617_s6]]   ;;  %s3620_s18 = smov 4  }
   0x3   :  { %s3686_s13 = sld [smem:[%s4353_s0 + %s3618_s10]]   ;;  %s3621_s22 = smov 5  }
   0x4   :  { %s3691_s17 = sld [smem:[%s4353_s0 + %s3619_s14]]   ;;  %s3622_s26 = smov 6  }
   0x5   :  { %s3696_s21 = sld [smem:[%s4353_s0 + %s3620_s18]]   ;;  %s3623_s30 = smov 7  }
   0x6   :  { %s3701_s25 = sld [smem:[%s4353_s0 + %s3621_s22]]   ;;  %s3624_s4 = smov 8  }
   0x7   :  { %4378 = sst [smem:[#allocation30_spill]] %s3676_s5  ;;  %s3625_s10 = smov 9  }
   0x8   :  { %4379 = sst [smem:[#allocation31_spill]] %s3681_s9  ;;  %s3626_s15 = smov 10  }
   0x9   :  { %s3706_s29 = sld [smem:[%s4353_s0 + %s3622_s26]]   ;;  %s3627_s20 = smov 11  }
   0xa   :  { %4380 = sst [smem:[#allocation32_spill]] %s3691_s17  ;;  %s3628_s26 = smov 12  }
   0xb   :  { %4381 = sst [smem:[#allocation33_spill]] %s3696_s21  ;;  %s3629_s1 = smov 13  }
   0xc   :  { %s3711_s3 = sld [smem:[%s4353_s0 + %s3623_s30]]   ;;  %s3630_s7 = smov 14  }
   0xd   :  { %s3716_s8 = sld [smem:[%s4353_s0 + %s3624_s4]]   ;;  %s3632_s22 = smov 16  }
   0xe   :  { %s3721_s14 = sld [smem:[%s4353_s0 + %s3625_s10]]   ;;  %s3633_s28 = smov 17  }
   0xf   :  { %4382 = sst [smem:[#allocation34_spill]] %s3706_s29 }
  0x10   :  { %s3726_s19 = sld [smem:[%s4353_s0 + %s3626_s15]]   ;;  %s3631_s15 = smov 15  }
  0x11   :  { %s3731_s24 = sld [smem:[%s4353_s0 + %s3627_s20]]  }
  0x12   :  { %4383 = sst [smem:[#allocation35_spill]] %s3711_s3 }
  0x13   :  { %s3736_s30 = sld [smem:[%s4353_s0 + %s3628_s26]]  }
  0x14   :  { %s3741_s6 = sld [smem:[%s4353_s0 + %s3629_s1]]  }
  0x15   :  { %s3746_s12 = sld [smem:[%s4353_s0 + %s3630_s7]]   ;;  %s3634_s7 = smov 18  }
  0x16   :  { %s3751_s20 = sld [smem:[%s4353_s0 + %s3631_s15]]   ;;  %s3635_s15 = smov 19  }
  0x17   :  { %4384 = sst [smem:[#allocation36_spill]] %s3731_s24 }
  0x18   :  { %s3756_s27 = sld [smem:[%s4353_s0 + %s3632_s22]]   ;;  %s3636_s22 = smov 20  }
  0x19   :  { %s3761_s4 = sld [smem:[%s4353_s0 + %s3633_s28]]   ;;  %s3637_s28 = smov 21  }
  0x1a   :  { %4385 = sst [smem:[#allocation37_spill]] %s3741_s6 }
  0x1b   :  { %4386 = sst [smem:[#allocation38_spill]] %s3746_s12 }
  0x1c   :  { %4387 = sst [smem:[#allocation39_spill]] %s3751_s20 }
  0x1d   :  { %s3766_s29 = sld [smem:[%s4353_s0 + %s3634_s7]]   ;;  %s3638_s7 = smov 22  }
  0x1e   :  { %4388 = sst [smem:[#allocation40_spill]] %s3756_s27 }
  0x1f   :  { %4389 = sst [smem:[#allocation41_spill]] %s3761_s4 }
  0x20   :  { %s3771_s20 = sld [smem:[%s4353_s0 + %s3635_s15]]   ;;  %s3639_s15 = smov 23  }
  0x21   :  { %s3776_s6 = sld [smem:[%s4353_s0 + %s3636_s22]]   ;;  %s3640_s22 = smov 24  }
  0x22   :  { %s3781_s21 = sld [smem:[%s4353_s0 + %s3637_s28]]   ;;  %s3641_s28 = smov 25  }
  0x23   :  { %4390 = sst [smem:[#allocation42_spill]] %s3766_s29 }
  0x24   :  { %s3786_s29 = sld [smem:[%s4353_s0 + %s3638_s7]]   ;;  %s3642_s7 = smov 26  }
  0x26   :  { %4391 = sst [smem:[#allocation43_spill]] %s3771_s20 }
  0x27   :  { %4392 = sst [smem:[#allocation44_spill]] %s3776_s6 }
  0x28   :  { %4393 = sst [smem:[#allocation45_spill]] %s3781_s21 }
  0x29   :  { %s3791_s20 = sld [smem:[%s4353_s0 + %s3639_s15]]   ;;  %s3643_s15 = smov 27  }
  0x2a   :  { %4394 = sst [smem:[#allocation46_spill]] %s3786_s29 }
  0x2b   :  { %s3796_s6 = sld [smem:[%s4353_s0 + %s3640_s22]]   ;;  %s3644_s22 = smov 28  }
  0x2c   :  { %s3801_s21 = sld [smem:[%s4353_s0 + %s3641_s28]]   ;;  %s3645_s28 = smov 29  }
  0x2d   :  { %s3806_s29 = sld [smem:[%s4353_s0 + %s3642_s7]]   ;;  %s3646_s7 = smov 30  }
  0x2f   :  { %4395 = sst [smem:[#allocation47_spill]] %s3791_s20 }
  0x30   :  { %s3811_s20 = sld [smem:[%s4353_s0 + %s3643_s15]]   ;;  %s3647_s15 = smov 31  }
  0x31   :  { %4396 = sst [smem:[#allocation48_spill]] %s3796_s6 }
  0x32   :  { %4397 = sst [smem:[#allocation49_spill]] %s3801_s21 }
  0x33   :  { %4398 = sst [smem:[#allocation50_spill]] %s3806_s29 }
  0x34   :  { %s3816_s6 = sld [smem:[%s4353_s0 + %s3644_s22]]   ;;  %s3648_s22 = smov 32  }
  0x35   :  { %s3821_s21 = sld [smem:[%s4353_s0 + %s3645_s28]]   ;;  %s3649_s28 = smov 33  }
  0x36   :  { %4399 = sst [smem:[#allocation51_spill]] %s3811_s20 }
  0x37   :  { %s3826_s29 = sld [smem:[%s4353_s0 + %s3646_s7]]   ;;  %s3650_s7 = smov 34  }
  0x38   :  { %s3831_s20 = sld [smem:[%s4353_s0 + %s3647_s15]]   ;;  %s3651_s15 = smov 35  }
  0x39   :  { %s3836_s12 = sld [smem:[%s4353_s0 + %s3648_s22]]  }
  0x3b   :  { %4400 = sst [smem:[#allocation52_spill]] %s3821_s21 }
  0x3c   :  { %s3841_s21 = sld [smem:[%s4353_s0 + %s3649_s28]]  }
  0x3d   :  { %4401 = sst [smem:[#allocation53_spill]] %s3826_s29 }
  0x3e   :  { %4402 = sst [smem:[#allocation54_spill]] %s3831_s20 }
  0x3f   :  { %4403 = sst [smem:[#allocation55_spill]] %s3836_s12 }
  0x40   :  { %s3846_s29 = sld [smem:[%s4353_s0 + %s3650_s7]]  }
  0x41   :  { %s3851_s20 = sld [smem:[%s4353_s0 + %s3651_s15]]  }
  0x42   :  { %4404 = sst [smem:[#allocation56_spill]] %s3841_s21 }
  0x46   :  { %4405 = sst [smem:[#allocation57_spill]] %s3846_s29 }
  0x47   :  { %4406 = sst [smem:[#allocation58_spill]] %s3851_s20 }
  0x48   :  { %77 = vsyncpa [#allocation3], 0 }
  0x49   :  { %78 = vsyncpa [#allocation6], 0 }
  0x4a   :  { %79 = vsyncpa [#allocation11], 0 }
  0x4b   :  { %80 = vsyncpa [#allocation14], 0 }
  0x4c   :  { %81 = vsyncpa [#allocation17], 0 }
  0x4d   :  { %82 = vsyncpa [#allocation4], 0 }
  0x4e   :  { %84 = vsyncpa [#allocation4 + $0x1], 0 }
  0x4f   :  { %85 = vsyncpa [#allocation20], 0 }
  0x50   :  { %87 = vsyncpa [#allocation20 + $0x1], 0  ;;  %s3853_s22 = smov 0   ;;  %s3855_s23 = smov 0  }
  0x51   :  { %s3857_s26 = smov 0   ;;  %s3859_s28 = smov 0  }
  0x52 LB: > { %s4407_s3 = sld [smem:[#allocation35_spill]]  ;;  %s3877_s1 = sadd.s32 4294967295, %s3615_s28   ;;  %s3607_s23 = sphi %s3855_s23, %s4476_s23   ;;  %s3603_s22 = sphi %s3853_s22, %s4475_s22   ;;  %s3615_s28 = sphi %s3859_s28, %s4472_s28   ;;  %s3611_s26 = sphi %s3857_s26, %s4474_s26  }
  0x53   : > { %s4408_s4 = sld [smem:[#allocation41_spill]]  ;;  %p2739_p0 = scmp.ge.s32.totalorder %s3615_s28, 1 }
  0x54   : > { %s4409_s27 = sld [smem:[#allocation40_spill]]  ;;  %p4373_p1 = scmp.eq.s32.totalorder %s3877_s1, 0 }
  0x55   : > { %s4410_s24 = sld [smem:[#allocation36_spill]]  ;;  %p894_p2 = scmp.lt.s32.totalorder %s3615_s28, 3 }
  0x56   : > { %s4411_s17 = sld [smem:[#allocation32_spill]]  ;;  %s3652_s7 = smov [#allocation2]  }
  0x57   : > { %s4412_s9 = sld [smem:[#allocation31_spill]]  ;;  %p3882_p3 = pnand %p2739_p0, %p894_p2 }
  0x58   : > { %4413 = sst [smem:[#allocation59_spill]] %s3603_s22  ;;  %s908_s10 = sshll.u32 %s3652_s7, 4  ;;  %s909_s10 = int_to_ptr.vmem [resolvable:$true] %s908_s10 }
  0x59   : > { %4414 = sst [smem:[#allocation60_spill]] %s3611_s26  ;;  %p3000_p5 = pneg %p3882_p3 }
  0x5a   : > { %s3653_s16 = smov [#allocation5]  }
  0x5b   : > { %p3894_p6 = pnand %p3000_p5, %p4373_p1  ;;  %s3898_s18 = sshll.u32 %s3653_s16, 4 }
  0x5c   : > { %s918_s11 = sshll.u32 %s4411_s17, 4  ;;  %4417 = sst [smem:[#allocation61_spill]] %s3898_s18  ;;  %s3890_s11 = int_to_ptr.hbm [resolvable:$true] %s918_s11 }
  0x5d   : > { %s906_s0 = sshll.u32 %s4412_s9, 4  ;;  %s948_s7 = sshll.u32 %s4410_s24, 4  ;;  %s3874_s0 = int_to_ptr.hbm [resolvable:$true] %s906_s0  ;;  %s3902_s7 = int_to_ptr.hbm [resolvable:$true] %s948_s7 }
  0x5e   : > { %s3193_s29 = sshra.s32 %s3874_s0, 4  ;;  %p3907_p8 = pneg %p3894_p6  ;;  %s3194_s29 = int_to_ptr.hbm [resolvable:$true] %s3193_s29 }
  0x5f   : > { %s3195_s20 = scalar_lea.hbm %s3194_s29, 8  ;;  %s3200_s16 = scalar_lea.hbm %s4412_s9, 8 }
  0x60   : > { %p3196_p7 = scmp.ne.s32.totalorder %s3194_s29, %s3195_s20  ;;  %p3201_p11 = scmp.lt.s32.totalorder %s3194_s29, %s4412_s9 }
  0x61   : > { %p3202_p12 = scmp.lt.s32.totalorder %s3200_s16, %s3195_s20 }
  0x62   : > { %p3198_p9 = pnand %p3907_p8, %p3196_p7 }
  0x63   : > { %p3203_p13 = por %p3202_p12, %p3201_p11 }
  0x64   : > { %p3199_p10 = pneg %p3198_p9 }
  0x66   : > { %p3204_p0 = pnand %p3203_p13, %p3199_p10 }
  0x68   : > { %3207 = shalt.err (!%p3204_p0)
}
  0x69   : > { %3003 = dma.hbm_to_vmem [thread:$0]  (!%p3894_p6), %s3874_s0, 128, %s909_s10, [#allocation3]  }
  0x6a   : > { %s3223_s18 = sshra.s32 %s3890_s11, 4  ;;  %s3230_s29 = scalar_lea.hbm %s4411_s17, 4  ;;  %s3224_s18 = int_to_ptr.hbm [resolvable:$true] %s3223_s18 }
  0x6b   : > { %s3225_s12 = scalar_lea.hbm %s3224_s18, 4  ;;  %p3231_p9 = scmp.lt.s32.totalorder %s3224_s18, %s4411_s17 }
  0x6c   : > { %p3226_p2 = scmp.ne.s32.totalorder %s3224_s18, %s3225_s12  ;;  %p3232_p11 = scmp.lt.s32.totalorder %s3230_s29, %s3225_s12 }
  0x6e   : > { %p3228_p5 = pnand %p3226_p2, %p3907_p8  ;;  %p3233_p10 = por %p3232_p11, %p3231_p9 }
  0x70   : > { %p3229_p7 = pneg %p3228_p5 }
  0x72   : > { %p3234_p12 = pnand %p3233_p10, %p3229_p7 }
  0x74   : > { %3237 = shalt.err (!%p3234_p12)
}
  0x75   : > { %s4419_s20 = sld [smem:[#allocation61_spill]]  ;;  %s981_s0 = sshll.u32 %s4409_s27, 4  ;;  %s3929_s0 = int_to_ptr.hbm [resolvable:$true] %s981_s0 }
  0x76   : > { %s3654_s10 = smov [#allocation10]   ;;  %s3253_s12 = sshra.s32 %s3902_s7, 4  ;;  %s3254_s12 = int_to_ptr.hbm [resolvable:$true] %s3253_s12 }
  0x77   : > { %s950_s9 = sshll.u32 %s3654_s10, 4  ;;  %s3255_s18 = scalar_lea.hbm %s3254_s12, 1  ;;  %s951_s9 = int_to_ptr.vmem [resolvable:$true] %s950_s9 }
  0x78   : > { %p3256_p13 = scmp.ne.s32.totalorder %s3254_s12, %s3255_s18  ;;  %s3260_s29 = scalar_lea.hbm %s4410_s24, 1 }
  0x79   : > { %p3261_p5 = scmp.lt.s32.totalorder %s3254_s12, %s4410_s24  ;;  %p3262_p7 = scmp.lt.s32.totalorder %s3260_s29, %s3255_s18 }
  0x7a   : > { %p3258_p0 = pnand %p3256_p13, %p3907_p8 }
  0x7b   : > { %s4420_s16 = int_to_ptr.vmem [resolvable:$true] %s4419_s20  ;;  %p3263_p9 = por %p3262_p7, %p3261_p5 }
  0x7c   : > { %3006 = dma.hbm_to_vmem [thread:$0]  (!%p3894_p6), %s3890_s11, 64, %s4420_s16, [#allocation6]  }
  0x7d   : > { %p3259_p2 = pneg %p3258_p0 }
  0x7f   : > { %p3264_p11 = pnand %p3263_p9, %p3259_p2 }
  0x81   : > { %3267 = shalt.err (!%p3264_p11)
}
  0x82   : > { %3012 = dma.hbm_to_vmem [thread:$0]  (!%p3894_p6), %s3902_s7, 16, %s951_s9, [#allocation11]  }
  0x83   : > { %s3655_s11 = smov [#allocation13]   ;;  %s3283_s16 = sshra.s32 %s3929_s0, 4  ;;  %s3284_s16 = int_to_ptr.hbm [resolvable:$true] %s3283_s16 }
  0x84   : > { %s983_s20 = sshll.u32 %s3655_s11, 4  ;;  %s3285_s10 = scalar_lea.hbm %s3284_s16, 1  ;;  %s984_s20 = int_to_ptr.vmem [resolvable:$true] %s983_s20 }
  0x85   : > { %p3286_p10 = scmp.ne.s32.totalorder %s3284_s16, %s3285_s10  ;;  %s3290_s12 = scalar_lea.hbm %s4409_s27, 1 }
  0x86   : > { %p3291_p0 = scmp.lt.s32.totalorder %s3284_s16, %s4409_s27  ;;  %p3292_p2 = scmp.lt.s32.totalorder %s3290_s12, %s3285_s10 }
  0x87   : > { %p3288_p12 = pnand %p3286_p10, %p3907_p8 }
  0x88   : > { %p3293_p5 = por %p3292_p2, %p3291_p0 }
  0x89   : > { %p3289_p13 = pneg %p3288_p12 }
  0x8b   : > { %p3294_p7 = pnand %p3293_p5, %p3289_p13 }
  0x8d   : > { %3297 = shalt.err (!%p3294_p7)
}
  0x8e   : > { %3018 = dma.hbm_to_vmem [thread:$0]  (!%p3894_p6), %s3929_s0, 16, %s984_s20, [#allocation14]  }
  0x8f   : > { %s2738_s9 = sadd.s32 4294967294, %s3615_s28   ;;  %s3949_s7 = sadd.s32 1, %s3615_s28  }
  0x90   : > { %4421 = sst [smem:[#allocation62_spill]] %s3949_s7  ;;  %s217_s18 = ssub.s32 %s3615_s28, %s3949_s7 }
  0x91   : > { %s220_s29 = sadd.s32 1, %s3611_s26  ;;  %p218_p9 = scmp.eq.s32.totalorder %s217_s18, 0 }
  0x92   : > { %p227_p11 = scmp.ne.s32.totalorder %s3611_s26, %s3607_s23  ;;  %p228_p10 = scmp.eq.s32.totalorder %s3615_s28, 0 }
  0x93   : > { %p233_p12 = scmp.ne.s32.totalorder %s3607_s23, %s3603_s22  ;;  %p855_p2 = scmp.eq.s32.totalorder %s3877_s1, 1 }
  0x94   : > { %s3960_s11 = scalar_select %p218_p9, %s3611_s26, %s220_s29  }
  0x95   : > { %p3962_p13 = por %p228_p10, %p227_p11  ;;  %p3968_p0 = por %p4373_p1, %p233_p12 }
  0x96   : > { %4422 = sst [smem:[#allocation63_spill]] %s3960_s11  ;;  %p861_p5 = scmp.eq.s32.totalorder %s2738_s9, 1 }
  0x97   : > { %p3047_p7 = scmp.lt.s32.totalorder %s3615_s28, 2  ;;  %s1087_s20 = sand.u32 1, %s3615_s28  }
  0x98   : > { %p3975_p4 = por %p855_p2, %p227_p11  ;;  %p3979_p9 = por %p861_p5, %p233_p12 }
  0x99   : > { %s1089_s18 = sand.u32 1, %s3611_s26   ;;  %s4371_s17 = sshll.u32 %s3615_s28, 2 }
  0x9a   : > { %s4426_s12 = scalar_select %p3979_p9, 1, 0 }
  0x9b   : > { %s3984_s29 = sshll.u32 %s1089_s18, 2  ;;  %s1095_s24 = scalar_lea.hbm %s3701_s25, %s4371_s17 }
  0x9c   : > { %4427 = sst [smem:[#allocation61_spill]] %s4426_s12  ;;  %s1097_s27 = sshll.u32 %s1095_s24, 4  ;;  %s1098_s27 = int_to_ptr.hbm [resolvable:$true] %s1097_s27 }
  0x9d   : > { %s1091_s11 = scalar_lea.vmem [#allocation7], %s3984_s29  ;;  %p3995_p11 = pnand %p3047_p7, %p3962_p13 }
  0x9e   : > { %s1099_s9 = sshll.u32 %s1091_s11, 4  ;;  %s936_s18 = sshll.u32 %s3726_s19, 4  ;;  %s1100_s9 = int_to_ptr.vmem [resolvable:$true] %s1099_s9  ;;  %s4000_s18 = int_to_ptr.hbm [resolvable:$true] %s936_s18 }
  0x9f   : > { %s3656_s26 = smov [#allocation9]   ;;  %s4004_s24 = scalar_lea.sflag [#allocation3], %s1087_s20 }
  0xa0   : > { %s4002_s17 = sshll.u32 %s3656_s26, 4  ;;  %s3313_s11 = sshra.s32 %s1098_s27, 4  ;;  %s3314_s11 = int_to_ptr.hbm [resolvable:$true] %s3313_s11  ;;  %s939_s17 = int_to_ptr.vmem [resolvable:$true] %s4002_s17 }
  0xa1   : > { %s3315_s12 = scalar_lea.hbm %s3314_s11, 4  ;;  %p3317_p12 = pneg %p3995_p11 }
  0xa2   : > { %p3316_p10 = scmp.ne.s32.totalorder %s3314_s11, %s3315_s12  ;;  %s3320_s16 = scalar_lea.hbm %s3701_s25, 8 }
  0xa3   : > { %p3321_p5 = scmp.lt.s32.totalorder %s3314_s11, %s3701_s25  ;;  %p3322_p7 = scmp.lt.s32.totalorder %s3320_s16, %s3315_s12 }
  0xa4   : > { %p3318_p13 = pnand %p3317_p12, %p3316_p10 }
  0xa5   : > { %p3323_p1 = por %p3322_p7, %p3321_p5 }
  0xa6   : > { %p3319_p2 = pneg %p3318_p13 }
  0xa8   : > { %p3324_p9 = pnand %p3323_p1, %p3319_p2 }
  0xaa   : > { %3327 = shalt.err (!%p3324_p9)
}
  0xab   : > { %3028 = dma.hbm_to_vmem [thread:$0]  (!%p3995_p11), %s1098_s27, 64, %s1100_s9, %s4004_s24  }
  0xac   : > { %s960_s26 = sshll.u32 %s3736_s30, 4  ;;  %s3343_s20 = sshra.s32 %s4000_s18, 4  ;;  %s3344_s20 = int_to_ptr.hbm [resolvable:$true] %s3343_s20  ;;  %s961_s26 = int_to_ptr.hbm [resolvable:$true] %s960_s26 }
  0xad   : > { %s3345_s22 = scalar_lea.hbm %s3344_s20, 1  ;;  %s3350_s12 = scalar_lea.hbm %s3726_s19, 1 }
  0xae   : > { %p3346_p10 = scmp.ne.s32.totalorder %s3344_s20, %s3345_s22  ;;  %p3351_p9 = scmp.lt.s32.totalorder %s3344_s20, %s3726_s19 }
  0xaf   : > { %p3352_p2 = scmp.lt.s32.totalorder %s3350_s12, %s3345_s22 }
  0xb0   : > { %p3348_p13 = pnand %p3346_p10, %p3907_p8 }
  0xb1   : > { %p3353_p5 = por %p3352_p2, %p3351_p9 }
  0xb2   : > { %p3349_p1 = pneg %p3348_p13 }
  0xb4   : > { %p3354_p7 = pnand %p3353_p5, %p3349_p1 }
  0xb6   : > { %3357 = shalt.err (!%p3354_p7)
}
  0xb7   : > { %3009 = dma.hbm_to_vmem [thread:$0]  (!%p3894_p6), %s4000_s18, 16, %s939_s17, [#allocation6]  }
  0xb8   : > { %s3657_s27 = smov [#allocation12]   ;;  %s993_s11 = sshll.u32 %s4408_s4, 4  ;;  %s4027_s11 = int_to_ptr.hbm [resolvable:$true] %s993_s11 }
  0xb9   : > { %s962_s9 = sshll.u32 %s3657_s27, 4  ;;  %s3373_s16 = sshra.s32 %s961_s26, 4  ;;  %s963_s9 = int_to_ptr.vmem [resolvable:$true] %s962_s9  ;;  %s3374_s16 = int_to_ptr.hbm [resolvable:$true] %s3373_s16 }
  0xba   : > { %s3375_s22 = scalar_lea.hbm %s3374_s16, 1  ;;  %s3380_s20 = scalar_lea.hbm %s3736_s30, 1 }
  0xbb   : > { %p3376_p10 = scmp.ne.s32.totalorder %s3374_s16, %s3375_s22  ;;  %p3381_p9 = scmp.lt.s32.totalorder %s3374_s16, %s3736_s30 }
  0xbc   : > { %p3382_p2 = scmp.lt.s32.totalorder %s3380_s20, %s3375_s22 }
  0xbd   : > { %p3378_p13 = pnand %p3376_p10, %p3907_p8 }
  0xbe   : > { %p3383_p5 = por %p3382_p2, %p3381_p9 }
  0xbf   : > { %p3379_p1 = pneg %p3378_p13 }
  0xc1   : > { %p3384_p7 = pnand %p3383_p5, %p3379_p1 }
  0xc3   : > { %3387 = shalt.err (!%p3384_p7)
}
  0xc4   : > { %3015 = dma.hbm_to_vmem [thread:$0]  (!%p3894_p6), %s961_s26, 16, %s963_s9, [#allocation11]  }
  0xc5   : > { %s1034_s17 = sshll.u32 %s3816_s6, 4  ;;  %s3658_s18 = smov [#allocation15]   ;;  %s4036_s17 = int_to_ptr.hbm [resolvable:$true] %s1034_s17 }
  0xc6   : > { %s995_s12 = sshll.u32 %s3658_s18, 4  ;;  %s3403_s27 = sshra.s32 %s4027_s11, 4  ;;  %s996_s12 = int_to_ptr.vmem [resolvable:$true] %s995_s12  ;;  %s3404_s27 = int_to_ptr.hbm [resolvable:$true] %s3403_s27 }
  0xc7   : > { %s3405_s16 = scalar_lea.hbm %s3404_s27, 1  ;;  %s3410_s22 = scalar_lea.hbm %s4408_s4, 1 }
  0xc8   : > { %p3406_p10 = scmp.ne.s32.totalorder %s3404_s27, %s3405_s16  ;;  %p3411_p9 = scmp.lt.s32.totalorder %s3404_s27, %s4408_s4 }
  0xc9   : > { %p3412_p2 = scmp.lt.s32.totalorder %s3410_s22, %s3405_s16 }
  0xca   : > { %p3408_p13 = pnand %p3406_p10, %p3907_p8 }
  0xcb   : > { %p3413_p5 = por %p3412_p2, %p3411_p9 }
  0xcc   : > { %p3409_p1 = pneg %p3408_p13 }
  0xce   : > { %p3414_p7 = pnand %p3413_p5, %p3409_p1 }
  0xd0   : > { %3417 = shalt.err (!%p3414_p7)
}
  0xd1   : > { %3021 = dma.hbm_to_vmem [thread:$0]  (!%p3894_p6), %s4027_s11, 16, %s996_s12, [#allocation14]  }
  0xd2   : > { %s3659_s26 = smov [#allocation16]   ;;  %s3433_s20 = sshra.s32 %s4036_s17, 4  ;;  %s3434_s20 = int_to_ptr.hbm [resolvable:$true] %s3433_s20 }
  0xd3   : > { %s1036_s9 = sshll.u32 %s3659_s26, 4  ;;  %s3435_s18 = scalar_lea.hbm %s3434_s20, 16  ;;  %s1037_s9 = int_to_ptr.vmem [resolvable:$true] %s1036_s9 }
  0xd4   : > { %p3436_p10 = scmp.ne.s32.totalorder %s3434_s20, %s3435_s18  ;;  %s3440_s27 = scalar_lea.hbm %s3816_s6, 16 }
  0xd5   : > { %p3441_p1 = scmp.lt.s32.totalorder %s3434_s20, %s3816_s6  ;;  %p3442_p2 = scmp.lt.s32.totalorder %s3440_s27, %s3435_s18 }
  0xd6   : > { %p3438_p13 = pnand %p3436_p10, %p3907_p8 }
  0xd7   : > { %p3443_p5 = por %p3442_p2, %p3441_p1 }
  0xd8   : > { %p3439_p9 = pneg %p3438_p13 }
  0xda   : > { %p3444_p7 = pnand %p3443_p5, %p3439_p9 }
  0xdc   : > { %3447 = shalt.err (!%p3444_p7)
}
  0xdd   : > { %s3660_s16 = smov 64   ;;  %s3661_s11 = smov 4  }
  0xde   : > { %3024 = dma.hbm_to_vmem [thread:$0]  (!%p3894_p6), %s4036_s17, 256, %s1037_s9, [#allocation17], %s3660_s16, %s3660_s16, %s3661_s11  }
  0xdf   : > { %s4429_s21 = sshll.u32 %s3615_s28, 2  ;;  %s1117_s26 = scalar_lea.vmem [#allocation8], %s3984_s29 }
  0xe0   : > { %s1121_s12 = scalar_lea.hbm %s4407_s3, %s4429_s21  ;;  %s1125_s20 = sshll.u32 %s1117_s26, 4  ;;  %s1126_s20 = int_to_ptr.vmem [resolvable:$true] %s1125_s20 }
  0xe1   : > { %s1123_s22 = sshll.u32 %s1121_s12, 4  ;;  %s3470_s4 = scalar_lea.hbm %s4407_s3, 8  ;;  %s1124_s22 = int_to_ptr.hbm [resolvable:$true] %s1123_s22 }
  0xe2   : > { %s3463_s18 = sshra.s32 %s1124_s22, 4  ;;  %s3464_s18 = int_to_ptr.hbm [resolvable:$true] %s3463_s18 }
  0xe3   : > { %s3465_s27 = scalar_lea.hbm %s3464_s18, 4  ;;  %p3471_p9 = scmp.lt.s32.totalorder %s3464_s18, %s4407_s3 }
  0xe4   : > { %p3466_p8 = scmp.ne.s32.totalorder %s3464_s18, %s3465_s27  ;;  %p3472_p1 = scmp.lt.s32.totalorder %s3470_s4, %s3465_s27 }
  0xe6   : > { %p3468_p10 = pnand %p3466_p8, %p3317_p12  ;;  %p3473_p2 = por %p3472_p1, %p3471_p9 }
  0xe8   : > { %p3469_p13 = pneg %p3468_p10 }
  0xea   : > { %p3474_p6 = pnand %p3473_p2, %p3469_p13 }
  0xec   : > { %3477 = shalt.err (!%p3474_p6)
}
  0xed   : > { %3031 = dma.hbm_to_vmem [thread:$0]  (!%p3995_p11), %s1124_s22, 64, %s1126_s20, %s4004_s24  }
  0xee   : > { %1134 = sbr.rel (%p3882_p3) target bundleno = 4672 (0x1240), region = 156  ;;  %p4430_p5 = scmp.eq.s32.totalorder (!%p3882_p3), %s3877_s1, 0 }
  0xf3   : > { %3566 = dma.done.wait (%p4430_p5), [#allocation3], 128   ;;  %p4431_p7 = pmov %p4430_p5 }
  0xf4   : > { %p4432_p12 = pmov %p4430_p5 }
  0xf5   : > { %3568 = vsyncadd (%p4431_p7), [#allocation3], 4294967168 }
  0xf6   : > { %3570 = dma.done.wait (%p4432_p12), [#allocation6], 64   ;;  %p4433_p8 = pmov %p4430_p5 }
  0xf7   : > { %s1146_s4 = sand.u32 1, %s3877_s1   ;;  %s4078_s15 = sand.u32 1, %s3607_s23  }
  0xf8   : > { %3572 = vsyncadd (%p4433_p8), [#allocation6], 4294967232  ;;  %s2756_s2 = sshll.u32 %s4078_s15, 2  ;;  %s1147_s7 = scalar_lea.sflag [#allocation3], %s1146_s4 }
  0xf9   : > { %s4081_s29 = scalar_lea.vmem [#allocation7], %s2756_s2 }
  0xfa   : > { %3574 = dma.done.wait (%p3968_p0), %s1147_s7, 128  }
  0xfb   : > { %3576 = vsyncadd (%p3968_p0), %s1147_s7, 4294967168  ;;  %s4087_s24 = scalar_lea.vmem [#allocation8], %s2756_s2  ;;  %p4434_p3 = pmov %p4430_p5 }
  0xfd   : > { %3578 = dma.done.wait (%p4434_p3), [#allocation6], 16   ;;  %p4435_p11 = pmov %p4434_p3 }
  0xfe   : > { %p4436_p10 = pmov %p4434_p3 }
  0xff   : > { %3580 = vsyncadd (%p4435_p11), [#allocation6], 4294967280 }
 0x100   : > { %3582 = dma.done.wait (%p4436_p10), [#allocation11], 32   ;;  %p4437_p13 = pmov %p4434_p3 }
 0x101   : > { %p4438_p9 = pmov %p4434_p3 }
 0x102   : > { %3584 = vsyncadd (%p4437_p13), [#allocation11], 4294967264 }
 0x103   : > { %3586 = dma.done.wait (%p4438_p9), [#allocation14], 32   ;;  %p4439_p1 = pmov %p4434_p3 }
 0x105   : > { %3588 = vsyncadd (%p4439_p1), [#allocation14], 4294967264  ;;  %p4440_p0 = pmov %p4439_p1 }
 0x107   : > { %3590 = dma.done.wait (%p4440_p0), [#allocation17], 256   ;;  %p4441_p2 = pmov %p4440_p0 }
 0x108   : > { %s4442_s5 = sld [smem:[#allocation30_spill]]  ;;  %p1305_p6 = scmp.lt.s32.totalorder %s3877_s1, 1  ;;  %v2781_v0 = vld [vmem:[%s3716_s8 + $0x10] sm:$0xf]  ;;  %v2933_v1 = vld [vmem:[%s3716_s8 + $0x14] sm:$0xf0] }
 0x109   : > { %3592 = vsyncadd (%p4441_p2), [#allocation17], 4294967040  ;;  %v2932_v2 = vld [vmem:[%s3716_s8 + $0x14] sm:$0xf]  ;;  %v2782_v3 = vor.u32 %v2933_v1, %v2781_v0  ;;  %v2783_v4 = vld [vmem:[%s3716_s8 + $0x18] sm:$0xf0] }
 0x10a   : > { %s4107_s0 = scalar_select %p1305_p6, %s3877_s1, 1  ;;  %v2773_v5 = vld [vmem:[%s3716_s8] sm:$0xf]  ;;  %v2931_v6 = vld [vmem:[%s3716_s8 + $0x4] sm:$0xf0]  ;;  %v2786_v7 = vor.u32 %v2932_v2, %v2783_v4  ;;  %vm1358_vm0 = vcmask 261120  }
 0x10b   : > { %v2930_v8 = vld [vmem:[%s3716_s8 + $0x4] sm:$0xf]  ;;  %v2775_v9 = vld [vmem:[%s3716_s8 + $0x8] sm:$0xf0]  ;;  %1368 = vmatpush.bf16.msra.mxu0 %v2782_v3  ;;  %v2774_v11 = vor.u32 %v2931_v6, %v2773_v5  ;;  %vm1448_vm1 = vcmask 1043456   ;;  %s3662_s16 = smov 96  }
 0x10c   : > { %s4110_s17 = sshll.u32 %s4107_s0, 3  ;;  %v1324_v12 = vld [vmem:[#allocation2] sm:$0xff]  ;;  %1381 = vmatpush.bf16.msra.mxu1 %v2786_v7  ;;  %v2778_v13 = vor.u32 %v2930_v8, %v2775_v9  ;;  %s3663_s11 = smov 64   ;;  %v1327_v28 = vld [vmem:[#allocation5] sm:$0xf]  ;;  %vm1428_vm2 = vcmask 64512  }
 0x10d   : > { %v1328_v31 = vunpack.c.l.bf16 %v1327_v28  ;;  %s3664_s21 = smov 32   ;;  %v2935_v44 = vld [vmem:[%s3721_s14 + $0x8] sm:$0xff]  ;;  %v2934_v51 = vld [vmem:[%s3721_s14] sm:$0xff]  ;;  %v2937_v7 = vld [vmem:[%s3721_s14 + $0x18] sm:$0xff]  ;;  %s1312_s12 = scalar_lea.vmem %s3686_s13, %s4110_s17  ;;  %vm1812_vm10 = vcmask 130048  }
 0x10e   : > { %s1308_s9 = scalar_lea.vmem %s4442_s5, %s4110_s17  ;;  %s4443_s22 = sld [smem:[#allocation38_spill]] }
 0x10f   : > { %v1323_v10 = vld [vmem:[%s1308_s9] sm:$0xff]  ;;  %1369 = vmatpush.bf16.msra.mxu0 %v2774_v11  ;;  %s4445_s26 = sld [smem:[#allocation33_spill]]  ;;  %s2929_s2 = sshll.u32 %s4107_s0, 4 }
 0x110   : > { %v4122_v14 = vadd.f32 %v1324_v12, %v1323_v10  ;;  %1382 = vmatpush.bf16.msra.mxu1 %v2778_v13  ;;  %v2936_v13 = vld [vmem:[%s3721_s14 + $0x10] sm:$0xff]  ;;  %s4446_s18 = sld [smem:[#allocation43_spill]] }
 0x111   : > { %s4447_s27 = sld [smem:[#allocation37_spill]] }
 0x112   : > { %v1337_v15 = vpack.c.bf16 %v4122_v14, %v4122_v14  ;;  %s4448_s4 = sld [smem:[#allocation34_spill]] }
 0x113   : > { %s4449_s0 = sld [smem:[#allocation53_spill]] }
 0x114   : > { %2787 = vmatmul.msk.bf16.vlgmr.msra.gmra.mxu0 %vm1358_vm0, %v1337_v15  ;;  %2788 = vmatmul.msk.bf16.vlgmr.msra.gmra.mxu1 %vm1358_vm0, %v1337_v15  ;;  %s4444_s20 = smov %s4443_s22 }
 0x115   : > { %1550 = vmatpush.bf16.msrb.mxu1 %v2937_v7  ;;  %s1317_s7 = scalar_lea.vmem %s4445_s26, %s2929_s2  ;;  %s4454_s26 = sld [smem:[#allocation46_spill]] }
 0x116   : > { %s4456_s2 = sld [smem:[#allocation42_spill]] }
 0x118   : > { %s1321_s9 = scalar_lea.vmem %s4448_s4, %s4110_s17  ;;  %s4376_s17 = sshll.u32 %s4078_s15, 3 }
 0x119   : > { %1551 = vmatpush.bf16.msrb.mxu1 %v2936_v13  ;;  %v1738_v7 = vld [vmem:[%s1321_s9] sm:$0xff]  ;;  %s4455_s4 = sld [smem:[#allocation47_spill]] }
 0x11a   : > { %s4458_s9 = sld [smem:[#allocation49_spill]] }
 0x191   : > { %v1371_v16 = vpop.f32.mrf.mxu0  ;;  %v1384_v17 = vpop.f32.mrf.mxu1 }
 0x192   : > { %v1388_v18 = vpack.c.bf16 %v1384_v17, %v1371_v16 }
 0x194   : > { %v1401_v19 = vunpack.c.l.b16 %v1388_v18  ;;  %v1443_v20 = vunpack.c.h.b16 %v1388_v18 }
 0x196   : > { %v1402_v21 = vpack.c.b16 %v1401_v19, %v1401_v19  ;;  %v1444_v22 = vpack.c.b16 %v1443_v20, %v1443_v20 }
 0x198   : > { %1466 = vrot.lane.b32.xlu2 %v1402_v21, %s3662_s16  ;;  %1403 = vrot.lane.b32.xlu0 %v1402_v21, %s3663_s11  ;;  %v1450_v24 = vsel %vm1448_vm1, %v1444_v22, 0 }
 0x199   : > { %v1373_v23 = vpop.f32.mrf.mxu0  ;;  %v1386_v25 = vpop.f32.mrf.mxu1  ;;  %1459 = vmatpush.bf16.msra.mxu3 %v1450_v24 }
 0x19a   : > { %v3665_v25 = vmov 32.0  }
 0x1f2   : > { %v1467_v50 = vpop.permute.xlu2 %1466 }
 0x20a   : > { %v1404_v26 = vpop.permute.xlu0 %1403 }
 0x20b   : > { %v1409_v27 = vsel %vm1358_vm0, %v1404_v26, 0  ;;  %v3666_v26 = vmov 0  }
 0x20c   : > { %1418 = vmatpush.bf16.xpose.msra.mxu2 %v1409_v27  ;;  %3140 = vset.pattern.permute.xlu0 %v3666_v26 }
 0x213   : > { %2789 = vmatmul.msk.bf16.vlgmr.msra.gmra.mxu2 %vm1358_vm0, %v1388_v18  ;;  %v3141_v18 = vld [vmem:[#allocation9] ss:$0 sm:$0xff] }
 0x214   : > { %1578 = vmatpush.bf16.msrb.mxu2 %v2935_v44 }
 0x218   : > { %1579 = vmatpush.bf16.msrb.mxu2 %v2934_v51  ;;  %v3143_v51 = vld [vmem:[#allocation12] ss:$0 sm:$0xff] }
 0x296   : > { %v1420_v29 = vpop.f32.mrf.mxu2 }
 0x297   : > { %v1424_v30 = vmul.f32 0.17677669, %v1420_v29 }
 0x299   : > { %v2790_v32 = vclamps-f32 %v1424_v30, 15.0 }
 0x29b   : > { %v1427_v33 = vmul.f32 %v2790_v32, %v1328_v31 }
 0x29d   : > { %v1429_v34 = vsel %vm1428_vm2, %v1427_v33, -inf }
 0x29e   : > { %1430 = vmax.xlane.f32.xlu0 %v1429_v34  ;;  %v1422_v35 = vpop.f32.mrf.mxu2 }
 0x311   : > { %v1431_v36 = vpop.xlane.xlu0 %1430 }
 0x312   : > { %v1432_v37 = vsub.f32 %v1427_v33, %v1431_v36 }
 0x314   : > { %v1433_v38 = vmul.f32 1.442695, %v1432_v37 }
 0x316   : > { %3157 = vpow2.f32 %v1433_v38  ;;  %v1326_v38 = vld [vmem:[%s1312_s12] sm:$0xff]  ;;  %s4450_s12 = sld [smem:[#allocation54_spill]] }
 0x31c   : > { %v3158_v39 = vpop.eup %3157 }
 0x31d   : > { %v1435_v40 = vmul.f32 %v3158_v39, %v1328_v31 }
 0x31f   : > { %v1436_v41 = vsel %vm1428_vm2, %v1435_v40, 0.0 }
 0x320   : > { %1437 = vadd.xlane.f32.xlu1 %v1436_v41 }
 0x339   : > { %1468 = vrot.lane.b32.xlu1 %v1402_v21, %s3664_s21 }
 0x393   : > { %v1438_v42 = vpop.xlane.xlu1 %1437 }
 0x394   : > { %v1439_v43 = vadd.f32 1e-06, %v1438_v42 }
 0x396   : > { %3159 = vrcp.f32 %v1439_v43 }
 0x39c   : > { %v3160_v45 = vpop.eup %3159 }
 0x39d   : > { %v1441_v46 = vmul.f32 %v3160_v45, %v1435_v40 }
 0x39f   : > { %v1442_v47 = vpack.c.bf16 %v1441_v46, %v1441_v46 }
 0x3a1   : > { %2791 = vmatmul.msk.bf16.vlgmr.msra.gmra.mxu3 %vm1428_vm2, %v1442_v47 }
 0x3ab   : > { %v1469_v48 = vpop.permute.xlu1 %1468 }
 0x3ac   : > { %v1474_v49 = vsel %vm1358_vm0, %v1469_v48, 0  ;;  %v3142_v48 = vld [vmem:[#allocation10] ss:$0 sm:$0xff] }
 0x3ad   : > { %1483 = vmatpush.bf16.xpose.msrb.mxu3 %v1474_v49 }
 0x3b4   : > { %2792 = vmatmul.msk.bf16.vlgmr.msrb.gmra.mxu3 %vm1358_vm0, %v1467_v50 }
 0x424   : > { %v1461_v52 = vpop.f32.mrf.mxu3 }
 0x425   : > { %v1465_v53 = vpack.c.bf16 %v1461_v52, %v1461_v52 }
 0x427   : > { %2812 = vmatmul.msk.bf16.vlgmr.msrb.gmra.mxu2 %vm1358_vm0, %v1465_v53 }
 0x42c   : > { %v1463_v54 = vpop.f32.mrf.mxu3 }
 0x437   : > { %v1485_v55 = vpop.f32.mrf.mxu3 }
 0x438   : > { %v1489_v56 = vmul.f32 0.17677669, %v1485_v55 }
 0x43a   : > { %v2793_v57 = vclamps-f32 %v1489_v56, 15.0 }
 0x43c   : > { %v1492_v58 = vmul.f32 %v2793_v57, %v1328_v31 }
 0x43e   : > { %v1493_v59 = vsel %vm1428_vm2, %v1492_v58, -inf }
 0x43f   : > { %1494 = vmax.xlane.f32.xlu2 %v1493_v59  ;;  %v1487_v60 = vpop.f32.mrf.mxu3 }
 0x457   : > { %1507 = vrot.lane.b32.xlu2 %v1444_v22, %s3662_s16 }
 0x4aa   : > { %v1581_v61 = vpop.f32.mrf.mxu2 }
 0x4b2   : > { %v1495_v62 = vpop.xlane.xlu2 %1494  ;;  %v1583_v63 = vpop.f32.mrf.mxu2 }
 0x4b3   : > { %v1496_v0 = vsub.f32 %v1492_v58, %v1495_v62  ;;  %v2940_v63 = vld [vmem:[%s4444_s20] sm:$0xff] }
 0x4b5   : > { %v1497_v1 = vmul.f32 1.442695, %v1496_v0  ;;  %v1700_v0 = vld [vmem:[%s1317_s7] sm:$0xff] }
 0x4b7   : > { %3161 = vpow2.f32 %v1497_v1  ;;  %v1701_v1 = vld [vmem:[%s1317_s7 + $0x8] sm:$0xff]  ;;  %s4457_s7 = sld [smem:[#allocation48_spill]] }
 0x4ba   : > { %v1508_v2 = vpop.permute.xlu2 %1507 }
 0x4bb   : > { %v1513_v3 = vsel %vm1448_vm1, %v1508_v2, 0  ;;  %v1706_v2 = vpack.c.bf16 %v1701_v1, %v1700_v0 }
 0x4bc   : > { %1522 = vmatpush.bf16.msrb.mxu0 %v1513_v3  ;;  %v2943_v3 = vld [vmem:[%s4446_s18 + $0x8] sm:$0xff] }
 0x4bd   : > { %v3162_v4 = vpop.eup %3161  ;;  %1765 = vmatpush.bf16.msra.mxu1 %v2943_v3 }
 0x4be   : > { %v1499_v5 = vmul.f32 %v3162_v4, %v1328_v31  ;;  %v2939_v4 = vld [vmem:[%s4447_s27 + $0x8] sm:$0xff] }
 0x4bf   : > { %1692 = vmatpush.bf16.msra.mxu3 %v2939_v4 }
 0x4c0   : > { %v1500_v6 = vsel %vm1428_vm2, %v1499_v5, 0.0 }
 0x4c1   : > { %1501 = vadd.xlane.f32.xlu1 %v1500_v6  ;;  %v2938_v6 = vld [vmem:[%s4447_s27] sm:$0xff] }
 0x4c3   : > { %1693 = vmatpush.bf16.msra.mxu3 %v2938_v6 }
 0x534   : > { %v1502_v8 = vpop.xlane.xlu1 %1501 }
 0x535   : > { %v1503_v9 = vadd.f32 1e-06, %v1502_v8  ;;  %v1743_v8 = vpack.c.bf16 %v1738_v7, %v1738_v7 }
 0x537   : > { %3163 = vrcp.f32 %v1503_v9 }
 0x538   : > { %3165 = vrcp.f32 %v3665_v25 }
 0x53d   : > { %v3164_v10 = vpop.eup %3163 }
 0x53e   : > { %v1505_v11 = vmul.f32 %v3164_v10, %v1499_v5  ;;  %v3166_v27 = vpop.eup %3165  ;;  %v2942_v5 = vld [vmem:[%s4446_s18] sm:$0xff] }
 0x53f   : > { %v1594_v28 = vmul.f32 32.0, %v3166_v27  ;;  %vm1598_vm3 = vweird.f32 %v3166_v27  ;;  %1766 = vmatpush.bf16.msra.mxu1 %v2942_v5 }
 0x540   : > { %v1506_v12 = vpack.c.bf16 %v1505_v11, %v1505_v11 }
 0x541   : > { %v1595_v29 = vsub.f32 1.0, %v1594_v28 }
 0x542   : > { %2794 = vmatmul.msk.bf16.vlgmr.msrb.gmra.mxu0 %vm1428_vm2, %v1506_v12 }
 0x543   : > { %v1596_v30 = vmul.f32 %v3166_v27, %v1595_v29 }
 0x545   : > { %v1597_v31 = vadd.f32 %v3166_v27, %v1596_v30 }
 0x547   : > { %v4152_v32 = vsel %vm1598_vm3, %v3166_v27, %v1597_v31  ;;  %vm1895_vm3 = vcmask 261248  }
 0x5bf   : > { %v1524_v15 = vpop.f32.mrf.mxu0 }
 0x5c0   : > { %v1528_v16 = vpack.c.bf16 %v1524_v15, %v1524_v15 }
 0x5c2   : > { %2803 = vmatmul.msk.bf16.vlgmr.msrb.gmra.mxu1 %vm1358_vm0, %v1528_v16 }
 0x5c7   : > { %v1526_v17 = vpop.f32.mrf.mxu0 }
 0x5d2   : > { %2839 = vmatmul.msk.bf16.vlgmr.msra.gmra.mxu1 %vm1358_vm0, %v1743_v8 }
 0x63f   : > { %v1553_v19 = vpop.f32.mrf.mxu1 }
 0x640   : > { %v1582_v20 = vadd.f32 %v1581_v61, %v1553_v19  ;;  %v3144_v19 = vld [vmem:[%s4449_s0] ss:$0 sm:$0xff]  ;;  %s3667_s0 = smov 16  }
 0x642   : > { %v1588_v21 = vadd.f32 %v3141_v18, %v1582_v20 }
 0x644   : > { %v1589_v22 = vadd.f32 %v1588_v21, %v4122_v14  ;;  %v3145_v21 = vld [vmem:[%s4450_s12] ss:$0 sm:$0xff]  ;;  %s4460_s12 = sld [smem:[#allocation55_spill]] }
 0x646   : > { %v1590_v23 = vsel %vm1358_vm0, %v1589_v22, 0.0 }
 0x647   : > { %1591 = vadd.xlane.f32.xlu0 %v1590_v23  ;;  %v1555_v24 = vpop.f32.mrf.mxu1 }
 0x6ba   : > { %v1592_v33 = vpop.xlane.xlu0 %1591 }
 0x6bb   : > { %v1600_v34 = vmul.f32 %v4152_v32, %v1592_v33 }
 0x6bd   : > { %v1601_v35 = vsub.f32 %v1589_v22, %v1600_v34 }
 0x6bf   : > { %v1602_v36 = vmul.f32 %v1601_v35, %v1601_v35 }
 0x6c1   : > { %v1603_v37 = vsel %vm1358_vm0, %v1602_v36, 0.0 }
 0x6c2   : > { %1604 = vadd.xlane.f32.xlu0 %v1603_v37 }
 0x6d6   : > { %1629 = vperm.xlu0 %3140, %v1326_v38  }
 0x735   : > { %v1605_v39 = vpop.xlane.xlu0 %1604 }
 0x736   : > { %v1606_v40 = vmul.f32 %v1605_v39, %v4152_v32 }
 0x738   : > { %v1607_v41 = vadd.f32 1e-05, %v1606_v40 }
 0x73a   : > { %3167 = vrsqrt.f32 %v1607_v41  ;;  %vm1614_vm5 = vweird.f32 %v1607_v41 }
 0x740   : > { %v3168_v42 = vpop.eup %3167 }
 0x741   : > { %v1609_v43 = vmul.f32 %v3168_v42, %v1607_v41  ;;  %vm1615_vm4 = vweird.f32 %v3168_v42 }
 0x742   : > { %vm1616_vm6 = vmor %vm1614_vm5, %vm1615_vm4 }
 0x743   : > { %v1610_v44 = vmul.f32 %v3168_v42, %v1609_v43 }
 0x745   : > { %v1611_v45 = vmul.f32 0.5, %v1610_v44 }
 0x747   : > { %v1612_v46 = vsub.f32 1.5, %v1611_v45 }
 0x748   : > { %v4159_v53 = vpop.permute.xlu0 %1629 }
 0x749   : > { %v1613_v47 = vmul.f32 %v3168_v42, %v1612_v46 }
 0x74b   : > { %v1617_v49 = vsel %vm1616_vm6, %v3168_v42, %v1613_v47 }
 0x74c   : > { %v1618_v50 = vmul.f32 %v1617_v49, %v1601_v35  ;;  %v1768_v35 = vpop.f32.mrf.mxu1 }
 0x74d   : > { %v1772_v36 = vpack.c.bf16 %v1768_v35, %v1768_v35 }
 0x74e   : > { %v1622_v52 = vmul.f32 %v3142_v48, %v1618_v50  ;;  %v1329_v50 = vld [vmem:[%s4081_s29] sm:$0xf]  ;;  %s4451_s29 = sld [smem:[#allocation39_spill]] }
 0x74f   : > { %v2060_v37 = vunpack.c.l.b16 %v1772_v36  ;;  %v2026_v46 = vsel %vm1358_vm0, %v1772_v36, 0 }
 0x750   : > { %v1626_v54 = vadd.f32 %v3143_v51, %v1622_v52 }
 0x751   : > { %v4201_v38 = vpack.c.b16 %v2060_v37, %v2060_v37 }
 0x752   : > { %v4162_v55 = vmul.f32 %v4159_v53, %v1626_v54  ;;  %v1330_v54 = vunpack.c.l.bf16 %v1329_v50 }
 0x754   : > { %v4166_v56 = vadd.f32 %v4162_v55, %v4122_v14  ;;  %v2941_v14 = vld [vmem:[%s4443_s22 + $0x8] sm:$0xff]  ;;  %v1770_v39 = vpop.f32.mrf.mxu1  ;;  %s4453_s22 = sld [smem:[#allocation45_spill]] }
 0x755   : > { %1728 = vmatpush.bf16.msra.mxu0 %v2941_v14 }
 0x756   : > { %v1636_v57 = vsel %vm1358_vm0, %v4166_v56, 0.0 }
 0x757   : > { %1637 = vadd.xlane.f32.xlu2 %v1636_v57 }
 0x759   : > { %1729 = vmatpush.bf16.msra.mxu0 %v2940_v63 }
 0x75c   : > { %2830 = vmatmul.msk.bf16.vlgmr.msra.gmra.mxu0 %vm1358_vm0, %v1706_v2 }
 0x7ca   : > { %v1638_v58 = vpop.xlane.xlu2 %1637 }
 0x7cb   : > { %v1639_v59 = vmul.f32 %v1638_v58, %v4152_v32 }
 0x7cd   : > { %v1640_v60 = vsub.f32 %v4166_v56, %v1639_v59 }
 0x7cf   : > { %v1641_v61 = vmul.f32 %v1640_v60, %v1640_v60 }
 0x7d1   : > { %v1642_v62 = vsel %vm1358_vm0, %v1641_v61, 0.0 }
 0x7d2   : > { %1643 = vadd.xlane.f32.xlu1 %v1642_v62 }
 0x7d9   : > { %v1731_v26 = vpop.f32.mrf.mxu0 }
 0x7da   : > { %v1736_v27 = vpack.c.bf16 %v1731_v26, %v1731_v26 }
 0x7dc   : > { %v1786_v29 = vunpack.c.l.b16 %v1736_v27 }
 0x7e1   : > { %v1733_v28 = vpop.f32.mrf.mxu0 }
 0x7e2   : > { %v1737_v30 = vpack.c.bf16 %v1733_v28, %v1733_v28 }
 0x7e4   : > { %v1787_v31 = vunpack.c.l.b16 %v1737_v30 }
 0x7e6   : > { %v4193_v33 = vpack.c.b16 %v1787_v31, %v1786_v29  ;;  %v1331_v29 = vld [vmem:[%s4087_s24] sm:$0xf]  ;;  %s4452_s24 = sld [smem:[#allocation44_spill]] }
 0x7e8   : > { %1898 = vrot.lane.b32.xlu2 %v4193_v33, %s3664_s21  ;;  %v1793_v34 = vsel %vm1358_vm0, %v4193_v33, 0 }
 0x7e9   : > { %1802 = vmatpush.bf16.xpose.msra.mxu2 %v1793_v34 }
 0x7eb   : > { %1853 = vrot.lane.b32.xlu1 %v4193_v33, %s3662_s16 }
 0x7f0   : > { %2086 = vrot.lane.b32.xlu2 %v4201_v38, %s3662_s16 }
 0x842   : > { %v1899_v45 = vpop.permute.xlu2 %1898 }
 0x843   : > { %1911 = vmatpush.bf16.msrb.mxu1 %v1899_v45 }
 0x845   : > { %v1644_v9 = vpop.xlane.xlu1 %1643 }
 0x846   : > { %v1645_v10 = vmul.f32 %v1644_v9, %v4152_v32 }
 0x848   : > { %v1646_v11 = vadd.f32 1e-05, %v1645_v10 }
 0x84a   : > { %3169 = vrsqrt.f32 %v1646_v11  ;;  %vm1653_vm8 = vweird.f32 %v1646_v11  ;;  %v2087_v2 = vpop.permute.xlu2 %2086 }
 0x850   : > { %v3170_v12 = vpop.eup %3169 }
 0x851   : > { %v1648_v13 = vmul.f32 %v3170_v12, %v1646_v11  ;;  %vm1654_vm7 = vweird.f32 %v3170_v12 }
 0x852   : > { %vm1655_vm9 = vmor %vm1653_vm8, %vm1654_vm7 }
 0x853   : > { %v1649_v15 = vmul.f32 %v3170_v12, %v1648_v13 }
 0x855   : > { %v1650_v16 = vmul.f32 0.5, %v1649_v15 }
 0x857   : > { %v1651_v17 = vsub.f32 1.5, %v1650_v16 }
 0x859   : > { %v1652_v18 = vmul.f32 %v3170_v12, %v1651_v17 }
 0x85b   : > { %v1656_v20 = vsel %vm1655_vm9, %v3170_v12, %v1652_v18  ;;  %v2947_v18 = vld [vmem:[%s4451_s29 + $0x18] sm:$0xff] }
 0x85c   : > { %v1657_v22 = vmul.f32 %v1656_v20, %v1640_v60  ;;  %1939 = vmatpush.bf16.msrb.mxu2 %v2947_v18 }
 0x85d   : > { %v1854_v47 = vpop.permute.xlu1 %1853 }
 0x85e   : > { %v1661_v23 = vmul.f32 %v3144_v19, %v1657_v22  ;;  %v1859_v48 = vsel %vm1358_vm0, %v1854_v47, 0 }
 0x85f   : > { %1868 = vmatpush.bf16.xpose.msrb.mxu0 %v1859_v48 }
 0x860   : > { %v4188_v24 = vadd.f32 %v3145_v21, %v1661_v23 }
 0x862   : > { %v1670_v25 = vpack.c.bf16 %v4188_v24, %v4188_v24 }
 0x864   : > { %2821 = vmatmul.msk.bf16.vlgmr.msra.gmra.mxu3 %vm1358_vm0, %v1670_v25 }
 0x867   : > { %2035 = vmatpush.bf16.xpose.msra.mxu0 %v2026_v46 }
 0x8e7   : > { %v1695_v40 = vpop.f32.mrf.mxu3 }
 0x8e8   : > { %v1699_v41 = vpack.c.bf16 %v1695_v40, %v1695_v40 }
 0x8ea   : > { %v1849_v42 = vunpack.c.l.b16 %v1699_v41  ;;  %2840 = vmatmul.msk.bf16.vlgmr.msra.gmra.mxu2 %vm1358_vm0, %v1699_v41  ;;  %v2092_v41 = vsel %vm1358_vm0, %v2087_v2, 0 }
 0x8ec   : > { %v1850_v43 = vpack.c.b16 %v1849_v42, %v1849_v42  ;;  %v2946_v42 = vld [vmem:[%s4451_s29 + $0x10] sm:$0xff] }
 0x8ed   : > { %1940 = vmatpush.bf16.msrb.mxu2 %v2946_v42  ;;  %v3147_v42 = vld [vmem:[%s4453_s22] ss:$0 sm:$0xff]  ;;  %s4462_s22 = sld [smem:[#allocation51_spill]] }
 0x8ee   : > { %1851 = vrot.lane.b32.xlu0 %v1850_v43, %s3662_s16  ;;  %2084 = vrot.lane.b32.xlu2 %v1850_v43, %s3664_s21  ;;  %s4232_s16 = scalar_lea.vmem [#allocation19], %s4376_s17 }
 0x8ef   : > { %v1697_v44 = vpop.f32.mrf.mxu3 }
 0x8f0   : > { %v2944_v44 = vld [vmem:[%s4451_s29] sm:$0xff] }
 0x8f1   : > { %2101 = vmatpush.bf16.xpose.msra.mxu2 %v2092_v41 }
 0x948   : > { %v4215_v3 = vpop.permute.xlu2 %2084 }
 0x960   : > { %v1852_v49 = vpop.permute.xlu0 %1851 }
 0x961   : > { %2843 = vmatmul.msk.bf16.vlgmr.msrb.gmra.mxu0 %vm1358_vm0, %v1852_v49 }
 0x96d   : > { %v1804_v51 = vpop.f32.mrf.mxu2 }
 0x96e   : > { %v1808_v52 = vmul.f32 0.17677669, %v1804_v51 }
 0x970   : > { %v2841_v57 = vclamps-f32 %v1808_v52, 15.0 }
 0x972   : > { %v1811_v58 = vmul.f32 %v2841_v57, %v1330_v54 }
 0x974   : > { %v1813_v59 = vsel %vm1812_vm10, %v1811_v58, -inf }
 0x975   : > { %1814 = vmax.xlane.f32.xlu2 %v1813_v59  ;;  %v1806_v60 = vpop.f32.mrf.mxu2 }
 0x9de   : > { %v1870_v61 = vpop.f32.mrf.mxu0 }
 0x9df   : > { %v1874_v62 = vmul.f32 0.17677669, %v1870_v61 }
 0x9e1   : > { %v2844_v14 = vclamps-f32 %v1874_v62, 15.0 }
 0x9e3   : > { %v1877_v63 = vmul.f32 %v2844_v14, %v1330_v54 }
 0x9e5   : > { %v1878_v0 = vsel %vm1812_vm10, %v1877_v63, -inf }
 0x9e6   : > { %1879 = vmax.xlane.f32.xlu1 %v1878_v0  ;;  %v1872_v1 = vpop.f32.mrf.mxu0 }
 0x9e8   : > { %v1815_v4 = vpop.xlane.xlu2 %1814 }
 0x9e9   : > { %v1816_v6 = vsub.f32 %v1811_v58, %v1815_v4 }
 0x9eb   : > { %v1817_v9 = vmul.f32 1.442695, %v1816_v6 }
 0x9ff   : > { %2020 = vrot.lane.b32.xlu1 %v1850_v43, %s3663_s11  ;;  %v2945_v43 = vld [vmem:[%s4451_s29 + $0x8] sm:$0xff] }
 0xa59   : > { %v1880_v5 = vpop.xlane.xlu1 %1879 }
 0xa5a   : > { %v1881_v7 = vsub.f32 %v1877_v63, %v1880_v5 }
 0xa5c   : > { %v1882_v8 = vmul.f32 1.442695, %v1881_v7 }
 0xa5e   : > { %3171 = vpow2.f32 %v1882_v8 }
 0xa5f   : > { %3173 = vpow2.f32 %v1817_v9 }
 0xa64   : > { %v3172_v10 = vpop.eup %3171 }
 0xa65   : > { %v1884_v11 = vmul.f32 %v3172_v10, %v1330_v54  ;;  %v3174_v13 = vpop.eup %3173 }
 0xa66   : > { %v1819_v15 = vmul.f32 %v3174_v13, %v1330_v54 }
 0xa67   : > { %v1885_v12 = vsel %vm1812_vm10, %v1884_v11, 0.0 }
 0xa68   : > { %1886 = vadd.xlane.f32.xlu0 %v1885_v12  ;;  %v1820_v16 = vsel %vm1812_vm10, %v1819_v15, 0.0 }
 0xa70   : > { %1821 = vadd.xlane.f32.xlu0 %v1820_v16 }
 0xa71   : > { %v2021_v17 = vpop.permute.xlu1 %2020 }
 0xa72   : > { %2864 = vmatmul.msk.bf16.vlgmr.msra.gmra.mxu0 %vm1358_vm0, %v2021_v17 }
 0xa84   : > { %1828 = vrot.lane.b32.xlu0 %v4193_v33, %s3663_s11  ;;  %v1332_v33 = vunpack.c.l.bf16 %v1331_v29 }
 0xadb   : > { %v1887_v19 = vpop.xlane.xlu0 %1886 }
 0xadc   : > { %v1888_v20 = vadd.f32 1e-06, %v1887_v19 }
 0xade   : > { %3175 = vrcp.f32 %v1888_v20  ;;  %v2949_v20 = vld [vmem:[%s4452_s24 + $0x8] sm:$0xff] }
 0xae3   : > { %v1822_v21 = vpop.xlane.xlu0 %1821 }
 0xae4   : > { %v3176_v22 = vpop.eup %3175  ;;  %v1823_v23 = vadd.f32 1e-06, %v1822_v21  ;;  %v2948_v21 = vld [vmem:[%s4452_s24] sm:$0xff] }
 0xae5   : > { %v4223_v25 = vmul.f32 %v3176_v22, %v1884_v11 }
 0xae6   : > { %3177 = vrcp.f32 %v1823_v23  ;;  %v2951_v23 = vld [vmem:[%s4452_s24 + $0x18] sm:$0xff] }
 0xae7   : > { %v1897_v26 = vpack.c.bf16 %v4223_v25, %v4223_v25  ;;  %2168 = vmatpush.bf16.msrb.mxu0 %v2951_v23 }
 0xae9   : > { %2845 = vmatmul.msk.bf16.vlgmr.msrb.gmra.mxu1 %vm1812_vm10, %v1897_v26 }
 0xaec   : > { %v3178_v27 = vpop.eup %3177 }
 0xaed   : > { %v1825_v28 = vmul.f32 %v3178_v27, %v1819_v15 }
 0xaef   : > { %v2037_v30 = vpop.f32.mrf.mxu0  ;;  %1826 = vst.msk [vmem:[%s4232_s16] sm:$0xff] %vm1812_vm10, %v1825_v28  ;;  %v1827_v40 = vpack.c.bf16 %v1825_v28, %v1825_v28 }
 0xaf0   : > { %v2041_v31 = vmul.f32 0.17677669, %v2037_v30 }
 0xaf2   : > { %v2865_v34 = vclamps-f32 %v2041_v31, 15.0 }
 0xaf4   : > { %v2044_v35 = vmul.f32 %v2865_v34, %v1332_v33 }
 0xaf6   : > { %v1829_v36 = vpop.permute.xlu0 %1828  ;;  %v2045_v37 = vsel %vm1428_vm2, %v2044_v35, -inf }
 0xaf7   : > { %v2039_v39 = vpop.f32.mrf.mxu0  ;;  %2046 = vmax.xlane.f32.xlu0 %v2045_v37  ;;  %1841 = vmatpush.bf16.msrb.mxu3 %v1829_v36 }
 0xafa   : > { %2842 = vmatmul.msk.bf16.vlgmr.msrb.gmra.mxu3 %vm1812_vm10, %v1827_v40 }
 0xafb   : > { %1967 = vmatpush.bf16.msra.mxu3 %v2945_v43 }
 0xaff   : > { %1968 = vmatpush.bf16.msra.mxu3 %v2944_v44 }
 0xb66   : > { %v1913_v45 = vpop.f32.mrf.mxu1 }
 0xb67   : > { %v1917_v46 = vpack.c.bf16 %v1913_v45, %v1913_v45  ;;  %v3146_v45 = vld [vmem:[#allocation13] ss:$0 sm:$0xff] }
 0xb69   : > { %2854 = vmatmul.msk.bf16.vlgmr.msrb.gmra.mxu2 %vm1358_vm0, %v1917_v46 }
 0xb6a   : > { %v2047_v47 = vpop.xlane.xlu0 %2046 }
 0xb6b   : > { %v2048_v48 = vsub.f32 %v2044_v35, %v2047_v47  ;;  %v2950_v35 = vld [vmem:[%s4452_s24 + $0x10] sm:$0xff] }
 0xb6c   : > { %2169 = vmatpush.bf16.msrb.mxu0 %v2950_v35  ;;  %v2953_v35 = vld [vmem:[%s4457_s7 + $0x8] sm:$0xff] }
 0xb6d   : > { %v2049_v49 = vmul.f32 1.442695, %v2048_v48 }
 0xb6e   : > { %v1915_v50 = vpop.f32.mrf.mxu1 }
 0xb6f   : > { %3179 = vpow2.f32 %v2049_v49 }
 0xb75   : > { %v3180_v51 = vpop.eup %3179 }
 0xb76   : > { %v2051_v52 = vmul.f32 %v3180_v51, %v1332_v33 }
 0xb78   : > { %v2052_v54 = vsel %vm1428_vm2, %v2051_v52, 0.0 }
 0xb79   : > { %2867 = vmatmul.msk.bf16.vlgmr.msra.gmra.mxu2 %vm1358_vm0, %v4215_v3  ;;  %2053 = vadd.xlane.f32.xlu2 %v2052_v54 }
 0xb7d   : > { %v1843_v57 = vpop.f32.mrf.mxu3 }
 0xb7e   : > { %v1847_v58 = vpack.c.bf16 %v1843_v57, %v1843_v57 }
 0xb80   : > { %2863 = vmatmul.msk.bf16.vlgmr.msra.gmra.mxu3 %vm1358_vm0, %v1847_v58 }
 0xb85   : > { %v1845_v59 = vpop.f32.mrf.mxu3 }
 0xbec   : > { %v1942_v60 = vpop.f32.mrf.mxu2  ;;  %v2054_v9 = vpop.xlane.xlu2 %2053 }
 0xbed   : > { %v2055_v10 = vadd.f32 1e-06, %v2054_v9 }
 0xbf4   : > { %v1944_v61 = vpop.f32.mrf.mxu2 }
 0xbfc   : > { %v2103_v62 = vpop.f32.mrf.mxu2 }
 0xbfd   : > { %v2107_v14 = vmul.f32 0.17677669, %v2103_v62 }
 0xbff   : > { %v2868_v63 = vclamps-f32 %v2107_v14, 15.0 }
 0xc01   : > { %v2110_v0 = vmul.f32 %v2868_v63, %v1332_v33 }
 0xc03   : > { %v1970_v1 = vpop.f32.mrf.mxu3  ;;  %v2111_v2 = vsel %vm1428_vm2, %v2110_v0, -inf }
 0xc04   : > { %v1971_v4 = vadd.f32 %v1970_v1, %v1942_v60  ;;  %2112 = vmax.xlane.f32.xlu1 %v2111_v2  ;;  %v2105_v5 = vpop.f32.mrf.mxu2 }
 0xc06   : > { %v1977_v48 = vadd.f32 %v3146_v45, %v1971_v4 }
 0xc08   : > { %v1978_v51 = vadd.f32 %v1977_v48, %v4188_v24 }
 0xc0b   : > { %v1972_v6 = vpop.f32.mrf.mxu3 }
 0xc1d   : > { %2062 = vrot.lane.b32.xlu1 %v4201_v38, %s3663_s11 }
 0xc77   : > { %v2113_v3 = vpop.xlane.xlu1 %2112 }
 0xc78   : > { %v2114_v7 = vsub.f32 %v2110_v0, %v2113_v3 }
 0xc7a   : > { %v2115_v8 = vmul.f32 1.442695, %v2114_v7 }
 0xc7c   : > { %3181 = vpow2.f32 %v2115_v8 }
 0xc7d   : > { %3183 = vrcp.f32 %v2055_v10 }
 0xc82   : > { %v3182_v11 = vpop.eup %3181 }
 0xc83   : > { %v2117_v12 = vmul.f32 %v3182_v11, %v1332_v33  ;;  %v3184_v15 = vpop.eup %3183 }
 0xc84   : > { %v2057_v16 = vmul.f32 %v3184_v15, %v2051_v52  ;;  %v1979_v52 = vsel %vm1358_vm0, %v1978_v51, 0.0  ;;  %v3148_v15 = vld [vmem:[%s4454_s26] ss:$0 sm:$0xff]  ;;  %s4463_s26 = sld [smem:[#allocation58_spill]] }
 0xc85   : > { %v2118_v13 = vsel %vm1428_vm2, %v2117_v12, 0.0 }
 0xc86   : > { %2119 = vadd.xlane.f32.xlu2 %v2118_v13  ;;  %v2058_v19 = vpack.c.bf16 %v2057_v16, %v2057_v16 }
 0xc8f   : > { %v2063_v17 = vpop.permute.xlu1 %2062 }
 0xc90   : > { %v2068_v18 = vsel %vm1448_vm1, %v2063_v17, 0 }
 0xc91   : > { %2077 = vmatpush.bf16.msra.mxu1 %v2068_v18 }
 0xc94   : > { %2866 = vmatmul.msk.bf16.vlgmr.msra.gmra.mxu1 %vm1428_vm2, %v2058_v19  ;;  %v3149_v19 = vld [vmem:[%s4455_s4] ss:$0 sm:$0xff]  ;;  %s4464_s4 = smov %s4463_s26 }
 0xc95   : > { %2196 = vmatpush.bf16.msrb.mxu1 %v2949_v20  ;;  %s3513_s3 = scalar_lea.hbm %s4464_s4, 16 }
 0xc99   : > { %2197 = vmatpush.bf16.msrb.mxu1 %v2948_v21 }
 0xc9e   : > { %2125 = vrot.lane.b32.xlu2 %v4201_v38, %s3664_s21 }
 0xcf9   : > { %v2120_v22 = vpop.xlane.xlu2 %2119 }
 0xcfa   : > { %v2121_v26 = vadd.f32 1e-06, %v2120_v22 }
 0xcfc   : > { %3185 = vrcp.f32 %v2121_v26 }
 0xd01   : > { %v2126_v27 = vpop.permute.xlu2 %2125 }
 0xd02   : > { %v3186_v28 = vpop.eup %3185  ;;  %v2131_v29 = vsel %vm1448_vm1, %v2126_v27, 0  ;;  %v3150_v27 = vld [vmem:[#allocation15] ss:$0 sm:$0xff] }
 0xd03   : > { %v2123_v30 = vmul.f32 %v3186_v28, %v2117_v12  ;;  %2140 = vmatpush.bf16.msrb.mxu3 %v2131_v29 }
 0xd05   : > { %v2124_v31 = vpack.c.bf16 %v2123_v30, %v2123_v30  ;;  %v3151_v30 = vld [vmem:[%s4456_s2] ss:$0 sm:$0xff]  ;;  %s2925_s2 = sshll.u32 %s3877_s1, 3 }
 0xd07   : > { %2869 = vmatmul.msk.bf16.vlgmr.msrb.gmra.mxu3 %vm1428_vm2, %v2124_v31  ;;  %vm2280_vm2 = vcmask 523264  }
 0xd11   : > { %v2079_v38 = vpop.f32.mrf.mxu1 }
 0xd12   : > { %v2083_v33 = vpack.c.bf16 %v2079_v38, %v2079_v38 }
 0xd14   : > { %2887 = vmatmul.msk.bf16.vlgmr.msrb.gmra.mxu1 %vm1358_vm0, %v2083_v33  ;;  %v2955_v33 = vld [vmem:[%s4457_s7 + $0x18] sm:$0xff] }
 0xd15   : > { %2288 = vmatpush.bf16.msrb.mxu2 %v2955_v33 }
 0xd19   : > { %v2081_v34 = vpop.f32.mrf.mxu1 }
 0xd1a   : > { %v2954_v34 = vld [vmem:[%s4457_s7 + $0x10] sm:$0xff] }
 0xd1b   : > { %2289 = vmatpush.bf16.msrb.mxu2 %v2954_v34 }
 0xd1f   : > { %2290 = vmatpush.bf16.msrb.mxu2 %v2953_v35 }
 0xd8a   : > { %v2142_v36 = vpop.f32.mrf.mxu3 }
 0xd8b   : > { %v2146_v37 = vpack.c.bf16 %v2142_v36, %v2142_v36  ;;  %v2952_v36 = vld [vmem:[%s4457_s7] sm:$0xff] }
 0xd8c   : > { %2291 = vmatpush.bf16.msrb.mxu2 %v2952_v36 }
 0xd8d   : > { %2878 = vmatmul.msk.bf16.vlgmr.msrb.gmra.mxu0 %vm1358_vm0, %v2146_v37 }
 0xd91   : > { %v2199_v39 = vpop.f32.mrf.mxu1 }
 0xd92   : > { %v2144_v40 = vpop.f32.mrf.mxu3 }
 0xd99   : > { %v2201_v41 = vpop.f32.mrf.mxu1 }
 0xd9a   : > { %v3152_v41 = vld [vmem:[%s4458_s9] ss:$0 sm:$0xff]  ;;  %s2451_s9 = scalar_lea.hbm %s4463_s26, %s2925_s2 }
 0xe0a   : > { %v2171_v43 = vpop.f32.mrf.mxu0 }
 0xe0b   : > { %v2200_v44 = vadd.f32 %v2199_v39, %v2171_v43 }
 0xe0d   : > { %v2206_v46 = vadd.f32 %v3147_v42, %v2200_v44 }
 0xe0f   : > { %v2207_v47 = vadd.f32 %v2206_v46, %v4188_v24 }
 0xe11   : > { %v2208_v49 = vsel %vm1358_vm0, %v2207_v47, 0.0 }
 0xe12   : > { %v2173_v50 = vpop.f32.mrf.mxu0  ;;  %2209 = vadd.xlane.f32.xlu0 %v2208_v49 }
 0xe1a   : > { %1980 = vadd.xlane.f32.xlu0 %v1979_v52 }
 0xe85   : > { %v2210_v54 = vpop.xlane.xlu0 %2209 }
 0xe86   : > { %v2211_v57 = vmul.f32 %v2210_v54, %v4152_v32 }
 0xe88   : > { %v2212_v58 = vsub.f32 %v2207_v47, %v2211_v57 }
 0xe8a   : > { %v2213_v59 = vmul.f32 %v2212_v58, %v2212_v58 }
 0xe8c   : > { %v2214_v60 = vsel %vm1358_vm0, %v2213_v59, 0.0 }
 0xe8d   : > { %2215 = vadd.xlane.f32.xlu2 %v2214_v60  ;;  %v1981_v61 = vpop.xlane.xlu0 %1980 }
 0xe8e   : > { %v1982_v62 = vmul.f32 %v1981_v61, %v4152_v32 }
 0xe90   : > { %v1983_v14 = vsub.f32 %v1978_v51, %v1982_v62 }
 0xe92   : > { %v1984_v63 = vmul.f32 %v1983_v14, %v1983_v14 }
 0xe94   : > { %v1985_v0 = vsel %vm1358_vm0, %v1984_v63, 0.0 }
 0xe95   : > { %1986 = vadd.xlane.f32.xlu0 %v1985_v0 }
 0xf00   : > { %v2216_v24 = vpop.xlane.xlu2 %2215 }
 0xf01   : > { %v2217_v1 = vmul.f32 %v2216_v24, %v4152_v32 }
 0xf03   : > { %v2218_v2 = vadd.f32 1e-05, %v2217_v1  ;;  %v3153_v1 = vld [vmem:[%s4460_s12] ss:$0 sm:$0xff]  ;;  %s2455_s12 = sshll.u32 %s2451_s9, 4  ;;  %s2456_s12 = int_to_ptr.hbm [resolvable:$true] %s2455_s12 }
 0xf04   : > { %s3507_s17 = sshra.s32 %s2456_s12, 4  ;;  %s3508_s17 = int_to_ptr.hbm [resolvable:$true] %s3507_s17 }
 0xf05   : > { %3187 = vrsqrt.f32 %v2218_v2  ;;  %vm2225_vm12 = vweird.f32 %v2218_v2  ;;  %p3514_p8 = scmp.lt.s32.totalorder %s3508_s17, %s4464_s4 }
 0xf08   : > { %v1987_v4 = vpop.xlane.xlu0 %1986 }
 0xf09   : > { %v1988_v5 = vmul.f32 %v1987_v4, %v4152_v32 }
 0xf0b   : > { %v3188_v6 = vpop.eup %3187  ;;  %v1989_v3 = vadd.f32 1e-05, %v1988_v5 }
 0xf0c   : > { %v2220_v7 = vmul.f32 %v3188_v6, %v2218_v2  ;;  %vm2226_vm11 = vweird.f32 %v3188_v6 }
 0xf0d   : > { %3189 = vrsqrt.f32 %v1989_v3  ;;  %vm2227_vm13 = vmor %vm2225_vm12, %vm2226_vm11  ;;  %vm1996_vm15 = vweird.f32 %v1989_v3 }
 0xf0e   : > { %v2221_v8 = vmul.f32 %v3188_v6, %v2220_v7  ;;  %v2959_v7 = vld [vmem:[#allocation16 + $0x8] sm:$0xff] }
 0xf0f   : > { %2400 = vmatpush.bf16.msra.mxu0 %v2959_v7 }
 0xf10   : > { %v2222_v9 = vmul.f32 0.5, %v2221_v8  ;;  %v2958_v8 = vld [vmem:[#allocation16] sm:$0xff] }
 0xf12   : > { %v2223_v10 = vsub.f32 1.5, %v2222_v9  ;;  %v3155_v9 = vld [vmem:[%s4462_s22] ss:$0 sm:$0xff]  ;;  %s3509_s22 = scalar_lea.hbm %s3508_s17, 8 }
 0xf13   : > { %v3190_v11 = vpop.eup %3189  ;;  %2401 = vmatpush.bf16.msra.mxu0 %v2958_v8  ;;  %p3510_p5 = scmp.ne.s32.totalorder %s3508_s17, %s3509_s22  ;;  %p3515_p3 = scmp.lt.s32.totalorder %s3513_s3, %s3509_s22 }
 0xf14   : > { %v2224_v12 = vmul.f32 %v3188_v6, %v2223_v10  ;;  %v1991_v13 = vmul.f32 %v3190_v11, %v1989_v3  ;;  %vm1997_vm14 = vweird.f32 %v3190_v11 }
 0xf15   : > { %vm1998_vm1 = vmor %vm1996_vm15, %vm1997_vm14  ;;  %p3511_p7 = pnand %p3510_p5, %p3975_p4  ;;  %p3516_p11 = por %p3515_p3, %p3514_p8 }
 0xf16   : > { %v2228_v16 = vsel %vm2227_vm13, %v3188_v6, %v2224_v12  ;;  %v1992_v17 = vmul.f32 %v3190_v11, %v1991_v13 }
 0xf17   : > { %v2229_v18 = vmul.f32 %v2228_v16, %v2212_v58  ;;  %p3512_p12 = pneg %p3511_p7 }
 0xf18   : > { %v1993_v20 = vmul.f32 0.5, %v1992_v17 }
 0xf19   : > { %v2233_v21 = vmul.f32 %v3148_v15, %v2229_v18  ;;  %p3517_p10 = pnand %p3516_p11, %p3512_p12 }
 0xf1a   : > { %v1994_v22 = vsub.f32 1.5, %v1993_v20 }
 0xf1b   : > { %v2237_v23 = vadd.f32 %v3149_v19, %v2233_v21 }
 0xf1c   : > { %v1995_v26 = vmul.f32 %v3190_v11, %v1994_v22 }
 0xf1d   : > { %2239 = vrot.lane.b32.xlu1 %v2237_v23, %s3664_s21 }
 0xf1e   : > { %v1999_v28 = vsel %vm1998_vm1, %v3190_v11, %v1995_v26 }
 0xf1f   : > { %v2000_v29 = vmul.f32 %v1999_v28, %v1983_v14 }
 0xf21   : > { %v2004_v31 = vmul.f32 %v3150_v27, %v2000_v29 }
 0xf23   : > { %v2008_v38 = vadd.f32 %v3151_v30, %v2004_v31 }
 0xf25   : > { %2414 = vrot.lane.b32.xlu2 %v2008_v38, %s3663_s11  ;;  %s4459_s11 = sld [smem:[#allocation50_spill]] }
 0xf2b   : > { %v2957_v58 = vld [vmem:[%s4459_s11 + $0x8] sm:$0xff] }
 0xf2c   : > { %2362 = vmatpush.bf16.msra.mxu3 %v2957_v58 }
 0xf8f   : > { %v2240_v37 = vpop.permute.xlu1 %2239 }
 0xf90   : > { %v2242_v39 = vsel %vm1358_vm0, %v2008_v38, %v2240_v37 }
 0xf91   : > { %v2251_v40 = vpack.c.bf16 %v2242_v39, %v2242_v39 }
 0xf93   : > { %2904 = vmatmul.msk.bf16.vlgmr.msrb.gmra.mxu2 %vm2280_vm2, %v2251_v40 }
0x1016   : > { %v2293_v42 = vpop.f32.mrf.mxu2 }
0x1017   : > { %v2294_v43 = vadd.f32 %v3152_v41, %v2293_v42 }
0x1019   : > { %v2297_v44 = vmax.f32 %v2294_v43, 0.0 }
0x101b   : > { %v2298_v45 = vmul.f32 %v2297_v44, %v4159_v53 }
0x101d   : > { %v4288_v46 = vadd.f32 %v2298_v45, %v4166_v56 }
0x101e   : > { %v2295_v47 = vpop.f32.mrf.mxu2 }
0x101f   : > { %v2302_v48 = vsel %vm1358_vm0, %v4288_v46, 0.0 }
0x1020   : > { %2303 = vadd.xlane.f32.xlu0 %v2302_v48 }
0x1034   : > { %2410 = vrot.lane.b32.xlu0 %v4162_v55, %s3664_s21  ;;  %v2956_v55 = vld [vmem:[%s4459_s11] sm:$0xff]  ;;  %s4461_s21 = sld [smem:[#allocation56_spill]] }
0x1035   : > { %2363 = vmatpush.bf16.msra.mxu3 %v2956_v55 }
0x103a   : > { %v3154_v5 = vld [vmem:[%s4461_s21] ss:$0 sm:$0xff]  ;;  %s2427_s21 = scalar_lea.sflag [#allocation20], %s4078_s15 }
0x103c   : > { %1892 = vrot.lane.b32.xlu0 %v4223_v25, %s3667_s0  ;;  %s2453_s0 = sshll.u32 %s4232_s16, 4  ;;  %s2454_s0 = int_to_ptr.vmem [resolvable:$true] %s2453_s0 }
0x1093   : > { %v2304_v49 = vpop.xlane.xlu0 %2303 }
0x1094   : > { %v2305_v50 = vmul.f32 %v2304_v49, %v4152_v32 }
0x1096   : > { %v2306_v56 = vsub.f32 %v4288_v46, %v2305_v50 }
0x1098   : > { %v2307_v51 = vmul.f32 %v2306_v56, %v2306_v56 }
0x109a   : > { %v2308_v52 = vsel %vm1358_vm0, %v2307_v51, 0.0 }
0x109b   : > { %2309 = vadd.xlane.f32.xlu1 %v2308_v52 }
0x10a6   : > { %v4298_v54 = vpop.permute.xlu0 %2410 }
0x10ae   : > { %v1893_v57 = vpop.permute.xlu0 %1892 }
0x10af   : > { %1896 = vst.msk [vmem:[%s4232_s16] sm:$0xff] %vm1895_vm3, %v1893_v57 }
0x110e   : > { %v2310_v25 = vpop.xlane.xlu1 %2309 }
0x110f   : > { %v2311_v59 = vmul.f32 %v2310_v25, %v4152_v32 }
0x1111   : > { %v2312_v60 = vadd.f32 1e-05, %v2311_v59 }
0x1113   : > { %3191 = vrsqrt.f32 %v2312_v60  ;;  %vm2319_vm5 = vweird.f32 %v2312_v60 }
0x1119   : > { %v3192_v61 = vpop.eup %3191 }
0x111a   : > { %v2314_v62 = vmul.f32 %v3192_v61, %v2312_v60  ;;  %vm2320_vm4 = vweird.f32 %v3192_v61 }
0x111b   : > { %vm2321_vm6 = vmor %vm2319_vm5, %vm2320_vm4 }
0x111c   : > { %v2315_v14 = vmul.f32 %v3192_v61, %v2314_v62 }
0x111e   : > { %v2316_v63 = vmul.f32 0.5, %v2315_v14 }
0x1120   : > { %v2317_v0 = vsub.f32 1.5, %v2316_v63 }
0x1122   : > { %v2318_v24 = vmul.f32 %v3192_v61, %v2317_v0 }
0x1124   : > { %v2322_v2 = vsel %vm2321_vm6, %v3192_v61, %v2318_v24 }
0x1125   : > { %v2323_v4 = vmul.f32 %v2322_v2, %v2306_v56 }
0x1127   : > { %v2327_v6 = vmul.f32 %v3153_v1, %v2323_v4 }
0x1129   : > { %v2331_v32 = vadd.f32 %v3154_v5, %v2327_v6 }
0x112b   : > { %v2336_v3 = vpack.c.bf16 %v2331_v32, %v2331_v32 }
0x112d   : > { %2913 = vmatmul.msk.bf16.vlgmr.msra.gmra.mxu3 %vm1358_vm0, %v2336_v3 }
0x11b0   : > { %v2365_v10 = vpop.f32.mrf.mxu3 }
0x11b1   : > { %v2366_v11 = vadd.f32 %v3155_v9, %v2365_v10 }
0x11b3   : > { %v2369_v12 = vmax.f32 %v2366_v11, 0.0 }
0x11b5   : > { %v2374_v13 = vpack.c.bf16 %v2369_v12, %v2369_v12 }
0x11b7   : > { %2922 = vmatmul.msk.bf16.vlgmr.msra.gmra.mxu0 %vm1358_vm0, %v2374_v13 }
0x11b8   : > { %v2367_v15 = vpop.f32.mrf.mxu3 }
0x11b9   : > { %3520 = shalt.err (!%p3517_p10)
}
0x11ba   : > { %s4465_s1 = sld [smem:[#allocation52_spill]]  ;;  %s4467_s9 = sshll.u32 %s4078_s15, 3  ;;  %vm2419_vm7 = vcmask 785408   ;;  %v2415_v21 = vpop.permute.xlu2 %2414 }
0x11bb   : > { %s4466_s16 = sld [smem:[#allocation57_spill]]  ;;  %s1297_s5 = scalar_lea.vmem [#allocation18], %s4467_s9 }
0x11bc   : > { %2997 = dma.vmem_to_hbm [thread:$0]  (%p3975_p4), %s2454_s0, 128, %s2456_s12, %s2427_s21  }
0x11bd   : > { %s2439_s17 = sshll.u32 %s1297_s5, 4  ;;  %s2440_s17 = int_to_ptr.vmem [resolvable:$true] %s2439_s17 }
0x11c0   : > { %v3156_v16 = vld [vmem:[%s4465_s1] ss:$0 sm:$0xff] }
0x11c1   : > { %s2437_s26 = scalar_lea.hbm %s4466_s16, %s2925_s2  ;;  %s2422_s2 = scalar_lea.sflag [#allocation4], %s4078_s15 }
0x11c2   : > { %s2441_s3 = sshll.u32 %s2437_s26, 4  ;;  %s3541_s21 = scalar_lea.hbm %s4466_s16, 16  ;;  %s2442_s3 = int_to_ptr.hbm [resolvable:$true] %s2441_s3 }
0x11c3   : > { %s3535_s0 = sshra.s32 %s2442_s3, 4  ;;  %s3536_s0 = int_to_ptr.hbm [resolvable:$true] %s3535_s0 }
0x11c4   : > { %s3537_s12 = scalar_lea.hbm %s3536_s0, 8  ;;  %p3542_p0 = scmp.lt.s32.totalorder %s3536_s0, %s4466_s16 }
0x11c5   : > { %p3538_p13 = scmp.ne.s32.totalorder %s3536_s0, %s3537_s12  ;;  %p3543_p2 = scmp.lt.s32.totalorder %s3541_s21, %s3537_s12 }
0x11c7   : > { %p3539_p9 = pnand %p3538_p13, %p3975_p4  ;;  %p3544_p6 = por %p3543_p2, %p3542_p0 }
0x11c9   : > { %p3540_p1 = pneg %p3539_p9 }
0x11cb   : > { %p3545_p5 = pnand %p3544_p6, %p3540_p1 }
0x1234   : > { %v2403_v17 = vpop.f32.mrf.mxu0 }
0x1235   : > { %v2404_v18 = vadd.f32 %v3156_v16, %v2403_v17 }
0x1237   : > { %v2407_v19 = vmul.f32 %v2404_v18, %v4159_v53 }
0x1239   : > { %v2408_v20 = vadd.f32 %v2407_v19, %v4288_v46 }
0x123b   : > { %v2417_v22 = vsel %vm1358_vm0, %v2408_v20, %v4298_v54 }
0x123c   : > { %v2405_v23 = vpop.f32.mrf.mxu0  ;;  %v2418_v26 = vsel %vm2280_vm2, %v2417_v22, %v2415_v21 }
0x123d   : > { %2420 = vst.msk [vmem:[%s1297_s5] sm:$0xff] %vm2419_vm7, %v2418_v26 }
0x123e   : > { %3548 = shalt.err (!%p3545_p5)
}
0x123f   : > { %2996 = dma.vmem_to_hbm [thread:$0]  (%p3975_p4), %s2440_s17, 128, %s2442_s3, %s2422_s2  }
0x1240 PF: > { %s4468_s22 = sld [smem:[#allocation59_spill]]  ;;  %p4471_p12 = scmp.ge.s32.totalorder %s3615_s28, 2 }
0x1241   : > { %s4469_s5 = sld [smem:[#allocation61_spill]] }
0x1246   : > { %s2467_s15 = sand.u32 1, %s4468_s22  }
0x1247   : > { %p4470_p7 = scmp.ne.s32.totalorder %s4469_s5, 0  ;;  %s2468_s1 = scalar_lea.sflag [#allocation4], %s2467_s15 }
0x1249   : > { %p3033_p8 = pnand %p4471_p12, %p4470_p7 }
0x124b   : > { %p3034_p3 = pneg %p3033_p8 }
0x124d   : > { %3594 = dma.done.wait (%p3034_p3), %s2468_s1, 128  }
0x124e   : > { %3596 = vsyncadd (%p3034_p3), %s2468_s1, 4294967168  ;;  %s2478_s26 = scalar_lea.sflag [#allocation20], %s2467_s15 }
0x124f   : > { %3598 = dma.done.wait (%p3034_p3), %s2478_s26, 128  }
0x1250   : > { %3600 = vsyncadd (%p3034_p3), %s2478_s26, 4294967168  ;;  %s4472_s28 = sld [smem:[#allocation62_spill]]  ;;  %s4475_s22 = smov %s3607_s23 }
0x1251   : > { %s4473_s9 = sld [smem:[#allocation60_spill]] }
0x1252   : > { %s4474_s26 = sld [smem:[#allocation63_spill]] }
0x1256   : > { %p90_p4 = scmp.ge.s32.totalorder %s4472_s28, 4  }
0x1257   : > { %s4476_s23 = smov %s4473_s9 }
0x1258   :  { %92 = sbr.rel (!%p90_p4) target bundleno = 82 (0x52), region = 307 }
0x125d   :  { %2484 = vsyncpa [#allocation3], 1 }
0x125e   :  { %2486 = vsyncpa [#allocation3 + $0x1], 1 }
0x125f   :  { %2487 = vsyncpa [#allocation6], 1 }
0x1260   :  { %2488 = vsyncpa [#allocation11], 1 }
0x1261   :  { %2489 = vsyncpa [#allocation14], 1 }
0x1262   :  { %2490 = vsyncpa [#allocation17], 1 }
0x1263   :  { %2491 = vsyncpa [#allocation4], 1 }
0x1264   :  { %2493 = vsyncpa [#allocation4 + $0x1], 1 }
0x1265   :  { %2494 = vsyncpa [#allocation20], 1 }
0x1266   :  { %2496 = vsyncpa [#allocation20 + $0x1], 1 }

// kernel: tpu_custom_call.1
= control target key start
LH: loop header
LB: loop body
LE: loop exit
PB: predicated region body
PF: predicated region fallthrough
CT: control target
= control target key end

     0   :  { %s3617_s6 = smov 1   ;;  %s3618_s10 = smov 2   ;;  %s4353_s0 = inlined_call_operand.smem [shape: u32[36], index: -1, kind: input, shape index: {}] }
   0x1   :  { %s3676_s5 = sld [smem:[%s4353_s0]]   ;;  %s3619_s14 = smov 3  }
   0x2   :  { %s3681_s9 = sld [smem:[%s4353_s0 + %s3617_s6]]   ;;  %s3620_s18 = smov 4  }
   0x3   :  { %s3686_s13 = sld [smem:[%s4353_s0 + %s3618_s10]]   ;;  %s3621_s22 = smov 5  }
   0x4   :  { %s3691_s17 = sld [smem:[%s4353_s0 + %s3619_s14]]   ;;  %s3622_s26 = smov 6  }
   0x5   :  { %s3696_s21 = sld [smem:[%s4353_s0 + %s3620_s18]]   ;;  %s3623_s30 = smov 7  }
   0x6   :  { %s3701_s25 = sld [smem:[%s4353_s0 + %s3621_s22]]   ;;  %s3624_s4 = smov 8  }
   0x7   :  { %4378 = sst [smem:[#allocation30_spill]] %s3676_s5  ;;  %s3625_s10 = smov 9  }
   0x8   :  { %4379 = sst [smem:[#allocation31_spill]] %s3681_s9  ;;  %s3626_s15 = smov 10  }
   0x9   :  { %s3706_s29 = sld [smem:[%s4353_s0 + %s3622_s26]]   ;;  %s3627_s20 = smov 11  }
   0xa   :  { %4380 = sst [smem:[#allocation32_spill]] %s3691_s17  ;;  %s3628_s26 = smov 12  }
   0xb   :  { %4381 = sst [smem:[#allocation33_spill]] %s3696_s21  ;;  %s3629_s1 = smov 13  }
   0xc   :  { %s3711_s3 = sld [smem:[%s4353_s0 + %s3623_s30]]   ;;  %s3630_s7 = smov 14  }
   0xd   :  { %s3716_s8 = sld [smem:[%s4353_s0 + %s3624_s4]]   ;;  %s3632_s22 = smov 16  }
   0xe   :  { %s3721_s14 = sld [smem:[%s4353_s0 + %s3625_s10]]   ;;  %s3633_s28 = smov 17  }
   0xf   :  { %4382 = sst [smem:[#allocation34_spill]] %s3706_s29 }
  0x10   :  { %s3726_s19 = sld [smem:[%s4353_s0 + %s3626_s15]]   ;;  %s3631_s15 = smov 15  }
  0x11   :  { %s3731_s24 = sld [smem:[%s4353_s0 + %s3627_s20]]  }
  0x12   :  { %4383 = sst [smem:[#allocation35_spill]] %s3711_s3 }
  0x13   :  { %s3736_s30 = sld [smem:[%s4353_s0 + %s3628_s26]]  }
  0x14   :  { %s3741_s6 = sld [smem:[%s4353_s0 + %s3629_s1]]  }
  0x15   :  { %s3746_s12 = sld [smem:[%s4353_s0 + %s3630_s7]]   ;;  %s3634_s7 = smov 18  }
  0x16   :  { %s3751_s20 = sld [smem:[%s4353_s0 + %s3631_s15]]   ;;  %s3635_s15 = smov 19  }
  0x17   :  { %4384 = sst [smem:[#allocation36_spill]] %s3731_s24 }
  0x18   :  { %s3756_s27 = sld [smem:[%s4353_s0 + %s3632_s22]]   ;;  %s3636_s22 = smov 20  }
  0x19   :  { %s3761_s4 = sld [smem:[%s4353_s0 + %s3633_s28]]   ;;  %s3637_s28 = smov 21  }
  0x1a   :  { %4385 = sst [smem:[#allocation37_spill]] %s3741_s6 }
  0x1b   :  { %4386 = sst [smem:[#allocation38_spill]] %s3746_s12 }
  0x1c   :  { %4387 = sst [smem:[#allocation39_spill]] %s3751_s20 }
  0x1d   :  { %s3766_s29 = sld [smem:[%s4353_s0 + %s3634_s7]]   ;;  %s3638_s7 = smov 22  }
  0x1e   :  { %4388 = sst [smem:[#allocation40_spill]] %s3756_s27 }
  0x1f   :  { %4389 = sst [smem:[#allocation41_spill]] %s3761_s4 }
  0x20   :  { %s3771_s20 = sld [smem:[%s4353_s0 + %s3635_s15]]   ;;  %s3639_s15 = smov 23  }
  0x21   :  { %s3776_s6 = sld [smem:[%s4353_s0 + %s3636_s22]]   ;;  %s3640_s22 = smov 24  }
  0x22   :  { %s3781_s21 = sld [smem:[%s4353_s0 + %s3637_s28]]   ;;  %s3641_s28 = smov 25  }
  0x23   :  { %4390 = sst [smem:[#allocation42_spill]] %s3766_s29 }
  0x24   :  { %s3786_s29 = sld [smem:[%s4353_s0 + %s3638_s7]]   ;;  %s3642_s7 = smov 26  }
  0x26   :  { %4391 = sst [smem:[#allocation43_spill]] %s3771_s20 }
  0x27   :  { %4392 = sst [smem:[#allocation44_spill]] %s3776_s6 }
  0x28   :  { %4393 = sst [smem:[#allocation45_spill]] %s3781_s21 }
  0x29   :  { %s3791_s20 = sld [smem:[%s4353_s0 + %s3639_s15]]   ;;  %s3643_s15 = smov 27  }
  0x2a   :  { %4394 = sst [smem:[#allocation46_spill]] %s3786_s29 }
  0x2b   :  { %s3796_s6 = sld [smem:[%s4353_s0 + %s3640_s22]]   ;;  %s3644_s22 = smov 28  }
  0x2c   :  { %s3801_s21 = sld [smem:[%s4353_s0 + %s3641_s28]]   ;;  %s3645_s28 = smov 29  }
  0x2d   :  { %s3806_s29 = sld [smem:[%s4353_s0 + %s3642_s7]]   ;;  %s3646_s7 = smov 30  }
  0x2f   :  { %4395 = sst [smem:[#allocation47_spill]] %s3791_s20 }
  0x30   :  { %s3811_s20 = sld [smem:[%s4353_s0 + %s3643_s15]]   ;;  %s3647_s15 = smov 31  }
  0x31   :  { %4396 = sst [smem:[#allocation48_spill]] %s3796_s6 }
  0x32   :  { %4397 = sst [smem:[#allocation49_spill]] %s3801_s21 }
  0x33   :  { %4398 = sst [smem:[#allocation50_spill]] %s3806_s29 }
  0x34   :  { %s3816_s6 = sld [smem:[%s4353_s0 + %s3644_s22]]   ;;  %s3648_s22 = smov 32  }
  0x35   :  { %s3821_s21 = sld [smem:[%s4353_s0 + %s3645_s28]]   ;;  %s3649_s28 = smov 33  }
  0x36   :  { %4399 = sst [smem:[#allocation51_spill]] %s3811_s20 }
  0x37   :  { %s3826_s29 = sld [smem:[%s4353_s0 + %s3646_s7]]   ;;  %s3650_s7 = smov 34  }
  0x38   :  { %s3831_s20 = sld [smem:[%s4353_s0 + %s3647_s15]]   ;;  %s3651_s15 = smov 35  }
  0x39   :  { %s3836_s12 = sld [smem:[%s4353_s0 + %s3648_s22]]  }
  0x3b   :  { %4400 = sst [smem:[#allocation52_spill]] %s3821_s21 }
  0x3c   :  { %s3841_s21 = sld [smem:[%s4353_s0 + %s3649_s28]]  }
  0x3d   :  { %4401 = sst [smem:[#allocation53_spill]] %s3826_s29 }
  0x3e   :  { %4402 = sst [smem:[#allocation54_spill]] %s3831_s20 }
  0x3f   :  { %4403 = sst [smem:[#allocation55_spill]] %s3836_s12 }
  0x40   :  { %s3846_s29 = sld [smem:[%s4353_s0 + %s3650_s7]]  }
  0x41   :  { %s3851_s20 = sld [smem:[%s4353_s0 + %s3651_s15]]  }
  0x42   :  { %4404 = sst [smem:[#allocation56_spill]] %s3841_s21 }
  0x46   :  { %4405 = sst [smem:[#allocation57_spill]] %s3846_s29 }
  0x47   :  { %4406 = sst [smem:[#allocation58_spill]] %s3851_s20 }
  0x48   :  { %77 = vsyncpa [#allocation3], 0 }
  0x49   :  { %78 = vsyncpa [#allocation6], 0 }
  0x4a   :  { %79 = vsyncpa [#allocation11], 0 }
  0x4b   :  { %80 = vsyncpa [#allocation14], 0 }
  0x4c   :  { %81 = vsyncpa [#allocation17], 0 }
  0x4d   :  { %82 = vsyncpa [#allocation4], 0 }
  0x4e   :  { %84 = vsyncpa [#allocation4 + $0x1], 0 }
  0x4f   :  { %85 = vsyncpa [#allocation20], 0 }
  0x50   :  { %87 = vsyncpa [#allocation20 + $0x1], 0  ;;  %s3853_s22 = smov 0   ;;  %s3855_s23 = smov 0  }
  0x51   :  { %s3857_s26 = smov 0   ;;  %s3859_s28 = smov 0  }
  0x52 LB: > { %s4407_s3 = sld [smem:[#allocation35_spill]]  ;;  %s3877_s1 = sadd.s32 4294967295, %s3615_s28   ;;  %s3607_s23 = sphi %s3855_s23, %s4476_s23   ;;  %s3603_s22 = sphi %s3853_s22, %s4475_s22   ;;  %s3615_s28 = sphi %s3859_s28, %s4472_s28   ;;  %s3611_s26 = sphi %s3857_s26, %s4474_s26  }
  0x53   : > { %s4408_s4 = sld [smem:[#allocation41_spill]]  ;;  %p2739_p0 = scmp.ge.s32.totalorder %s3615_s28, 1 }
  0x54   : > { %s4409_s27 = sld [smem:[#allocation40_spill]]  ;;  %p4373_p1 = scmp.eq.s32.totalorder %s3877_s1, 0 }
  0x55   : > { %s4410_s24 = sld [smem:[#allocation36_spill]]  ;;  %p894_p2 = scmp.lt.s32.totalorder %s3615_s28, 3 }
  0x56   : > { %s4411_s17 = sld [smem:[#allocation32_spill]]  ;;  %s3652_s7 = smov [#allocation2]  }
  0x57   : > { %s4412_s9 = sld [smem:[#allocation31_spill]]  ;;  %p3882_p3 = pnand %p2739_p0, %p894_p2 }
  0x58   : > { %4413 = sst [smem:[#allocation59_spill]] %s3603_s22  ;;  %s908_s10 = sshll.u32 %s3652_s7, 4  ;;  %s909_s10 = int_to_ptr.vmem [resolvable:$true] %s908_s10 }
  0x59   : > { %4414 = sst [smem:[#allocation60_spill]] %s3611_s26  ;;  %p3000_p5 = pneg %p3882_p3 }
  0x5a   : > { %s3653_s16 = smov [#allocation5]  }
  0x5b   : > { %p3894_p6 = pnand %p3000_p5, %p4373_p1  ;;  %s3898_s18 = sshll.u32 %s3653_s16, 4 }
  0x5c   : > { %s918_s11 = sshll.u32 %s4411_s17, 4  ;;  %4417 = sst [smem:[#allocation61_spill]] %s3898_s18  ;;  %s3890_s11 = int_to_ptr.hbm [resolvable:$true] %s918_s11 }
  0x5d   : > { %s906_s0 = sshll.u32 %s4412_s9, 4  ;;  %s948_s7 = sshll.u32 %s4410_s24, 4  ;;  %s3874_s0 = int_to_ptr.hbm [resolvable:$true] %s906_s0  ;;  %s3902_s7 = int_to_ptr.hbm [resolvable:$true] %s948_s7 }
  0x5e   : > { %s3193_s29 = sshra.s32 %s3874_s0, 4  ;;  %p3907_p8 = pneg %p3894_p6  ;;  %s3194_s29 = int_to_ptr.hbm [resolvable:$true] %s3193_s29 }
  0x5f   : > { %s3195_s20 = scalar_lea.hbm %s3194_s29, 8  ;;  %s3200_s16 = scalar_lea.hbm %s4412_s9, 8 }
  0x60   : > { %p3196_p7 = scmp.ne.s32.totalorder %s3194_s29, %s3195_s20  ;;  %p3201_p11 = scmp.lt.s32.totalorder %s3194_s29, %s4412_s9 }
  0x61   : > { %p3202_p12 = scmp.lt.s32.totalorder %s3200_s16, %s3195_s20 }
  0x62   : > { %p3198_p9 = pnand %p3907_p8, %p3196_p7 }
  0x63   : > { %p3203_p13 = por %p3202_p12, %p3201_p11 }
  0x64   : > { %p3199_p10 = pneg %p3198_p9 }
  0x66   : > { %p3204_p0 = pnand %p3203_p13, %p3199_p10 }
  0x68   : > { %3207 = shalt.err (!%p3204_p0)
}
  0x69   : > { %3003 = dma.hbm_to_vmem [thread:$0]  (!%p3894_p6), %s3874_s0, 128, %s909_s10, [#allocation3]  }
  0x6a   : > { %s3223_s18 = sshra.s32 %s3890_s11, 4  ;;  %s3230_s29 = scalar_lea.hbm %s4411_s17, 4  ;;  %s3224_s18 = int_to_ptr.hbm [resolvable:$true] %s3223_s18 }
  0x6b   : > { %s3225_s12 = scalar_lea.hbm %s3224_s18, 4  ;;  %p3231_p9 = scmp.lt.s32.totalorder %s3224_s18, %s4411_s17 }
  0x6c   : > { %p3226_p2 = scmp.ne.s32.totalorder %s3224_s18, %s3225_s12  ;;  %p3232_p11 = scmp.lt.s32.totalorder %s3230_s29, %s3225_s12 }
  0x6e   : > { %p3228_p5 = pnand %p3226_p2, %p3907_p8  ;;  %p3233_p10 = por %p3232_p11, %p3231_p9 }
  0x70   : > { %p3229_p7 = pneg %p3228_p5 }
  0x72   : > { %p3234_p12 = pnand %p3233_p10, %p3229_p7 }
  0x74   : > { %3237 = shalt.err (!%p3234_p12)
}
  0x75   : > { %s4419_s20 = sld [smem:[#allocation61_spill]]  ;;  %s981_s0 = sshll.u32 %s4409_s27, 4  ;;  %s3929_s0 = int_to_ptr.hbm [resolvable:$true] %s981_s0 }
  0x76   : > { %s3654_s10 = smov [#allocation10]   ;;  %s3253_s12 = sshra.s32 %s3902_s7, 4  ;;  %s3254_s12 = int_to_ptr.hbm [resolvable:$true] %s3253_s12 }
  0x77   : > { %s950_s9 = sshll.u32 %s3654_s10, 4  ;;  %s3255_s18 = scalar_lea.hbm %s3254_s12, 1  ;;  %s951_s9 = int_to_ptr.vmem [resolvable:$true] %s950_s9 }
  0x78   : > { %p3256_p13 = scmp.ne.s32.totalorder %s3254_s12, %s3255_s18  ;;  %s3260_s29 = scalar_lea.hbm %s4410_s24, 1 }
  0x79   : > { %p3261_p5 = scmp.lt.s32.totalorder %s3254_s12, %s4410_s24  ;;  %p3262_p7 = scmp.lt.s32.totalorder %s3260_s29, %s3255_s18 }
  0x7a   : > { %p3258_p0 = pnand %p3256_p13, %p3907_p8 }
  0x7b   : > { %s4420_s16 = int_to_ptr.vmem [resolvable:$true] %s4419_s20  ;;  %p3263_p9 = por %p3262_p7, %p3261_p5 }
  0x7c   : > { %3006 = dma.hbm_to_vmem [thread:$0]  (!%p3894_p6), %s3890_s11, 64, %s4420_s16, [#allocation6]  }
  0x7d   : > { %p3259_p2 = pneg %p3258_p0 }
  0x7f   : > { %p3264_p11 = pnand %p3263_p9, %p3259_p2 }
  0x81   : > { %3267 = shalt.err (!%p3264_p11)
}
  0x82   : > { %3012 = dma.hbm_to_vmem [thread:$0]  (!%p3894_p6), %s3902_s7, 16, %s951_s9, [#allocation11]  }
  0x83   : > { %s3655_s11 = smov [#allocation13]   ;;  %s3283_s16 = sshra.s32 %s3929_s0, 4  ;;  %s3284_s16 = int_to_ptr.hbm [resolvable:$true] %s3283_s16 }
  0x84   : > { %s983_s20 = sshll.u32 %s3655_s11, 4  ;;  %s3285_s10 = scalar_lea.hbm %s3284_s16, 1  ;;  %s984_s20 = int_to_ptr.vmem [resolvable:$true] %s983_s20 }
  0x85   : > { %p3286_p10 = scmp.ne.s32.totalorder %s3284_s16, %s3285_s10  ;;  %s3290_s12 = scalar_lea.hbm %s4409_s27, 1 }
  0x86   : > { %p3291_p0 = scmp.lt.s32.totalorder %s3284_s16, %s4409_s27  ;;  %p3292_p2 = scmp.lt.s32.totalorder %s3290_s12, %s3285_s10 }
  0x87   : > { %p3288_p12 = pnand %p3286_p10, %p3907_p8 }
  0x88   : > { %p3293_p5 = por %p3292_p2, %p3291_p0 }
  0x89   : > { %p3289_p13 = pneg %p3288_p12 }
  0x8b   : > { %p3294_p7 = pnand %p3293_p5, %p3289_p13 }
  0x8d   : > { %3297 = shalt.err (!%p3294_p7)
}
  0x8e   : > { %3018 = dma.hbm_to_vmem [thread:$0]  (!%p3894_p6), %s3929_s0, 16, %s984_s20, [#allocation14]  }
  0x8f   : > { %s2738_s9 = sadd.s32 4294967294, %s3615_s28   ;;  %s3949_s7 = sadd.s32 1, %s3615_s28  }
  0x90   : > { %4421 = sst [smem:[#allocation62_spill]] %s3949_s7  ;;  %s217_s18 = ssub.s32 %s3615_s28, %s3949_s7 }
  0x91   : > { %s220_s29 = sadd.s32 1, %s3611_s26  ;;  %p218_p9 = scmp.eq.s32.totalorder %s217_s18, 0 }
  0x92   : > { %p227_p11 = scmp.ne.s32.totalorder %s3611_s26, %s3607_s23  ;;  %p228_p10 = scmp.eq.s32.totalorder %s3615_s28, 0 }
  0x93   : > { %p233_p12 = scmp.ne.s32.totalorder %s3607_s23, %s3603_s22  ;;  %p855_p2 = scmp.eq.s32.totalorder %s3877_s1, 1 }
  0x94   : > { %s3960_s11 = scalar_select %p218_p9, %s3611_s26, %s220_s29  }
  0x95   : > { %p3962_p13 = por %p228_p10, %p227_p11  ;;  %p3968_p0 = por %p4373_p1, %p233_p12 }
  0x96   : > { %4422 = sst [smem:[#allocation63_spill]] %s3960_s11  ;;  %p861_p5 = scmp.eq.s32.totalorder %s2738_s9, 1 }
  0x97   : > { %p3047_p7 = scmp.lt.s32.totalorder %s3615_s28, 2  ;;  %s1087_s20 = sand.u32 1, %s3615_s28  }
  0x98   : > { %p3975_p4 = por %p855_p2, %p227_p11  ;;  %p3979_p9 = por %p861_p5, %p233_p12 }
  0x99   : > { %s1089_s18 = sand.u32 1, %s3611_s26   ;;  %s4371_s17 = sshll.u32 %s3615_s28, 2 }
  0x9a   : > { %s4426_s12 = scalar_select %p3979_p9, 1, 0 }
  0x9b   : > { %s3984_s29 = sshll.u32 %s1089_s18, 2  ;;  %s1095_s24 = scalar_lea.hbm %s3701_s25, %s4371_s17 }
  0x9c   : > { %4427 = sst [smem:[#allocation61_spill]] %s4426_s12  ;;  %s1097_s27 = sshll.u32 %s1095_s24, 4  ;;  %s1098_s27 = int_to_ptr.hbm [resolvable:$true] %s1097_s27 }
  0x9d   : > { %s1091_s11 = scalar_lea.vmem [#allocation7], %s3984_s29  ;;  %p3995_p11 = pnand %p3047_p7, %p3962_p13 }
  0x9e   : > { %s1099_s9 = sshll.u32 %s1091_s11, 4  ;;  %s936_s18 = sshll.u32 %s3726_s19, 4  ;;  %s1100_s9 = int_to_ptr.vmem [resolvable:$true] %s1099_s9  ;;  %s4000_s18 = int_to_ptr.hbm [resolvable:$true] %s936_s18 }
  0x9f   : > { %s3656_s26 = smov [#allocation9]   ;;  %s4004_s24 = scalar_lea.sflag [#allocation3], %s1087_s20 }
  0xa0   : > { %s4002_s17 = sshll.u32 %s3656_s26, 4  ;;  %s3313_s11 = sshra.s32 %s1098_s27, 4  ;;  %s3314_s11 = int_to_ptr.hbm [resolvable:$true] %s3313_s11  ;;  %s939_s17 = int_to_ptr.vmem [resolvable:$true] %s4002_s17 }
  0xa1   : > { %s3315_s12 = scalar_lea.hbm %s3314_s11, 4  ;;  %p3317_p12 = pneg %p3995_p11 }
  0xa2   : > { %p3316_p10 = scmp.ne.s32.totalorder %s3314_s11, %s3315_s12  ;;  %s3320_s16 = scalar_lea.hbm %s3701_s25, 8 }
  0xa3   : > { %p3321_p5 = scmp.lt.s32.totalorder %s3314_s11, %s3701_s25  ;;  %p3322_p7 = scmp.lt.s32.totalorder %s3320_s16, %s3315_s12 }
  0xa4   : > { %p3318_p13 = pnand %p3317_p12, %p3316_p10 }
  0xa5   : > { %p3323_p1 = por %p3322_p7, %p3321_p5 }
  0xa6   : > { %p3319_p2 = pneg %p3318_p13 }
  0xa8   : > { %p3324_p9 = pnand %p3323_p1, %p3319_p2 }
  0xaa   : > { %3327 = shalt.err (!%p3324_p9)
}
  0xab   : > { %3028 = dma.hbm_to_vmem [thread:$0]  (!%p3995_p11), %s1098_s27, 64, %s1100_s9, %s4004_s24  }
  0xac   : > { %s960_s26 = sshll.u32 %s3736_s30, 4  ;;  %s3343_s20 = sshra.s32 %s4000_s18, 4  ;;  %s3344_s20 = int_to_ptr.hbm [resolvable:$true] %s3343_s20  ;;  %s961_s26 = int_to_ptr.hbm [resolvable:$true] %s960_s26 }
  0xad   : > { %s3345_s22 = scalar_lea.hbm %s3344_s20, 1  ;;  %s3350_s12 = scalar_lea.hbm %s3726_s19, 1 }
  0xae   : > { %p3346_p10 = scmp.ne.s32.totalorder %s3344_s20, %s3345_s22  ;;  %p3351_p9 = scmp.lt.s32.totalorder %s3344_s20, %s3726_s19 }
  0xaf   : > { %p3352_p2 = scmp.lt.s32.totalorder %s3350_s12, %s3345_s22 }
  0xb0   : > { %p3348_p13 = pnand %p3346_p10, %p3907_p8 }
  0xb1   : > { %p3353_p5 = por %p3352_p2, %p3351_p9 }
  0xb2   : > { %p3349_p1 = pneg %p3348_p13 }
  0xb4   : > { %p3354_p7 = pnand %p3353_p5, %p3349_p1 }
  0xb6   : > { %3357 = shalt.err (!%p3354_p7)
}
  0xb7   : > { %3009 = dma.hbm_to_vmem [thread:$0]  (!%p3894_p6), %s4000_s18, 16, %s939_s17, [#allocation6]  }
  0xb8   : > { %s3657_s27 = smov [#allocation12]   ;;  %s993_s11 = sshll.u32 %s4408_s4, 4  ;;  %s4027_s11 = int_to_ptr.hbm [resolvable:$true] %s993_s11 }
  0xb9   : > { %s962_s9 = sshll.u32 %s3657_s27, 4  ;;  %s3373_s16 = sshra.s32 %s961_s26, 4  ;;  %s963_s9 = int_to_ptr.vmem [resolvable:$true] %s962_s9  ;;  %s3374_s16 = int_to_ptr.hbm [resolvable:$true] %s3373_s16 }
  0xba   : > { %s3375_s22 = scalar_lea.hbm %s3374_s16, 1  ;;  %s3380_s20 = scalar_lea.hbm %s3736_s30, 1 }
  0xbb   : > { %p3376_p10 = scmp.ne.s32.totalorder %s3374_s16, %s3375_s22  ;;  %p3381_p9 = scmp.lt.s32.totalorder %s3374_s16, %s3736_s30 }
  0xbc   : > { %p3382_p2 = scmp.lt.s32.totalorder %s3380_s20, %s3375_s22 }
  0xbd   : > { %p3378_p13 = pnand %p3376_p10, %p3907_p8 }
  0xbe   : > { %p3383_p5 = por %p3382_p2, %p3381_p9 }
  0xbf   : > { %p3379_p1 = pneg %p3378_p13 }
  0xc1   : > { %p3384_p7 = pnand %p3383_p5, %p3379_p1 }
  0xc3   : > { %3387 = shalt.err (!%p3384_p7)
}
  0xc4   : > { %3015 = dma.hbm_to_vmem [thread:$0]  (!%p3894_p6), %s961_s26, 16, %s963_s9, [#allocation11]  }
  0xc5   : > { %s1034_s17 = sshll.u32 %s3816_s6, 4  ;;  %s3658_s18 = smov [#allocation15]   ;;  %s4036_s17 = int_to_ptr.hbm [resolvable:$true] %s1034_s17 }
  0xc6   : > { %s995_s12 = sshll.u32 %s3658_s18, 4  ;;  %s3403_s27 = sshra.s32 %s4027_s11, 4  ;;  %s996_s12 = int_to_ptr.vmem [resolvable:$true] %s995_s12  ;;  %s3404_s27 = int_to_ptr.hbm [resolvable:$true] %s3403_s27 }
  0xc7   : > { %s3405_s16 = scalar_lea.hbm %s3404_s27, 1  ;;  %s3410_s22 = scalar_lea.hbm %s4408_s4, 1 }
  0xc8   : > { %p3406_p10 = scmp.ne.s32.totalorder %s3404_s27, %s3405_s16  ;;  %p3411_p9 = scmp.lt.s32.totalorder %s3404_s27, %s4408_s4 }
  0xc9   : > { %p3412_p2 = scmp.lt.s32.totalorder %s3410_s22, %s3405_s16 }
  0xca   : > { %p3408_p13 = pnand %p3406_p10, %p3907_p8 }
  0xcb   : > { %p3413_p5 = por %p3412_p2, %p3411_p9 }
  0xcc   : > { %p3409_p1 = pneg %p3408_p13 }
  0xce   : > { %p3414_p7 = pnand %p3413_p5, %p3409_p1 }
  0xd0   : > { %3417 = shalt.err (!%p3414_p7)
}
  0xd1   : > { %3021 = dma.hbm_to_vmem [thread:$0]  (!%p3894_p6), %s4027_s11, 16, %s996_s12, [#allocation14]  }
  0xd2   : > { %s3659_s26 = smov [#allocation16]   ;;  %s3433_s20 = sshra.s32 %s4036_s17, 4  ;;  %s3434_s20 = int_to_ptr.hbm [resolvable:$true] %s3433_s20 }
  0xd3   : > { %s1036_s9 = sshll.u32 %s3659_s26, 4  ;;  %s3435_s18 = scalar_lea.hbm %s3434_s20, 16  ;;  %s1037_s9 = int_to_ptr.vmem [resolvable:$true] %s1036_s9 }
  0xd4   : > { %p3436_p10 = scmp.ne.s32.totalorder %s3434_s20, %s3435_s18  ;;  %s3440_s27 = scalar_lea.hbm %s3816_s6, 16 }
  0xd5   : > { %p3441_p1 = scmp.lt.s32.totalorder %s3434_s20, %s3816_s6  ;;  %p3442_p2 = scmp.lt.s32.totalorder %s3440_s27, %s3435_s18 }
  0xd6   : > { %p3438_p13 = pnand %p3436_p10, %p3907_p8 }
  0xd7   : > { %p3443_p5 = por %p3442_p2, %p3441_p1 }
  0xd8   : > { %p3439_p9 = pneg %p3438_p13 }
  0xda   : > { %p3444_p7 = pnand %p3443_p5, %p3439_p9 }
  0xdc   : > { %3447 = shalt.err (!%p3444_p7)
}
  0xdd   : > { %s3660_s16 = smov 64   ;;  %s3661_s11 = smov 4  }
  0xde   : > { %3024 = dma.hbm_to_vmem [thread:$0]  (!%p3894_p6), %s4036_s17, 256, %s1037_s9, [#allocation17], %s3660_s16, %s3660_s16, %s3661_s11  }
  0xdf   : > { %s4429_s21 = sshll.u32 %s3615_s28, 2  ;;  %s1117_s26 = scalar_lea.vmem [#allocation8], %s3984_s29 }
  0xe0   : > { %s1121_s12 = scalar_lea.hbm %s4407_s3, %s4429_s21  ;;  %s1125_s20 = sshll.u32 %s1117_s26, 4  ;;  %s1126_s20 = int_to_ptr.vmem [resolvable:$true] %s1125_s20 }
  0xe1   : > { %s1123_s22 = sshll.u32 %s1121_s12, 4  ;;  %s3470_s4 = scalar_lea.hbm %s4407_s3, 8  ;;  %s1124_s22 = int_to_ptr.hbm [resolvable:$true] %s1123_s22 }
  0xe2   : > { %s3463_s18 = sshra.s32 %s1124_s22, 4  ;;  %s3464_s18 = int_to_ptr.hbm [resolvable:$true] %s3463_s18 }
  0xe3   : > { %s3465_s27 = scalar_lea.hbm %s3464_s18, 4  ;;  %p3471_p9 = scmp.lt.s32.totalorder %s3464_s18, %s4407_s3 }
  0xe4   : > { %p3466_p8 = scmp.ne.s32.totalorder %s3464_s18, %s3465_s27  ;;  %p3472_p1 = scmp.lt.s32.totalorder %s3470_s4, %s3465_s27 }
  0xe6   : > { %p3468_p10 = pnand %p3466_p8, %p3317_p12  ;;  %p3473_p2 = por %p3472_p1, %p3471_p9 }
  0xe8   : > { %p3469_p13 = pneg %p3468_p10 }
  0xea   : > { %p3474_p6 = pnand %p3473_p2, %p3469_p13 }
  0xec   : > { %3477 = shalt.err (!%p3474_p6)
}
  0xed   : > { %3031 = dma.hbm_to_vmem [thread:$0]  (!%p3995_p11), %s1124_s22, 64, %s1126_s20, %s4004_s24  }
  0xee   : > { %1134 = sbr.rel (%p3882_p3) target bundleno = 4672 (0x1240), region = 156  ;;  %p4430_p5 = scmp.eq.s32.totalorder (!%p3882_p3), %s3877_s1, 0 }
  0xf3   : > { %3566 = dma.done.wait (%p4430_p5), [#allocation3], 128   ;;  %p4431_p7 = pmov %p4430_p5 }
  0xf4   : > { %p4432_p12 = pmov %p4430_p5 }
  0xf5   : > { %3568 = vsyncadd (%p4431_p7), [#allocation3], 4294967168 }
  0xf6   : > { %3570 = dma.done.wait (%p4432_p12), [#allocation6], 64   ;;  %p4433_p8 = pmov %p4430_p5 }
  0xf7   : > { %s1146_s4 = sand.u32 1, %s3877_s1   ;;  %s4078_s15 = sand.u32 1, %s3607_s23  }
  0xf8   : > { %3572 = vsyncadd (%p4433_p8), [#allocation6], 4294967232  ;;  %s2756_s2 = sshll.u32 %s4078_s15, 2  ;;  %s1147_s7 = scalar_lea.sflag [#allocation3], %s1146_s4 }
  0xf9   : > { %s4081_s29 = scalar_lea.vmem [#allocation7], %s2756_s2 }
  0xfa   : > { %3574 = dma.done.wait (%p3968_p0), %s1147_s7, 128  }
  0xfb   : > { %3576 = vsyncadd (%p3968_p0), %s1147_s7, 4294967168  ;;  %s4087_s24 = scalar_lea.vmem [#allocation8], %s2756_s2  ;;  %p4434_p3 = pmov %p4430_p5 }
  0xfd   : > { %3578 = dma.done.wait (%p4434_p3), [#allocation6], 16   ;;  %p4435_p11 = pmov %p4434_p3 }
  0xfe   : > { %p4436_p10 = pmov %p4434_p3 }
  0xff   : > { %3580 = vsyncadd (%p4435_p11), [#allocation6], 4294967280 }
 0x100   : > { %3582 = dma.done.wait (%p4436_p10), [#allocation11], 32   ;;  %p4437_p13 = pmov %p4434_p3 }
 0x101   : > { %p4438_p9 = pmov %p4434_p3 }
 0x102   : > { %3584 = vsyncadd (%p4437_p13), [#allocation11], 4294967264 }
 0x103   : > { %3586 = dma.done.wait (%p4438_p9), [#allocation14], 32   ;;  %p4439_p1 = pmov %p4434_p3 }
 0x105   : > { %3588 = vsyncadd (%p4439_p1), [#allocation14], 4294967264  ;;  %p4440_p0 = pmov %p4439_p1 }
 0x107   : > { %3590 = dma.done.wait (%p4440_p0), [#allocation17], 256   ;;  %p4441_p2 = pmov %p4440_p0 }
 0x108   : > { %s4442_s5 = sld [smem:[#allocation30_spill]]  ;;  %p1305_p6 = scmp.lt.s32.totalorder %s3877_s1, 1  ;;  %v2781_v0 = vld [vmem:[%s3716_s8 + $0x10] sm:$0xf]  ;;  %v2933_v1 = vld [vmem:[%s3716_s8 + $0x14] sm:$0xf0] }
 0x109   : > { %3592 = vsyncadd (%p4441_p2), [#allocation17], 4294967040  ;;  %v2932_v2 = vld [vmem:[%s3716_s8 + $0x14] sm:$0xf]  ;;  %v2782_v3 = vor.u32 %v2933_v1, %v2781_v0  ;;  %v2783_v4 = vld [vmem:[%s3716_s8 + $0x18] sm:$0xf0] }
 0x10a   : > { %s4107_s0 = scalar_select %p1305_p6, %s3877_s1, 1  ;;  %v2773_v5 = vld [vmem:[%s3716_s8] sm:$0xf]  ;;  %v2931_v6 = vld [vmem:[%s3716_s8 + $0x4] sm:$0xf0]  ;;  %v2786_v7 = vor.u32 %v2932_v2, %v2783_v4  ;;  %vm1358_vm0 = vcmask 261120  }
 0x10b   : > { %v2930_v8 = vld [vmem:[%s3716_s8 + $0x4] sm:$0xf]  ;;  %v2775_v9 = vld [vmem:[%s3716_s8 + $0x8] sm:$0xf0]  ;;  %1368 = vmatpush.bf16.msra.mxu0 %v2782_v3  ;;  %v2774_v11 = vor.u32 %v2931_v6, %v2773_v5  ;;  %vm1448_vm1 = vcmask 1043456   ;;  %s3662_s16 = smov 96  }
 0x10c   : > { %s4110_s17 = sshll.u32 %s4107_s0, 3  ;;  %v1324_v12 = vld [vmem:[#allocation2] sm:$0xff]  ;;  %1381 = vmatpush.bf16.msra.mxu1 %v2786_v7  ;;  %v2778_v13 = vor.u32 %v2930_v8, %v2775_v9  ;;  %s3663_s11 = smov 64   ;;  %v1327_v28 = vld [vmem:[#allocation5] sm:$0xf]  ;;  %vm1428_vm2 = vcmask 64512  }
 0x10d   : > { %v1328_v31 = vunpack.c.l.bf16 %v1327_v28  ;;  %s3664_s21 = smov 32   ;;  %v2935_v44 = vld [vmem:[%s3721_s14 + $0x8] sm:$0xff]  ;;  %v2934_v51 = vld [vmem:[%s3721_s14] sm:$0xff]  ;;  %v2937_v7 = vld [vmem:[%s3721_s14 + $0x18] sm:$0xff]  ;;  %s1312_s12 = scalar_lea.vmem %s3686_s13, %s4110_s17  ;;  %vm1812_vm10 = vcmask 130048  }
 0x10e   : > { %s1308_s9 = scalar_lea.vmem %s4442_s5, %s4110_s17  ;;  %s4443_s22 = sld [smem:[#allocation38_spill]] }
 0x10f   : > { %v1323_v10 = vld [vmem:[%s1308_s9] sm:$0xff]  ;;  %1369 = vmatpush.bf16.msra.mxu0 %v2774_v11  ;;  %s4445_s26 = sld [smem:[#allocation33_spill]]  ;;  %s2929_s2 = sshll.u32 %s4107_s0, 4 }
 0x110   : > { %v4122_v14 = vadd.f32 %v1324_v12, %v1323_v10  ;;  %1382 = vmatpush.bf16.msra.mxu1 %v2778_v13  ;;  %v2936_v13 = vld [vmem:[%s3721_s14 + $0x10] sm:$0xff]  ;;  %s4446_s18 = sld [smem:[#allocation43_spill]] }
 0x111   : > { %s4447_s27 = sld [smem:[#allocation37_spill]] }
 0x112   : > { %v1337_v15 = vpack.c.bf16 %v4122_v14, %v4122_v14  ;;  %s4448_s4 = sld [smem:[#allocation34_spill]] }
 0x113   : > { %s4449_s0 = sld [smem:[#allocation53_spill]] }
 0x114   : > { %2787 = vmatmul.msk.bf16.vlgmr.msra.gmra.mxu0 %vm1358_vm0, %v1337_v15  ;;  %2788 = vmatmul.msk.bf16.vlgmr.msra.gmra.mxu1 %vm1358_vm0, %v1337_v15  ;;  %s4444_s20 = smov %s4443_s22 }
 0x115   : > { %1550 = vmatpush.bf16.msrb.mxu1 %v2937_v7  ;;  %s1317_s7 = scalar_lea.vmem %s4445_s26, %s2929_s2  ;;  %s4454_s26 = sld [smem:[#allocation46_spill]] }
 0x116   : > { %s4456_s2 = sld [smem:[#allocation42_spill]] }
 0x118   : > { %s1321_s9 = scalar_lea.vmem %s4448_s4, %s4110_s17  ;;  %s4376_s17 = sshll.u32 %s4078_s15, 3 }
 0x119   : > { %1551 = vmatpush.bf16.msrb.mxu1 %v2936_v13  ;;  %v1738_v7 = vld [vmem:[%s1321_s9] sm:$0xff]  ;;  %s4455_s4 = sld [smem:[#allocation47_spill]] }
 0x11a   : > { %s4458_s9 = sld [smem:[#allocation49_spill]] }
 0x191   : > { %v1371_v16 = vpop.f32.mrf.mxu0  ;;  %v1384_v17 = vpop.f32.mrf.mxu1 }
 0x192   : > { %v1388_v18 = vpack.c.bf16 %v1384_v17, %v1371_v16 }
 0x194   : > { %v1401_v19 = vunpack.c.l.b16 %v1388_v18  ;;  %v1443_v20 = vunpack.c.h.b16 %v1388_v18 }
 0x196   : > { %v1402_v21 = vpack.c.b16 %v1401_v19, %v1401_v19  ;;  %v1444_v22 = vpack.c.b16 %v1443_v20, %v1443_v20 }
 0x198   : > { %1466 = vrot.lane.b32.xlu2 %v1402_v21, %s3662_s16  ;;  %1403 = vrot.lane.b32.xlu0 %v1402_v21, %s3663_s11  ;;  %v1450_v24 = vsel %vm1448_vm1, %v1444_v22, 0 }
 0x199   : > { %v1373_v23 = vpop.f32.mrf.mxu0  ;;  %v1386_v25 = vpop.f32.mrf.mxu1  ;;  %1459 = vmatpush.bf16.msra.mxu3 %v1450_v24 }
 0x19a   : > { %v3665_v25 = vmov 32.0  }
 0x1f2   : > { %v1467_v50 = vpop.permute.xlu2 %1466 }
 0x20a   : > { %v1404_v26 = vpop.permute.xlu0 %1403 }
 0x20b   : > { %v1409_v27 = vsel %vm1358_vm0, %v1404_v26, 0  ;;  %v3666_v26 = vmov 0  }
 0x20c   : > { %1418 = vmatpush.bf16.xpose.msra.mxu2 %v1409_v27  ;;  %3140 = vset.pattern.permute.xlu0 %v3666_v26 }
 0x213   : > { %2789 = vmatmul.msk.bf16.vlgmr.msra.gmra.mxu2 %vm1358_vm0, %v1388_v18  ;;  %v3141_v18 = vld [vmem:[#allocation9] ss:$0 sm:$0xff] }
 0x214   : > { %1578 = vmatpush.bf16.msrb.mxu2 %v2935_v44 }
 0x218   : > { %1579 = vmatpush.bf16.msrb.mxu2 %v2934_v51  ;;  %v3143_v51 = vld [vmem:[#allocation12] ss:$0 sm:$0xff] }
 0x296   : > { %v1420_v29 = vpop.f32.mrf.mxu2 }
 0x297   : > { %v1424_v30 = vmul.f32 0.17677669, %v1420_v29 }
 0x299   : > { %v2790_v32 = vclamps-f32 %v1424_v30, 15.0 }
 0x29b   : > { %v1427_v33 = vmul.f32 %v2790_v32, %v1328_v31 }
 0x29d   : > { %v1429_v34 = vsel %vm1428_vm2, %v1427_v33, -inf }
 0x29e   : > { %1430 = vmax.xlane.f32.xlu0 %v1429_v34  ;;  %v1422_v35 = vpop.f32.mrf.mxu2 }
 0x311   : > { %v1431_v36 = vpop.xlane.xlu0 %1430 }
 0x312   : > { %v1432_v37 = vsub.f32 %v1427_v33, %v1431_v36 }
 0x314   : > { %v1433_v38 = vmul.f32 1.442695, %v1432_v37 }
 0x316   : > { %3157 = vpow2.f32 %v1433_v38  ;;  %v1326_v38 = vld [vmem:[%s1312_s12] sm:$0xff]  ;;  %s4450_s12 = sld [smem:[#allocation54_spill]] }
 0x31c   : > { %v3158_v39 = vpop.eup %3157 }
 0x31d   : > { %v1435_v40 = vmul.f32 %v3158_v39, %v1328_v31 }
 0x31f   : > { %v1436_v41 = vsel %vm1428_vm2, %v1435_v40, 0.0 }
 0x320   : > { %1437 = vadd.xlane.f32.xlu1 %v1436_v41 }
 0x339   : > { %1468 = vrot.lane.b32.xlu1 %v1402_v21, %s3664_s21 }
 0x393   : > { %v1438_v42 = vpop.xlane.xlu1 %1437 }
 0x394   : > { %v1439_v43 = vadd.f32 1e-06, %v1438_v42 }
 0x396   : > { %3159 = vrcp.f32 %v1439_v43 }
 0x39c   : > { %v3160_v45 = vpop.eup %3159 }
 0x39d   : > { %v1441_v46 = vmul.f32 %v3160_v45, %v1435_v40 }
 0x39f   : > { %v1442_v47 = vpack.c.bf16 %v1441_v46, %v1441_v46 }
 0x3a1   : > { %2791 = vmatmul.msk.bf16.vlgmr.msra.gmra.mxu3 %vm1428_vm2, %v1442_v47 }
 0x3ab   : > { %v1469_v48 = vpop.permute.xlu1 %1468 }
 0x3ac   : > { %v1474_v49 = vsel %vm1358_vm0, %v1469_v48, 0  ;;  %v3142_v48 = vld [vmem:[#allocation10] ss:$0 sm:$0xff] }
 0x3ad   : > { %1483 = vmatpush.bf16.xpose.msrb.mxu3 %v1474_v49 }
 0x3b4   : > { %2792 = vmatmul.msk.bf16.vlgmr.msrb.gmra.mxu3 %vm1358_vm0, %v1467_v50 }
 0x424   : > { %v1461_v52 = vpop.f32.mrf.mxu3 }
 0x425   : > { %v1465_v53 = vpack.c.bf16 %v1461_v52, %v1461_v52 }
 0x427   : > { %2812 = vmatmul.msk.bf16.vlgmr.msrb.gmra.mxu2 %vm1358_vm0, %v1465_v53 }
 0x42c   : > { %v1463_v54 = vpop.f32.mrf.mxu3 }
 0x437   : > { %v1485_v55 = vpop.f32.mrf.mxu3 }
 0x438   : > { %v1489_v56 = vmul.f32 0.17677669, %v1485_v55 }
 0x43a   : > { %v2793_v57 = vclamps-f32 %v1489_v56, 15.0 }
 0x43c   : > { %v1492_v58 = vmul.f32 %v2793_v57, %v1328_v31 }
 0x43e   : > { %v1493_v59 = vsel %vm1428_vm2, %v1492_v58, -inf }
 0x43f   : > { %1494 = vmax.xlane.f32.xlu2 %v1493_v59  ;;  %v1487_v60 = vpop.f32.mrf.mxu3 }
 0x457   : > { %1507 = vrot.lane.b32.xlu2 %v1444_v22, %s3662_s16 }
 0x4aa   : > { %v1581_v61 = vpop.f32.mrf.mxu2 }
 0x4b2   : > { %v1495_v62 = vpop.xlane.xlu2 %1494  ;;  %v1583_v63 = vpop.f32.mrf.mxu2 }
 0x4b3   : > { %v1496_v0 = vsub.f32 %v1492_v58, %v1495_v62  ;;  %v2940_v63 = vld [vmem:[%s4444_s20] sm:$0xff] }
 0x4b5   : > { %v1497_v1 = vmul.f32 1.442695, %v1496_v0  ;;  %v1700_v0 = vld [vmem:[%s1317_s7] sm:$0xff] }
 0x4b7   : > { %3161 = vpow2.f32 %v1497_v1  ;;  %v1701_v1 = vld [vmem:[%s1317_s7 + $0x8] sm:$0xff]  ;;  %s4457_s7 = sld [smem:[#allocation48_spill]] }
 0x4ba   : > { %v1508_v2 = vpop.permute.xlu2 %1507 }
 0x4bb   : > { %v1513_v3 = vsel %vm1448_vm1, %v1508_v2, 0  ;;  %v1706_v2 = vpack.c.bf16 %v1701_v1, %v1700_v0 }
 0x4bc   : > { %1522 = vmatpush.bf16.msrb.mxu0 %v1513_v3  ;;  %v2943_v3 = vld [vmem:[%s4446_s18 + $0x8] sm:$0xff] }
 0x4bd   : > { %v3162_v4 = vpop.eup %3161  ;;  %1765 = vmatpush.bf16.msra.mxu1 %v2943_v3 }
 0x4be   : > { %v1499_v5 = vmul.f32 %v3162_v4, %v1328_v31  ;;  %v2939_v4 = vld [vmem:[%s4447_s27 + $0x8] sm:$0xff] }
 0x4bf   : > { %1692 = vmatpush.bf16.msra.mxu3 %v2939_v4 }
 0x4c0   : > { %v1500_v6 = vsel %vm1428_vm2, %v1499_v5, 0.0 }
 0x4c1   : > { %1501 = vadd.xlane.f32.xlu1 %v1500_v6  ;;  %v2938_v6 = vld [vmem:[%s4447_s27] sm:$0xff] }
 0x4c3   : > { %1693 = vmatpush.bf16.msra.mxu3 %v2938_v6 }
 0x534   : > { %v1502_v8 = vpop.xlane.xlu1 %1501 }
 0x535   : > { %v1503_v9 = vadd.f32 1e-06, %v1502_v8  ;;  %v1743_v8 = vpack.c.bf16 %v1738_v7, %v1738_v7 }
 0x537   : > { %3163 = vrcp.f32 %v1503_v9 }
 0x538   : > { %3165 = vrcp.f32 %v3665_v25 }
 0x53d   : > { %v3164_v10 = vpop.eup %3163 }
 0x53e   : > { %v1505_v11 = vmul.f32 %v3164_v10, %v1499_v5  ;;  %v3166_v27 = vpop.eup %3165  ;;  %v2942_v5 = vld [vmem:[%s4446_s18] sm:$0xff] }
 0x53f   : > { %v1594_v28 = vmul.f32 32.0, %v3166_v27  ;;  %vm1598_vm3 = vweird.f32 %v3166_v27  ;;  %1766 = vmatpush.bf16.msra.mxu1 %v2942_v5 }
 0x540   : > { %v1506_v12 = vpack.c.bf16 %v1505_v11, %v1505_v11 }
 0x541   : > { %v1595_v29 = vsub.f32 1.0, %v1594_v28 }
 0x542   : > { %2794 = vmatmul.msk.bf16.vlgmr.msrb.gmra.mxu0 %vm1428_vm2, %v1506_v12 }
 0x543   : > { %v1596_v30 = vmul.f32 %v3166_v27, %v1595_v29 }
 0x545   : > { %v1597_v31 = vadd.f32 %v3166_v27, %v1596_v30 }
 0x547   : > { %v4152_v32 = vsel %vm1598_vm3, %v3166_v27, %v1597_v31  ;;  %vm1895_vm3 = vcmask 261248  }
 0x5bf   : > { %v1524_v15 = vpop.f32.mrf.mxu0 }
 0x5c0   : > { %v1528_v16 = vpack.c.bf16 %v1524_v15, %v1524_v15 }
 0x5c2   : > { %2803 = vmatmul.msk.bf16.vlgmr.msrb.gmra.mxu1 %vm1358_vm0, %v1528_v16 }
 0x5c7   : > { %v1526_v17 = vpop.f32.mrf.mxu0 }
 0x5d2   : > { %2839 = vmatmul.msk.bf16.vlgmr.msra.gmra.mxu1 %vm1358_vm0, %v1743_v8 }
 0x63f   : > { %v1553_v19 = vpop.f32.mrf.mxu1 }
 0x640   : > { %v1582_v20 = vadd.f32 %v1581_v61, %v1553_v19  ;;  %v3144_v19 = vld [vmem:[%s4449_s0] ss:$0 sm:$0xff]  ;;  %s3667_s0 = smov 16  }
 0x642   : > { %v1588_v21 = vadd.f32 %v3141_v18, %v1582_v20 }
 0x644   : > { %v1589_v22 = vadd.f32 %v1588_v21, %v4122_v14  ;;  %v3145_v21 = vld [vmem:[%s4450_s12] ss:$0 sm:$0xff]  ;;  %s4460_s12 = sld [smem:[#allocation55_spill]] }
 0x646   : > { %v1590_v23 = vsel %vm1358_vm0, %v1589_v22, 0.0 }
 0x647   : > { %1591 = vadd.xlane.f32.xlu0 %v1590_v23  ;;  %v1555_v24 = vpop.f32.mrf.mxu1 }
 0x6ba   : > { %v1592_v33 = vpop.xlane.xlu0 %1591 }
 0x6bb   : > { %v1600_v34 = vmul.f32 %v4152_v32, %v1592_v33 }
 0x6bd   : > { %v1601_v35 = vsub.f32 %v1589_v22, %v1600_v34 }
 0x6bf   : > { %v1602_v36 = vmul.f32 %v1601_v35, %v1601_v35 }
 0x6c1   : > { %v1603_v37 = vsel %vm1358_vm0, %v1602_v36, 0.0 }
 0x6c2   : > { %1604 = vadd.xlane.f32.xlu0 %v1603_v37 }
 0x6d6   : > { %1629 = vperm.xlu0 %3140, %v1326_v38  }
 0x735   : > { %v1605_v39 = vpop.xlane.xlu0 %1604 }
 0x736   : > { %v1606_v40 = vmul.f32 %v1605_v39, %v4152_v32 }
 0x738   : > { %v1607_v41 = vadd.f32 1e-05, %v1606_v40 }
 0x73a   : > { %3167 = vrsqrt.f32 %v1607_v41  ;;  %vm1614_vm5 = vweird.f32 %v1607_v41 }
 0x740   : > { %v3168_v42 = vpop.eup %3167 }
 0x741   : > { %v1609_v43 = vmul.f32 %v3168_v42, %v1607_v41  ;;  %vm1615_vm4 = vweird.f32 %v3168_v42 }
 0x742   : > { %vm1616_vm6 = vmor %vm1614_vm5, %vm1615_vm4 }
 0x743   : > { %v1610_v44 = vmul.f32 %v3168_v42, %v1609_v43 }
 0x745   : > { %v1611_v45 = vmul.f32 0.5, %v1610_v44 }
 0x747   : > { %v1612_v46 = vsub.f32 1.5, %v1611_v45 }
 0x748   : > { %v4159_v53 = vpop.permute.xlu0 %1629 }
 0x749   : > { %v1613_v47 = vmul.f32 %v3168_v42, %v1612_v46 }
 0x74b   : > { %v1617_v49 = vsel %vm1616_vm6, %v3168_v42, %v1613_v47 }
 0x74c   : > { %v1618_v50 = vmul.f32 %v1617_v49, %v1601_v35  ;;  %v1768_v35 = vpop.f32.mrf.mxu1 }
 0x74d   : > { %v1772_v36 = vpack.c.bf16 %v1768_v35, %v1768_v35 }
 0x74e   : > { %v1622_v52 = vmul.f32 %v3142_v48, %v1618_v50  ;;  %v1329_v50 = vld [vmem:[%s4081_s29] sm:$0xf]  ;;  %s4451_s29 = sld [smem:[#allocation39_spill]] }
 0x74f   : > { %v2060_v37 = vunpack.c.l.b16 %v1772_v36  ;;  %v2026_v46 = vsel %vm1358_vm0, %v1772_v36, 0 }
 0x750   : > { %v1626_v54 = vadd.f32 %v3143_v51, %v1622_v52 }
 0x751   : > { %v4201_v38 = vpack.c.b16 %v2060_v37, %v2060_v37 }
 0x752   : > { %v4162_v55 = vmul.f32 %v4159_v53, %v1626_v54  ;;  %v1330_v54 = vunpack.c.l.bf16 %v1329_v50 }
 0x754   : > { %v4166_v56 = vadd.f32 %v4162_v55, %v4122_v14  ;;  %v2941_v14 = vld [vmem:[%s4443_s22 + $0x8] sm:$0xff]  ;;  %v1770_v39 = vpop.f32.mrf.mxu1  ;;  %s4453_s22 = sld [smem:[#allocation45_spill]] }
 0x755   : > { %1728 = vmatpush.bf16.msra.mxu0 %v2941_v14 }
 0x756   : > { %v1636_v57 = vsel %vm1358_vm0, %v4166_v56, 0.0 }
 0x757   : > { %1637 = vadd.xlane.f32.xlu2 %v1636_v57 }
 0x759   : > { %1729 = vmatpush.bf16.msra.mxu0 %v2940_v63 }
 0x75c   : > { %2830 = vmatmul.msk.bf16.vlgmr.msra.gmra.mxu0 %vm1358_vm0, %v1706_v2 }
 0x7ca   : > { %v1638_v58 = vpop.xlane.xlu2 %1637 }
 0x7cb   : > { %v1639_v59 = vmul.f32 %v1638_v58, %v4152_v32 }
 0x7cd   : > { %v1640_v60 = vsub.f32 %v4166_v56, %v1639_v59 }
 0x7cf   : > { %v1641_v61 = vmul.f32 %v1640_v60, %v1640_v60 }
 0x7d1   : > { %v1642_v62 = vsel %vm1358_vm0, %v1641_v61, 0.0 }
 0x7d2   : > { %1643 = vadd.xlane.f32.xlu1 %v1642_v62 }
 0x7d9   : > { %v1731_v26 = vpop.f32.mrf.mxu0 }
 0x7da   : > { %v1736_v27 = vpack.c.bf16 %v1731_v26, %v1731_v26 }
 0x7dc   : > { %v1786_v29 = vunpack.c.l.b16 %v1736_v27 }
 0x7e1   : > { %v1733_v28 = vpop.f32.mrf.mxu0 }
 0x7e2   : > { %v1737_v30 = vpack.c.bf16 %v1733_v28, %v1733_v28 }
 0x7e4   : > { %v1787_v31 = vunpack.c.l.b16 %v1737_v30 }
 0x7e6   : > { %v4193_v33 = vpack.c.b16 %v1787_v31, %v1786_v29  ;;  %v1331_v29 = vld [vmem:[%s4087_s24] sm:$0xf]  ;;  %s4452_s24 = sld [smem:[#allocation44_spill]] }
 0x7e8   : > { %1898 = vrot.lane.b32.xlu2 %v4193_v33, %s3664_s21  ;;  %v1793_v34 = vsel %vm1358_vm0, %v4193_v33, 0 }
 0x7e9   : > { %1802 = vmatpush.bf16.xpose.msra.mxu2 %v1793_v34 }
 0x7eb   : > { %1853 = vrot.lane.b32.xlu1 %v4193_v33, %s3662_s16 }
 0x7f0   : > { %2086 = vrot.lane.b32.xlu2 %v4201_v38, %s3662_s16 }
 0x842   : > { %v1899_v45 = vpop.permute.xlu2 %1898 }
 0x843   : > { %1911 = vmatpush.bf16.msrb.mxu1 %v1899_v45 }
 0x845   : > { %v1644_v9 = vpop.xlane.xlu1 %1643 }
 0x846   : > { %v1645_v10 = vmul.f32 %v1644_v9, %v4152_v32 }
 0x848   : > { %v1646_v11 = vadd.f32 1e-05, %v1645_v10 }
 0x84a   : > { %3169 = vrsqrt.f32 %v1646_v11  ;;  %vm1653_vm8 = vweird.f32 %v1646_v11  ;;  %v2087_v2 = vpop.permute.xlu2 %2086 }
 0x850   : > { %v3170_v12 = vpop.eup %3169 }
 0x851   : > { %v1648_v13 = vmul.f32 %v3170_v12, %v1646_v11  ;;  %vm1654_vm7 = vweird.f32 %v3170_v12 }
 0x852   : > { %vm1655_vm9 = vmor %vm1653_vm8, %vm1654_vm7 }
 0x853   : > { %v1649_v15 = vmul.f32 %v3170_v12, %v1648_v13 }
 0x855   : > { %v1650_v16 = vmul.f32 0.5, %v1649_v15 }
 0x857   : > { %v1651_v17 = vsub.f32 1.5, %v1650_v16 }
 0x859   : > { %v1652_v18 = vmul.f32 %v3170_v12, %v1651_v17 }
 0x85b   : > { %v1656_v20 = vsel %vm1655_vm9, %v3170_v12, %v1652_v18  ;;  %v2947_v18 = vld [vmem:[%s4451_s29 + $0x18] sm:$0xff] }
 0x85c   : > { %v1657_v22 = vmul.f32 %v1656_v20, %v1640_v60  ;;  %1939 = vmatpush.bf16.msrb.mxu2 %v2947_v18 }
 0x85d   : > { %v1854_v47 = vpop.permute.xlu1 %1853 }
 0x85e   : > { %v1661_v23 = vmul.f32 %v3144_v19, %v1657_v22  ;;  %v1859_v48 = vsel %vm1358_vm0, %v1854_v47, 0 }
 0x85f   : > { %1868 = vmatpush.bf16.xpose.msrb.mxu0 %v1859_v48 }
 0x860   : > { %v4188_v24 = vadd.f32 %v3145_v21, %v1661_v23 }
 0x862   : > { %v1670_v25 = vpack.c.bf16 %v4188_v24, %v4188_v24 }
 0x864   : > { %2821 = vmatmul.msk.bf16.vlgmr.msra.gmra.mxu3 %vm1358_vm0, %v1670_v25 }
 0x867   : > { %2035 = vmatpush.bf16.xpose.msra.mxu0 %v2026_v46 }
 0x8e7   : > { %v1695_v40 = vpop.f32.mrf.mxu3 }
 0x8e8   : > { %v1699_v41 = vpack.c.bf16 %v1695_v40, %v1695_v40 }
 0x8ea   : > { %v1849_v42 = vunpack.c.l.b16 %v1699_v41  ;;  %2840 = vmatmul.msk.bf16.vlgmr.msra.gmra.mxu2 %vm1358_vm0, %v1699_v41  ;;  %v2092_v41 = vsel %vm1358_vm0, %v2087_v2, 0 }
 0x8ec   : > { %v1850_v43 = vpack.c.b16 %v1849_v42, %v1849_v42  ;;  %v2946_v42 = vld [vmem:[%s4451_s29 + $0x10] sm:$0xff] }
 0x8ed   : > { %1940 = vmatpush.bf16.msrb.mxu2 %v2946_v42  ;;  %v3147_v42 = vld [vmem:[%s4453_s22] ss:$0 sm:$0xff]  ;;  %s4462_s22 = sld [smem:[#allocation51_spill]] }
 0x8ee   : > { %1851 = vrot.lane.b32.xlu0 %v1850_v43, %s3662_s16  ;;  %2084 = vrot.lane.b32.xlu2 %v1850_v43, %s3664_s21  ;;  %s4232_s16 = scalar_lea.vmem [#allocation19], %s4376_s17 }
 0x8ef   : > { %v1697_v44 = vpop.f32.mrf.mxu3 }
 0x8f0   : > { %v2944_v44 = vld [vmem:[%s4451_s29] sm:$0xff] }
 0x8f1   : > { %2101 = vmatpush.bf16.xpose.msra.mxu2 %v2092_v41 }
 0x948   : > { %v4215_v3 = vpop.permute.xlu2 %2084 }
 0x960   : > { %v1852_v49 = vpop.permute.xlu0 %1851 }
 0x961   : > { %2843 = vmatmul.msk.bf16.vlgmr.msrb.gmra.mxu0 %vm1358_vm0, %v1852_v49 }
 0x96d   : > { %v1804_v51 = vpop.f32.mrf.mxu2 }
 0x96e   : > { %v1808_v52 = vmul.f32 0.17677669, %v1804_v51 }
 0x970   : > { %v2841_v57 = vclamps-f32 %v1808_v52, 15.0 }
 0x972   : > { %v1811_v58 = vmul.f32 %v2841_v57, %v1330_v54 }
 0x974   : > { %v1813_v59 = vsel %vm1812_vm10, %v1811_v58, -inf }
 0x975   : > { %1814 = vmax.xlane.f32.xlu2 %v1813_v59  ;;  %v1806_v60 = vpop.f32.mrf.mxu2 }
 0x9de   : > { %v1870_v61 = vpop.f32.mrf.mxu0 }
 0x9df   : > { %v1874_v62 = vmul.f32 0.17677669, %v1870_v61 }
 0x9e1   : > { %v2844_v14 = vclamps-f32 %v1874_v62, 15.0 }
 0x9e3   : > { %v1877_v63 = vmul.f32 %v2844_v14, %v1330_v54 }
 0x9e5   : > { %v1878_v0 = vsel %vm1812_vm10, %v1877_v63, -inf }
 0x9e6   : > { %1879 = vmax.xlane.f32.xlu1 %v1878_v0  ;;  %v1872_v1 = vpop.f32.mrf.mxu0 }
 0x9e8   : > { %v1815_v4 = vpop.xlane.xlu2 %1814 }
 0x9e9   : > { %v1816_v6 = vsub.f32 %v1811_v58, %v1815_v4 }
 0x9eb   : > { %v1817_v9 = vmul.f32 1.442695, %v1816_v6 }
 0x9ff   : > { %2020 = vrot.lane.b32.xlu1 %v1850_v43, %s3663_s11  ;;  %v2945_v43 = vld [vmem:[%s4451_s29 + $0x8] sm:$0xff] }
 0xa59   : > { %v1880_v5 = vpop.xlane.xlu1 %1879 }
 0xa5a   : > { %v1881_v7 = vsub.f32 %v1877_v63, %v1880_v5 }
 0xa5c   : > { %v1882_v8 = vmul.f32 1.442695, %v1881_v7 }
 0xa5e   : > { %3171 = vpow2.f32 %v1882_v8 }
 0xa5f   : > { %3173 = vpow2.f32 %v1817_v9 }
 0xa64   : > { %v3172_v10 = vpop.eup %3171 }
 0xa65   : > { %v1884_v11 = vmul.f32 %v3172_v10, %v1330_v54  ;;  %v3174_v13 = vpop.eup %3173 }
 0xa66   : > { %v1819_v15 = vmul.f32 %v3174_v13, %v1330_v54 }
 0xa67   : > { %v1885_v12 = vsel %vm1812_vm10, %v1884_v11, 0.0 }
 0xa68   : > { %1886 = vadd.xlane.f32.xlu0 %v1885_v12  ;;  %v1820_v16 = vsel %vm1812_vm10, %v1819_v15, 0.0 }
 0xa70   : > { %1821 = vadd.xlane.f32.xlu0 %v1820_v16 }
 0xa71   : > { %v2021_v17 = vpop.permute.xlu1 %2020 }
 0xa72   : > { %2864 = vmatmul.msk.bf16.vlgmr.msra.gmra.mxu0 %vm1358_vm0, %v2021_v17 }
 0xa84   : > { %1828 = vrot.lane.b32.xlu0 %v4193_v33, %s3663_s11  ;;  %v1332_v33 = vunpack.c.l.bf16 %v1331_v29 }
 0xadb   : > { %v1887_v19 = vpop.xlane.xlu0 %1886 }
 0xadc   : > { %v1888_v20 = vadd.f32 1e-06, %v1887_v19 }
 0xade   : > { %3175 = vrcp.f32 %v1888_v20  ;;  %v2949_v20 = vld [vmem:[%s4452_s24 + $0x8] sm:$0xff] }
 0xae3   : > { %v1822_v21 = vpop.xlane.xlu0 %1821 }
 0xae4   : > { %v3176_v22 = vpop.eup %3175  ;;  %v1823_v23 = vadd.f32 1e-06, %v1822_v21  ;;  %v2948_v21 = vld [vmem:[%s4452_s24] sm:$0xff] }
 0xae5   : > { %v4223_v25 = vmul.f32 %v3176_v22, %v1884_v11 }
 0xae6   : > { %3177 = vrcp.f32 %v1823_v23  ;;  %v2951_v23 = vld [vmem:[%s4452_s24 + $0x18] sm:$0xff] }
 0xae7   : > { %v1897_v26 = vpack.c.bf16 %v4223_v25, %v4223_v25  ;;  %2168 = vmatpush.bf16.msrb.mxu0 %v2951_v23 }
 0xae9   : > { %2845 = vmatmul.msk.bf16.vlgmr.msrb.gmra.mxu1 %vm1812_vm10, %v1897_v26 }
 0xaec   : > { %v3178_v27 = vpop.eup %3177 }
 0xaed   : > { %v1825_v28 = vmul.f32 %v3178_v27, %v1819_v15 }
 0xaef   : > { %v2037_v30 = vpop.f32.mrf.mxu0  ;;  %1826 = vst.msk [vmem:[%s4232_s16] sm:$0xff] %vm1812_vm10, %v1825_v28  ;;  %v1827_v40 = vpack.c.bf16 %v1825_v28, %v1825_v28 }
 0xaf0   : > { %v2041_v31 = vmul.f32 0.17677669, %v2037_v30 }
 0xaf2   : > { %v2865_v34 = vclamps-f32 %v2041_v31, 15.0 }
 0xaf4   : > { %v2044_v35 = vmul.f32 %v2865_v34, %v1332_v33 }
 0xaf6   : > { %v1829_v36 = vpop.permute.xlu0 %1828  ;;  %v2045_v37 = vsel %vm1428_vm2, %v2044_v35, -inf }
 0xaf7   : > { %v2039_v39 = vpop.f32.mrf.mxu0  ;;  %2046 = vmax.xlane.f32.xlu0 %v2045_v37  ;;  %1841 = vmatpush.bf16.msrb.mxu3 %v1829_v36 }
 0xafa   : > { %2842 = vmatmul.msk.bf16.vlgmr.msrb.gmra.mxu3 %vm1812_vm10, %v1827_v40 }
 0xafb   : > { %1967 = vmatpush.bf16.msra.mxu3 %v2945_v43 }
 0xaff   : > { %1968 = vmatpush.bf16.msra.mxu3 %v2944_v44 }
 0xb66   : > { %v1913_v45 = vpop.f32.mrf.mxu1 }
 0xb67   : > { %v1917_v46 = vpack.c.bf16 %v1913_v45, %v1913_v45  ;;  %v3146_v45 = vld [vmem:[#allocation13] ss:$0 sm:$0xff] }
 0xb69   : > { %2854 = vmatmul.msk.bf16.vlgmr.msrb.gmra.mxu2 %vm1358_vm0, %v1917_v46 }
 0xb6a   : > { %v2047_v47 = vpop.xlane.xlu0 %2046 }
 0xb6b   : > { %v2048_v48 = vsub.f32 %v2044_v35, %v2047_v47  ;;  %v2950_v35 = vld [vmem:[%s4452_s24 + $0x10] sm:$0xff] }
 0xb6c   : > { %2169 = vmatpush.bf16.msrb.mxu0 %v2950_v35  ;;  %v2953_v35 = vld [vmem:[%s4457_s7 + $0x8] sm:$0xff] }
 0xb6d   : > { %v2049_v49 = vmul.f32 1.442695, %v2048_v48 }
 0xb6e   : > { %v1915_v50 = vpop.f32.mrf.mxu1 }
 0xb6f   : > { %3179 = vpow2.f32 %v2049_v49 }
 0xb75   : > { %v3180_v51 = vpop.eup %3179 }
 0xb76   : > { %v2051_v52 = vmul.f32 %v3180_v51, %v1332_v33 }
 0xb78   : > { %v2052_v54 = vsel %vm1428_vm2, %v2051_v52, 0.0 }
 0xb79   : > { %2867 = vmatmul.msk.bf16.vlgmr.msra.gmra.mxu2 %vm1358_vm0, %v4215_v3  ;;  %2053 = vadd.xlane.f32.xlu2 %v2052_v54 }
 0xb7d   : > { %v1843_v57 = vpop.f32.mrf.mxu3 }
 0xb7e   : > { %v1847_v58 = vpack.c.bf16 %v1843_v57, %v1843_v57 }
 0xb80   : > { %2863 = vmatmul.msk.bf16.vlgmr.msra.gmra.mxu3 %vm1358_vm0, %v1847_v58 }
 0xb85   : > { %v1845_v59 = vpop.f32.mrf.mxu3 }
 0xbec   : > { %v1942_v60 = vpop.f32.mrf.mxu2  ;;  %v2054_v9 = vpop.xlane.xlu2 %2053 }
 0xbed   : > { %v2055_v10 = vadd.f32 1e-06, %v2054_v9 }
 0xbf4   : > { %v1944_v61 = vpop.f32.mrf.mxu2 }
 0xbfc   : > { %v2103_v62 = vpop.f32.mrf.mxu2 }
 0xbfd   : > { %v2107_v14 = vmul.f32 0.17677669, %v2103_v62 }
 0xbff   : > { %v2868_v63 = vclamps-f32 %v2107_v14, 15.0 }
 0xc01   : > { %v2110_v0 = vmul.f32 %v2868_v63, %v1332_v33 }
 0xc03   : > { %v1970_v1 = vpop.f32.mrf.mxu3  ;;  %v2111_v2 = vsel %vm1428_vm2, %v2110_v0, -inf }
 0xc04   : > { %v1971_v4 = vadd.f32 %v1970_v1, %v1942_v60  ;;  %2112 = vmax.xlane.f32.xlu1 %v2111_v2  ;;  %v2105_v5 = vpop.f32.mrf.mxu2 }
 0xc06   : > { %v1977_v48 = vadd.f32 %v3146_v45, %v1971_v4 }
 0xc08   : > { %v1978_v51 = vadd.f32 %v1977_v48, %v4188_v24 }
 0xc0b   : > { %v1972_v6 = vpop.f32.mrf.mxu3 }
 0xc1d   : > { %2062 = vrot.lane.b32.xlu1 %v4201_v38, %s3663_s11 }
 0xc77   : > { %v2113_v3 = vpop.xlane.xlu1 %2112 }
 0xc78   : > { %v2114_v7 = vsub.f32 %v2110_v0, %v2113_v3 }
 0xc7a   : > { %v2115_v8 = vmul.f32 1.442695, %v2114_v7 }
 0xc7c   : > { %3181 = vpow2.f32 %v2115_v8 }
 0xc7d   : > { %3183 = vrcp.f32 %v2055_v10 }
 0xc82   : > { %v3182_v11 = vpop.eup %3181 }
 0xc83   : > { %v2117_v12 = vmul.f32 %v3182_v11, %v1332_v33  ;;  %v3184_v15 = vpop.eup %3183 }
 0xc84   : > { %v2057_v16 = vmul.f32 %v3184_v15, %v2051_v52  ;;  %v1979_v52 = vsel %vm1358_vm0, %v1978_v51, 0.0  ;;  %v3148_v15 = vld [vmem:[%s4454_s26] ss:$0 sm:$0xff]  ;;  %s4463_s26 = sld [smem:[#allocation58_spill]] }
 0xc85   : > { %v2118_v13 = vsel %vm1428_vm2, %v2117_v12, 0.0 }
 0xc86   : > { %2119 = vadd.xlane.f32.xlu2 %v2118_v13  ;;  %v2058_v19 = vpack.c.bf16 %v2057_v16, %v2057_v16 }
 0xc8f   : > { %v2063_v17 = vpop.permute.xlu1 %2062 }
 0xc90   : > { %v2068_v18 = vsel %vm1448_vm1, %v2063_v17, 0 }
 0xc91   : > { %2077 = vmatpush.bf16.msra.mxu1 %v2068_v18 }
 0xc94   : > { %2866 = vmatmul.msk.bf16.vlgmr.msra.gmra.mxu1 %vm1428_vm2, %v2058_v19  ;;  %v3149_v19 = vld [vmem:[%s4455_s4] ss:$0 sm:$0xff]  ;;  %s4464_s4 = smov %s4463_s26 }
 0xc95   : > { %2196 = vmatpush.bf16.msrb.mxu1 %v2949_v20  ;;  %s3513_s3 = scalar_lea.hbm %s4464_s4, 16 }
 0xc99   : > { %2197 = vmatpush.bf16.msrb.mxu1 %v2948_v21 }
 0xc9e   : > { %2125 = vrot.lane.b32.xlu2 %v4201_v38, %s3664_s21 }
 0xcf9   : > { %v2120_v22 = vpop.xlane.xlu2 %2119 }
 0xcfa   : > { %v2121_v26 = vadd.f32 1e-06, %v2120_v22 }
 0xcfc   : > { %3185 = vrcp.f32 %v2121_v26 }
 0xd01   : > { %v2126_v27 = vpop.permute.xlu2 %2125 }
 0xd02   : > { %v3186_v28 = vpop.eup %3185  ;;  %v2131_v29 = vsel %vm1448_vm1, %v2126_v27, 0  ;;  %v3150_v27 = vld [vmem:[#allocation15] ss:$0 sm:$0xff] }
 0xd03   : > { %v2123_v30 = vmul.f32 %v3186_v28, %v2117_v12  ;;  %2140 = vmatpush.bf16.msrb.mxu3 %v2131_v29 }
 0xd05   : > { %v2124_v31 = vpack.c.bf16 %v2123_v30, %v2123_v30  ;;  %v3151_v30 = vld [vmem:[%s4456_s2] ss:$0 sm:$0xff]  ;;  %s2925_s2 = sshll.u32 %s3877_s1, 3 }
 0xd07   : > { %2869 = vmatmul.msk.bf16.vlgmr.msrb.gmra.mxu3 %vm1428_vm2, %v2124_v31  ;;  %vm2280_vm2 = vcmask 523264  }
 0xd11   : > { %v2079_v38 = vpop.f32.mrf.mxu1 }
 0xd12   : > { %v2083_v33 = vpack.c.bf16 %v2079_v38, %v2079_v38 }
 0xd14   : > { %2887 = vmatmul.msk.bf16.vlgmr.msrb.gmra.mxu1 %vm1358_vm0, %v2083_v33  ;;  %v2955_v33 = vld [vmem:[%s4457_s7 + $0x18] sm:$0xff] }
 0xd15   : > { %2288 = vmatpush.bf16.msrb.mxu2 %v2955_v33 }
 0xd19   : > { %v2081_v34 = vpop.f32.mrf.mxu1 }
 0xd1a   : > { %v2954_v34 = vld [vmem:[%s4457_s7 + $0x10] sm:$0xff] }
 0xd1b   : > { %2289 = vmatpush.bf16.msrb.mxu2 %v2954_v34 }
 0xd1f   : > { %2290 = vmatpush.bf16.msrb.mxu2 %v2953_v35 }
 0xd8a   : > { %v2142_v36 = vpop.f32.mrf.mxu3 }
 0xd8b   : > { %v2146_v37 = vpack.c.bf16 %v2142_v36, %v2142_v36  ;;  %v2952_v36 = vld [vmem:[%s4457_s7] sm:$0xff] }
 0xd8c   : > { %2291 = vmatpush.bf16.msrb.mxu2 %v2952_v36 }
 0xd8d   : > { %2878 = vmatmul.msk.bf16.vlgmr.msrb.gmra.mxu0 %vm1358_vm0, %v2146_v37 }
 0xd91   : > { %v2199_v39 = vpop.f32.mrf.mxu1 }
 0xd92   : > { %v2144_v40 = vpop.f32.mrf.mxu3 }
 0xd99   : > { %v2201_v41 = vpop.f32.mrf.mxu1 }
 0xd9a   : > { %v3152_v41 = vld [vmem:[%s4458_s9] ss:$0 sm:$0xff]  ;;  %s2451_s9 = scalar_lea.hbm %s4463_s26, %s2925_s2 }
 0xe0a   : > { %v2171_v43 = vpop.f32.mrf.mxu0 }
 0xe0b   : > { %v2200_v44 = vadd.f32 %v2199_v39, %v2171_v43 }
 0xe0d   : > { %v2206_v46 = vadd.f32 %v3147_v42, %v2200_v44 }
 0xe0f   : > { %v2207_v47 = vadd.f32 %v2206_v46, %v4188_v24 }
 0xe11   : > { %v2208_v49 = vsel %vm1358_vm0, %v2207_v47, 0.0 }
 0xe12   : > { %v2173_v50 = vpop.f32.mrf.mxu0  ;;  %2209 = vadd.xlane.f32.xlu0 %v2208_v49 }
 0xe1a   : > { %1980 = vadd.xlane.f32.xlu0 %v1979_v52 }
 0xe85   : > { %v2210_v54 = vpop.xlane.xlu0 %2209 }
 0xe86   : > { %v2211_v57 = vmul.f32 %v2210_v54, %v4152_v32 }
 0xe88   : > { %v2212_v58 = vsub.f32 %v2207_v47, %v2211_v57 }
 0xe8a   : > { %v2213_v59 = vmul.f32 %v2212_v58, %v2212_v58 }
 0xe8c   : > { %v2214_v60 = vsel %vm1358_vm0, %v2213_v59, 0.0 }
 0xe8d   : > { %2215 = vadd.xlane.f32.xlu2 %v2214_v60  ;;  %v1981_v61 = vpop.xlane.xlu0 %1980 }
 0xe8e   : > { %v1982_v62 = vmul.f32 %v1981_v61, %v4152_v32 }
 0xe90   : > { %v1983_v14 = vsub.f32 %v1978_v51, %v1982_v62 }
 0xe92   : > { %v1984_v63 = vmul.f32 %v1983_v14, %v1983_v14 }
 0xe94   : > { %v1985_v0 = vsel %vm1358_vm0, %v1984_v63, 0.0 }
 0xe95   : > { %1986 = vadd.xlane.f32.xlu0 %v1985_v0 }
 0xf00   : > { %v2216_v24 = vpop.xlane.xlu2 %2215 }
 0xf01   : > { %v2217_v1 = vmul.f32 %v2216_v24, %v4152_v32 }
 0xf03   : > { %v2218_v2 = vadd.f32 1e-05, %v2217_v1  ;;  %v3153_v1 = vld [vmem:[%s4460_s12] ss:$0 sm:$0xff]  ;;  %s2455_s12 = sshll.u32 %s2451_s9, 4  ;;  %s2456_s12 = int_to_ptr.hbm [resolvable:$true] %s2455_s12 }
 0xf04   : > { %s3507_s17 = sshra.s32 %s2456_s12, 4  ;;  %s3508_s17 = int_to_ptr.hbm [resolvable:$true] %s3507_s17 }
 0xf05   : > { %3187 = vrsqrt.f32 %v2218_v2  ;;  %vm2225_vm12 = vweird.f32 %v2218_v2  ;;  %p3514_p8 = scmp.lt.s32.totalorder %s3508_s17, %s4464_s4 }
 0xf08   : > { %v1987_v4 = vpop.xlane.xlu0 %1986 }
 0xf09   : > { %v1988_v5 = vmul.f32 %v1987_v4, %v4152_v32 }
 0xf0b   : > { %v3188_v6 = vpop.eup %3187  ;;  %v1989_v3 = vadd.f32 1e-05, %v1988_v5 }
 0xf0c   : > { %v2220_v7 = vmul.f32 %v3188_v6, %v2218_v2  ;;  %vm2226_vm11 = vweird.f32 %v3188_v6 }
 0xf0d   : > { %3189 = vrsqrt.f32 %v1989_v3  ;;  %vm2227_vm13 = vmor %vm2225_vm12, %vm2226_vm11  ;;  %vm1996_vm15 = vweird.f32 %v1989_v3 }
 0xf0e   : > { %v2221_v8 = vmul.f32 %v3188_v6, %v2220_v7  ;;  %v2959_v7 = vld [vmem:[#allocation16 + $0x8] sm:$0xff] }
 0xf0f   : > { %2400 = vmatpush.bf16.msra.mxu0 %v2959_v7 }
 0xf10   : > { %v2222_v9 = vmul.f32 0.5, %v2221_v8  ;;  %v2958_v8 = vld [vmem:[#allocation16] sm:$0xff] }
 0xf12   : > { %v2223_v10 = vsub.f32 1.5, %v2222_v9  ;;  %v3155_v9 = vld [vmem:[%s4462_s22] ss:$0 sm:$0xff]  ;;  %s3509_s22 = scalar_lea.hbm %s3508_s17, 8 }
 0xf13   : > { %v3190_v11 = vpop.eup %3189  ;;  %2401 = vmatpush.bf16.msra.mxu0 %v2958_v8  ;;  %p3510_p5 = scmp.ne.s32.totalorder %s3508_s17, %s3509_s22  ;;  %p3515_p3 = scmp.lt.s32.totalorder %s3513_s3, %s3509_s22 }
 0xf14   : > { %v2224_v12 = vmul.f32 %v3188_v6, %v2223_v10  ;;  %v1991_v13 = vmul.f32 %v3190_v11, %v1989_v3  ;;  %vm1997_vm14 = vweird.f32 %v3190_v11 }
 0xf15   : > { %vm1998_vm1 = vmor %vm1996_vm15, %vm1997_vm14  ;;  %p3511_p7 = pnand %p3510_p5, %p3975_p4  ;;  %p3516_p11 = por %p3515_p3, %p3514_p8 }
 0xf16   : > { %v2228_v16 = vsel %vm2227_vm13, %v3188_v6, %v2224_v12  ;;  %v1992_v17 = vmul.f32 %v3190_v11, %v1991_v13 }
 0xf17   : > { %v2229_v18 = vmul.f32 %v2228_v16, %v2212_v58  ;;  %p3512_p12 = pneg %p3511_p7 }
 0xf18   : > { %v1993_v20 = vmul.f32 0.5, %v1992_v17 }
 0xf19   : > { %v2233_v21 = vmul.f32 %v3148_v15, %v2229_v18  ;;  %p3517_p10 = pnand %p3516_p11, %p3512_p12 }
 0xf1a   : > { %v1994_v22 = vsub.f32 1.5, %v1993_v20 }
 0xf1b   : > { %v2237_v23 = vadd.f32 %v3149_v19, %v2233_v21 }
 0xf1c   : > { %v1995_v26 = vmul.f32 %v3190_v11, %v1994_v22 }
 0xf1d   : > { %2239 = vrot.lane.b32.xlu1 %v2237_v23, %s3664_s21 }
 0xf1e   : > { %v1999_v28 = vsel %vm1998_vm1, %v3190_v11, %v1995_v26 }
 0xf1f   : > { %v2000_v29 = vmul.f32 %v1999_v28, %v1983_v14 }
 0xf21   : > { %v2004_v31 = vmul.f32 %v3150_v27, %v2000_v29 }
 0xf23   : > { %v2008_v38 = vadd.f32 %v3151_v30, %v2004_v31 }
 0xf25   : > { %2414 = vrot.lane.b32.xlu2 %v2008_v38, %s3663_s11  ;;  %s4459_s11 = sld [smem:[#allocation50_spill]] }
 0xf2b   : > { %v2957_v58 = vld [vmem:[%s4459_s11 + $0x8] sm:$0xff] }
 0xf2c   : > { %2362 = vmatpush.bf16.msra.mxu3 %v2957_v58 }
 0xf8f   : > { %v2240_v37 = vpop.permute.xlu1 %2239 }
 0xf90   : > { %v2242_v39 = vsel %vm1358_vm0, %v2008_v38, %v2240_v37 }
 0xf91   : > { %v2251_v40 = vpack.c.bf16 %v2242_v39, %v2242_v39 }
 0xf93   : > { %2904 = vmatmul.msk.bf16.vlgmr.msrb.gmra.mxu2 %vm2280_vm2, %v2251_v40 }
0x1016   : > { %v2293_v42 = vpop.f32.mrf.mxu2 }
0x1017   : > { %v2294_v43 = vadd.f32 %v3152_v41, %v2293_v42 }
0x1019   : > { %v2297_v44 = vmax.f32 %v2294_v43, 0.0 }
0x101b   : > { %v2298_v45 = vmul.f32 %v2297_v44, %v4159_v53 }
0x101d   : > { %v4288_v46 = vadd.f32 %v2298_v45, %v4166_v56 }
0x101e   : > { %v2295_v47 = vpop.f32.mrf.mxu2 }
0x101f   : > { %v2302_v48 = vsel %vm1358_vm0, %v4288_v46, 0.0 }
0x1020   : > { %2303 = vadd.xlane.f32.xlu0 %v2302_v48 }
0x1034   : > { %2410 = vrot.lane.b32.xlu0 %v4162_v55, %s3664_s21  ;;  %v2956_v55 = vld [vmem:[%s4459_s11] sm:$0xff]  ;;  %s4461_s21 = sld [smem:[#allocation56_spill]] }
0x1035   : > { %2363 = vmatpush.bf16.msra.mxu3 %v2956_v55 }
0x103a   : > { %v3154_v5 = vld [vmem:[%s4461_s21] ss:$0 sm:$0xff]  ;;  %s2427_s21 = scalar_lea.sflag [#allocation20], %s4078_s15 }
0x103c   : > { %1892 = vrot.lane.b32.xlu0 %v4223_v25, %s3667_s0  ;;  %s2453_s0 = sshll.u32 %s4232_s16, 4  ;;  %s2454_s0 = int_to_ptr.vmem [resolvable:$true] %s2453_s0 }
0x1093   : > { %v2304_v49 = vpop.xlane.xlu0 %2303 }
0x1094   : > { %v2305_v50 = vmul.f32 %v2304_v49, %v4152_v32 }
0x1096   : > { %v2306_v56 = vsub.f32 %v4288_v46, %v2305_v50 }
0x1098   : > { %v2307_v51 = vmul.f32 %v2306_v56, %v2306_v56 }
0x109a   : > { %v2308_v52 = vsel %vm1358_vm0, %v2307_v51, 0.0 }
0x109b   : > { %2309 = vadd.xlane.f32.xlu1 %v2308_v52 }
0x10a6   : > { %v4298_v54 = vpop.permute.xlu0 %2410 }
0x10ae   : > { %v1893_v57 = vpop.permute.xlu0 %1892 }
0x10af   : > { %1896 = vst.msk [vmem:[%s4232_s16] sm:$0xff] %vm1895_vm3, %v1893_v57 }
0x110e   : > { %v2310_v25 = vpop.xlane.xlu1 %2309 }
0x110f   : > { %v2311_v59 = vmul.f32 %v2310_v25, %v4152_v32 }
0x1111   : > { %v2312_v60 = vadd.f32 1e-05, %v2311_v59 }
0x1113   : > { %3191 = vrsqrt.f32 %v2312_v60  ;;  %vm2319_vm5 = vweird.f32 %v2312_v60 }
0x1119   : > { %v3192_v61 = vpop.eup %3191 }
0x111a   : > { %v2314_v62 = vmul.f32 %v3192_v61, %v2312_v60  ;;  %vm2320_vm4 = vweird.f32 %v3192_v61 }
0x111b   : > { %vm2321_vm6 = vmor %vm2319_vm5, %vm2320_vm4 }
0x111c   : > { %v2315_v14 = vmul.f32 %v3192_v61, %v2314_v62 }
0x111e   : > { %v2316_v63 = vmul.f32 0.5, %v2315_v14 }
0x1120   : > { %v2317_v0 = vsub.f32 1.5, %v2316_v63 }
0x1122   : > { %v2318_v24 = vmul.f32 %v3192_v61, %v2317_v0 }
0x1124   : > { %v2322_v2 = vsel %vm2321_vm6, %v3192_v61, %v2318_v24 }
0x1125   : > { %v2323_v4 = vmul.f32 %v2322_v2, %v2306_v56 }
0x1127   : > { %v2327_v6 = vmul.f32 %v3153_v1, %v2323_v4 }
0x1129   : > { %v2331_v32 = vadd.f32 %v3154_v5, %v2327_v6 }
0x112b   : > { %v2336_v3 = vpack.c.bf16 %v2331_v32, %v2331_v32 }
0x112d   : > { %2913 = vmatmul.msk.bf16.vlgmr.msra.gmra.mxu3 %vm1358_vm0, %v2336_v3 }
0x11b0   : > { %v2365_v10 = vpop.f32.mrf.mxu3 }
0x11b1   : > { %v2366_v11 = vadd.f32 %v3155_v9, %v2365_v10 }
0x11b3   : > { %v2369_v12 = vmax.f32 %v2366_v11, 0.0 }
0x11b5   : > { %v2374_v13 = vpack.c.bf16 %v2369_v12, %v2369_v12 }
0x11b7   : > { %2922 = vmatmul.msk.bf16.vlgmr.msra.gmra.mxu0 %vm1358_vm0, %v2374_v13 }
0x11b8   : > { %v2367_v15 = vpop.f32.mrf.mxu3 }
0x11b9   : > { %3520 = shalt.err (!%p3517_p10)
}
0x11ba   : > { %s4465_s1 = sld [smem:[#allocation52_spill]]  ;;  %s4467_s9 = sshll.u32 %s4078_s15, 3  ;;  %vm2419_vm7 = vcmask 785408   ;;  %v2415_v21 = vpop.permute.xlu2 %2414 }
0x11bb   : > { %s4466_s16 = sld [smem:[#allocation57_spill]]  ;;  %s1297_s5 = scalar_lea.vmem [#allocation18], %s4467_s9 }
0x11bc   : > { %2997 = dma.vmem_to_hbm [thread:$0]  (%p3975_p4), %s2454_s0, 128, %s2456_s12, %s2427_s21  }
0x11bd   : > { %s2439_s17 = sshll.u32 %s1297_s5, 4  ;;  %s2440_s17 = int_to_ptr.vmem [resolvable:$true] %s2439_s17 }
0x11c0   : > { %v3156_v16 = vld [vmem:[%s4465_s1] ss:$0 sm:$0xff] }
0x11c1   : > { %s2437_s26 = scalar_lea.hbm %s4466_s16, %s2925_s2  ;;  %s2422_s2 = scalar_lea.sflag [#allocation4], %s4078_s15 }
0x11c2   : > { %s2441_s3 = sshll.u32 %s2437_s26, 4  ;;  %s3541_s21 = scalar_lea.hbm %s4466_s16, 16  ;;  %s2442_s3 = int_to_ptr.hbm [resolvable:$true] %s2441_s3 }
0x11c3   : > { %s3535_s0 = sshra.s32 %s2442_s3, 4  ;;  %s3536_s0 = int_to_ptr.hbm [resolvable:$true] %s3535_s0 }
0x11c4   : > { %s3537_s12 = scalar_lea.hbm %s3536_s0, 8  ;;  %p3542_p0 = scmp.lt.s32.totalorder %s3536_s0, %s4466_s16 }
0x11c5   : > { %p3538_p13 = scmp.ne.s32.totalorder %s3536_s0, %s3537_s12  ;;  %p3543_p2 = scmp.lt.s32.totalorder %s3541_s21, %s3537_s12 }
0x11c7   : > { %p3539_p9 = pnand %p3538_p13, %p3975_p4  ;;  %p3544_p6 = por %p3543_p2, %p3542_p0 }
0x11c9   : > { %p3540_p1 = pneg %p3539_p9 }
0x11cb   : > { %p3545_p5 = pnand %p3544_p6, %p3540_p1 }
0x1234   : > { %v2403_v17 = vpop.f32.mrf.mxu0 }
0x1235   : > { %v2404_v18 = vadd.f32 %v3156_v16, %v2403_v17 }
0x1237   : > { %v2407_v19 = vmul.f32 %v2404_v18, %v4159_v53 }
0x1239   : > { %v2408_v20 = vadd.f32 %v2407_v19, %v4288_v46 }
0x123b   : > { %v2417_v22 = vsel %vm1358_vm0, %v2408_v20, %v4298_v54 }
0x123c   : > { %v2405_v23 = vpop.f32.mrf.mxu0  ;;  %v2418_v26 = vsel %vm2280_vm2, %v2417_v22, %v2415_v21 }
0x123d   : > { %2420 = vst.msk [vmem:[%s1297_s5] sm:$0xff] %vm2419_vm7, %v2418_v26 }
0x123e   : > { %3548 = shalt.err (!%p3545_p5)
}
0x123f   : > { %2996 = dma.vmem_to_hbm [thread:$0]  (%p3975_p4), %s2440_s17, 128, %s2442_s3, %s2422_s2  }
0x1240 PF: > { %s4468_s22 = sld [smem:[#allocation59_spill]]  ;;  %p4471_p12 = scmp.ge.s32.totalorder %s3615_s28, 2 }
0x1241   : > { %s4469_s5 = sld [smem:[#allocation61_spill]] }
0x1246   : > { %s2467_s15 = sand.u32 1, %s4468_s22  }
0x1247   : > { %p4470_p7 = scmp.ne.s32.totalorder %s4469_s5, 0  ;;  %s2468_s1 = scalar_lea.sflag [#allocation4], %s2467_s15 }
0x1249   : > { %p3033_p8 = pnand %p4471_p12, %p4470_p7 }
0x124b   : > { %p3034_p3 = pneg %p3033_p8 }
0x124d   : > { %3594 = dma.done.wait (%p3034_p3), %s2468_s1, 128  }
0x124e   : > { %3596 = vsyncadd (%p3034_p3), %s2468_s1, 4294967168  ;;  %s2478_s26 = scalar_lea.sflag [#allocation20], %s2467_s15 }
0x124f   : > { %3598 = dma.done.wait (%p3034_p3), %s2478_s26, 128  }
0x1250   : > { %3600 = vsyncadd (%p3034_p3), %s2478_s26, 4294967168  ;;  %s4472_s28 = sld [smem:[#allocation62_spill]]  ;;  %s4475_s22 = smov %s3607_s23 }
0x1251   : > { %s4473_s9 = sld [smem:[#allocation60_spill]] }
0x1252   : > { %s4474_s26 = sld [smem:[#allocation63_spill]] }
0x1256   : > { %p90_p4 = scmp.ge.s32.totalorder %s4472_s28, 4  }
0x1257   : > { %s4476_s23 = smov %s4473_s9 }
0x1258   :  { %92 = sbr.rel (!%p90_p4) target bundleno = 82 (0x52), region = 307 }
0x125d   :  { %2484 = vsyncpa [#allocation3], 1 }
0x125e   :  { %2486 = vsyncpa [#allocation3 + $0x1], 1 }
0x125f   :  { %2487 = vsyncpa [#allocation6], 1 }
0x1260   :  { %2488 = vsyncpa [#allocation11], 1 }
0x1261   :  { %2489 = vsyncpa [#allocation14], 1 }
0x1262   :  { %2490 = vsyncpa [#allocation17], 1 }
0x1263   :  { %2491 = vsyncpa [#allocation4], 1 }
0x1264   :  { %2493 = vsyncpa [#allocation4 + $0x1], 1 }
0x1265   :  { %2494 = vsyncpa [#allocation20], 1 }
0x1266   :  { %2496 = vsyncpa [#allocation20 + $0x1], 1 }

</bundles_post_ra>
